<compile_context>
chip_gen: v7x
topology: tpu7x:2x2x1
jax: 0.10.0
libtpu: 0.0.40
codegen_flags: <defaults>
</compile_context>

<pallas_src>
import functools

import jax
import jax.numpy as jnp
import numpy as np
from jax.experimental import pallas as pl
from jax.experimental.pallas import tpu as pltpu

EPS = 1e-5
GROUPS = 8
HALO = 3          # Conv1d kernel 7, "same" padding = 3
WPAD = 128        # halo window pad (multiple of 128 so rolls/slices stay lane aligned)


# --------------------------------------------------------------------------
# in-kernel helpers
# --------------------------------------------------------------------------
def _silu(v):
    return v * jax.nn.sigmoid(v)


def _tile_channel_stats(v):
    """Per-channel partial stats of a (C, TN) tile -> (3C, 1).

    Returns [sum, M2 (centred at the per-channel tile mean), tile_mean**2].
    The wrapper combines these across tiles/channels with the law of total
    variance, avoiding the numerically fragile E[x^2] - E[x]^2 form.
    """
    tn = v.shape[1]
    s_c = jnp.sum(v, axis=1, keepdims=True)               # (C, 1)
    mu_c = s_c * (1.0 / tn)
    d = v - mu_c
    m2_c = jnp.sum(d * d, axis=1, keepdims=True)
    return jnp.concatenate([s_c, m2_c, mu_c * mu_c], axis=0)


def _masked_act(win, a, b, j, tn, n_total):
    """Folded GroupNorm affine + SiLU on a haloed window, zeroed outside [0, N).

    win column q corresponds to global sequence position (j*tn + q - HALO);
    positions outside the sequence must be exactly zero (conv "same" padding
    is applied to the post-activation tensor in the PyTorch module).
    """
    act = _silu(win * a + b)
    q = jax.lax.broadcasted_iota(jnp.int32, act.shape, 1)
    gpos = q + (j * tn - HALO)
    return jnp.where((gpos >= 0) & (gpos < n_total), act, 0.0)


def _stacked_taps(act, tn):
    """Build the (7*C, TN) stacked conv operand from a haloed activation tile.

    act: (C, TN + WPAD) f32, column q = global position (tile_start + q - 3).
    Tap k needs column (t + k): roll left by k through the XLU + lane-aligned
    slice (instead of pad + unaligned slices, which force VMEM relayouts).
    The stacked operand feeds a single bf16 MXU matmul with K = 7*C.
    """
    width = act.shape[1]
    taps = []
    for k in range(7):
        r = act if k == 0 else pltpu.roll(act, shift=width - k, axis=1)
        taps.append(r[:, :tn])
    return jnp.concatenate(taps, axis=0).astype(jnp.bfloat16)


# --------------------------------------------------------------------------
# pass 1: GroupNorm-1 partial stats + GlobalContext online-softmax pooling
# --------------------------------------------------------------------------
def _stats_gca_kernel(x_ref, wk_ref, stats_ref, pooled_ref, m_ref, l_ref, acc_ref):
    j = pl.program_id(1)
    nt = pl.num_programs(1)

    xt = x_ref[0]                                          # (cin, TN) f32

    @pl.when(j == 0)
    def _init():
        stats_ref[...] = jnp.zeros_like(stats_ref)
        m_ref[...] = jnp.full_like(m_ref, -jnp.inf)
        l_ref[...] = jnp.zeros_like(l_ref)
        acc_ref[...] = jnp.zeros_like(acc_ref)

    # partial GroupNorm statistics of x (per channel, tile-centred)
    stats_ref[0] += _tile_channel_stats(xt)

    # GlobalContext: ctx = to_k(x); softmax over N; pooled = x @ softmax(ctx).
    # (to_k bias is dropped: softmax is shift invariant.)  Online softmax so a
    # single pass over the N tiles suffices.
    ctx = jnp.sum(xt * wk_ref[...], axis=0, keepdims=True)  # (1, TN)
    m_t = jnp.max(ctx, axis=1, keepdims=True)
    m_new = jnp.maximum(m_ref[...], m_t)
    alpha = jnp.exp(m_ref[...] - m_new)
    e = jnp.exp(ctx - m_new)
    l_ref[...] = l_ref[...] * alpha + jnp.sum(e, axis=1, keepdims=True)
    acc_ref[...] = acc_ref[...] * alpha + jnp.sum(xt * e, axis=1, keepdims=True)
    m_ref[...] = m_new

    @pl.when(j == nt - 1)
    def _finalize():
        pooled_ref[0] = acc_ref[...] * pl.reciprocal(l_ref[...], approx=True)


# --------------------------------------------------------------------------
# pass 2: block1 (GN1 affine folded -> SiLU -> Conv1d(7)) + GN2 partial stats
# --------------------------------------------------------------------------
def _block1_kernel(xh_ref, a1_ref, b1_ref, w1_ref, bc1_ref, h1_ref, stats_ref):
    j = pl.program_id(1)
    tn = h1_ref.shape[2]
    n_total = pl.num_programs(1) * tn

    @pl.when(j == 0)
    def _init():
        stats_ref[...] = jnp.zeros_like(stats_ref)

    act = _masked_act(xh_ref[0, 0], a1_ref[0], b1_ref[0], j, tn, n_total)
    stacked = _stacked_taps(act, tn)                       # (7*cin, TN) bf16
    h1 = jnp.dot(w1_ref[...], stacked,
                 preferred_element_type=jnp.float32) + bc1_ref[...]
    h1_ref[0] = h1

    # partial GroupNorm statistics of h1 (for block2's norm)
    stats_ref[0] += _tile_channel_stats(h1)


# --------------------------------------------------------------------------
# pass 3: block2 conv + GCA gate + 1x1 residual conv
# --------------------------------------------------------------------------
def _block2_kernel(hh_ref, x_ref, a2_ref, b2_ref, gate_ref,
                   w2_ref, bc2_ref, wr_ref, br_ref, o_ref):
    j = pl.program_id(1)
    tn = o_ref.shape[2]
    n_total = pl.num_programs(1) * tn

    # GN2 * (scale+1) + shift folded into a2/b2, then SiLU, then Conv1d(7).
    act = _masked_act(hh_ref[0, 0], a2_ref[0], b2_ref[0], j, tn, n_total)
    stacked = _stacked_taps(act, tn)                       # (7*dout, TN) bf16
    h2 = jnp.dot(w2_ref[...], stacked,
                 preferred_element_type=jnp.float32) + bc2_ref[...]

    # 1x1 residual conv on x (bf16 MXU) and GCA squeeze-excite gate.
    res = jnp.dot(wr_ref[...], x_ref[0].astype(jnp.bfloat16),
                  preferred_element_type=jnp.float32) + br_ref[...]
    o_ref[0] = (h2 * gate_ref[0] + res).astype(o_ref.dtype)


# --------------------------------------------------------------------------
# wrapper
# --------------------------------------------------------------------------
def _windows(a, tn):
    """Overlapping haloed windows: (B, C, N) -> (B, NT, C, TN + WPAD).

    Window j, column q corresponds to global position j*tn + q - HALO
    (zero padded outside the sequence).
    """
    b, c, n = a.shape
    nt = n // tn
    ap = jnp.pad(a, ((0, 0), (0, 0), (HALO, WPAD - HALO)))
    return jnp.stack([ap[:, :, j * tn: j * tn + tn + WPAD] for j in range(nt)],
                     axis=1)


def _finalize_group_stats(stats, groups, tn, n):
    """Combine per-(tile, channel) partial stats into per-channel mean / rstd."""
    b, three_c, _ = stats.shape
    c = three_c // 3
    gs = c // groups
    s = stats[:, :c, 0]
    m2 = stats[:, c:2 * c, 0]
    msq = stats[:, 2 * c:, 0]
    cnt = gs * n
    sg = jnp.sum(s.reshape(b, groups, gs), axis=-1)
    m2g = jnp.sum(m2.reshape(b, groups, gs), axis=-1)
    msqg = jnp.sum(msq.reshape(b, groups, gs), axis=-1)
    mean_g = sg / cnt
    var_g = (m2g + tn * msqg) / cnt - mean_g * mean_g      # law of total variance
    rstd_g = jax.lax.rsqrt(var_g + EPS)
    mean_c = jnp.repeat(mean_g, gs, axis=1)                # (B, C)
    rstd_c = jnp.repeat(rstd_g, gs, axis=1)
    return mean_c, rstd_c


@functools.partial(jax.jit, static_argnames=("tile_n",))
def residual_block_v2(x, time_emb, params, tile_n=128):
    B, cin, n = x.shape
    dout = params["wc1"].shape[0]
    assert n % tile_n == 0 and tile_n % 128 == 0
    assert cin % GROUPS == 0 and dout % GROUPS == 0
    nt = n // tile_n
    f32, bf16 = jnp.float32, jnp.bfloat16

    cparams = pltpu.CompilerParams(
        dimension_semantics=("parallel", "arbitrary"),
        vmem_limit_bytes=64 * 1024 * 1024)

    # ---------------- pass 1: GN1 stats + GlobalContext pooling ------------
    wk_col = params["wk"].reshape(cin, 1).astype(f32)
    stats1, pooled = pl.pallas_call(
        _stats_gca_kernel,
        out_shape=(jax.ShapeDtypeStruct((B, 3 * cin, 1), f32),
                   jax.ShapeDtypeStruct((B, cin, 1), f32)),
        grid=(B, nt),
        in_specs=[
            pl.BlockSpec((1, cin, tile_n), lambda b, j: (b, 0, j)),
            pl.BlockSpec(memory_space=pltpu.MemorySpace.VMEM),
        ],
        out_specs=(pl.BlockSpec((1, 3 * cin, 1), lambda b, j: (b, 0, 0)),
                   pl.BlockSpec((1, cin, 1), lambda b, j: (b, 0, 0))),
        scratch_shapes=[pltpu.VMEM((1, 1), f32),
                        pltpu.VMEM((1, 1), f32),
                        pltpu.VMEM((cin, 1), f32)],
        compiler_params=cparams,
        cost_estimate=pl.CostEstimate(
            flops=6 * B * cin * n, transcendentals=2 * B * n,
            bytes_accessed=4 * B * cin * n),
    )(x, wk_col)

    # small per-(batch, channel) coefficient math done in XLA
    mean1, rstd1 = _finalize_group_stats(stats1, GROUPS, tile_n, n)    # (B, cin)
    a1 = params["g1"][None, :] * rstd1
    b1 = params["be1"][None, :] - mean1 * a1

    t = _silu(time_emb) @ params["wt"].T + params["bt"][None, :]       # time MLP
    scale, shift = t[:, :dout], t[:, dout:]

    g = _silu(pooled[:, :, 0] @ params["wg1"].T + params["bg1"][None, :])
    gate = jax.nn.sigmoid(g @ params["wg2"].T + params["bg2"][None, :])  # (B, dout)

    # ---------------- pass 2: block1 conv + GN2 stats -----------------------
    w1s = jnp.transpose(params["wc1"], (0, 2, 1)).reshape(dout, 7 * cin).astype(bf16)
    bc1 = params["bc1"].reshape(dout, 1).astype(f32)
    xh = _windows(x, tile_n)                               # (B, NT, cin, TN+WPAD)

    h1, stats2 = pl.pallas_call(
        _block1_kernel,
        out_shape=(jax.ShapeDtypeStruct((B, dout, n), f32),
                   jax.ShapeDtypeStruct((B, 3 * dout, 1), f32)),
        grid=(B, nt),
        in_specs=[
            pl.BlockSpec((1, 1, cin, tile_n + WPAD), lambda b, j: (b, j, 0, 0)),
            pl.BlockSpec((1, cin, 1), lambda b, j: (b, 0, 0)),
            pl.BlockSpec((1, cin, 1), lambda b, j: (b, 0, 0)),
            pl.BlockSpec(memory_space=pltpu.MemorySpace.VMEM),
            pl.BlockSpec(memory_space=pltpu.MemorySpace.VMEM),
        ],
        out_specs=(pl.BlockSpec((1, dout, tile_n), lambda b, j: (b, 0, j)),
                   pl.BlockSpec((1, 3 * dout, 1), lambda b, j: (b, 0, 0))),
        compiler_params=cparams,
        cost_estimate=pl.CostEstimate(
            flops=2 * B * n * dout * 7 * cin, transcendentals=B * cin * n,
            bytes_accessed=4 * B * n * (cin + 2 * dout)),
    )(xh, a1[:, :, None], b1[:, :, None], w1s, bc1)

    mean2, rstd2 = _finalize_group_stats(stats2, GROUPS, tile_n, n)    # (B, dout)
    g2r = params["g2"][None, :] * rstd2
    a2 = (scale + 1.0) * g2r
    b2 = (scale + 1.0) * (params["be2"][None, :] - mean2 * g2r) + shift

    # ---------------- pass 3: block2 conv + gate + residual -----------------
    w2s = jnp.transpose(params["wc2"], (0, 2, 1)).reshape(dout, 7 * dout).astype(bf16)
    bc2 = params["bc2"].reshape(dout, 1).astype(f32)
    wr = params["wr"].astype(bf16)
    br = params["br"].reshape(dout, 1).astype(f32)
    hh = _windows(h1, tile_n)                              # (B, NT, dout, TN+WPAD)

    out = pl.pallas_call(
        _block2_kernel,
        out_shape=jax.ShapeDtypeStruct((B, dout, n), f32),
        grid=(B, nt),
        in_specs=[
            pl.BlockSpec((1, 1, dout, tile_n + WPAD), lambda b, j: (b, j, 0, 0)),
            pl.BlockSpec((1, cin, tile_n), lambda b, j: (b, 0, j)),
            pl.BlockSpec((1, dout, 1), lambda b, j: (b, 0, 0)),
            pl.BlockSpec((1, dout, 1), lambda b, j: (b, 0, 0)),
            pl.BlockSpec((1, dout, 1), lambda b, j: (b, 0, 0)),
            pl.BlockSpec(memory_space=pltpu.MemorySpace.VMEM),
            pl.BlockSpec(memory_space=pltpu.MemorySpace.VMEM),
            pl.BlockSpec(memory_space=pltpu.MemorySpace.VMEM),
            pl.BlockSpec(memory_space=pltpu.MemorySpace.VMEM),
        ],
        out_specs=pl.BlockSpec((1, dout, tile_n), lambda b, j: (b, 0, j)),
        compiler_params=cparams,
        cost_estimate=pl.CostEstimate(
            flops=2 * B * n * dout * (7 * dout + cin),
            transcendentals=B * dout * n,
            bytes_accessed=4 * B * n * (cin + 3 * dout)),
    )(hh, x, a2[:, :, None], b2[:, :, None], gate[:, :, None], w2s, bc2, wr, br)

    return out


# --------------------------------------------------------------------------
# parameters + pure-JAX reference (PyTorch module semantics, fp32)
# --------------------------------------------------------------------------
def init_params(key, cin, dout, demb):
    inner = max(3, dout // 2)
    ks = jax.random.split(key, 18)

    def nrm(k, shape, s=0.1):
        return jax.random.normal(k, shape, jnp.float32) * s

    return {
        "wt": nrm(ks[0], (2 * dout, demb)),
        "bt": nrm(ks[1], (2 * dout,)),
        "g1": 1.0 + nrm(ks[2], (cin,)),
        "be1": nrm(ks[3], (cin,)),
        "wc1": nrm(ks[4], (dout, cin, 7)),       # PyTorch Conv1d (O, I, K)
        "bc1": nrm(ks[5], (dout,)),
        "g2": 1.0 + nrm(ks[6], (dout,)),
        "be2": nrm(ks[7], (dout,)),
        "wc2": nrm(ks[8], (dout, dout, 7)),
        "bc2": nrm(ks[9], (dout,)),
        "wk": nrm(ks[10], (1, cin)),
        "bk": nrm(ks[11], (1,)),
        "wg1": nrm(ks[12], (inner, cin)),
        "bg1": nrm(ks[13], (inner,)),
        "wg2": nrm(ks[14], (dout, inner)),
        "bg2": nrm(ks[15], (dout,)),
        "wr": nrm(ks[16], (dout, cin)),
        "br": nrm(ks[17], (dout,)),
    }


def reference(x, time_emb, p):
    B, cin, n = x.shape
    dout = p["wc1"].shape[0]

    def gn(v, gamma, beta):
        b_, c, nn = v.shape
        vg = v.reshape(b_, GROUPS, c // GROUPS, nn)
        mean = vg.mean(axis=(2, 3), keepdims=True)
        var = ((vg - mean) ** 2).mean(axis=(2, 3), keepdims=True)
        vn = ((vg - mean) / jnp.sqrt(var + EPS)).reshape(b_, c, nn)
        return vn * gamma[None, :, None] + beta[None, :, None]

    def conv7(v, w, b):
        out = jax.lax.conv_general_dilated(
            v, w, window_strides=(1,), padding=((3, 3),),
            dimension_numbers=("NCH", "OIH", "NCH"))
        return out + b[None, :, None]

    te = jax.nn.silu(time_emb) @ p["wt"].T + p["bt"][None, :]
    scale = te[:, :dout, None]
    shift = te[:, dout:, None]

    h = conv7(jax.nn.silu(gn(x, p["g1"], p["be1"])), p["wc1"], p["bc1"])
    h = gn(h, p["g2"], p["be2"])
    h = h * (scale + 1.0) + shift
    h = conv7(jax.nn.silu(h), p["wc2"], p["bc2"])

    ctx = jnp.einsum("oc,bcn->bon", p["wk"], x) + p["bk"][None, :, None]
    sm = jax.nn.softmax(ctx, axis=-1)
    pooled = jnp.einsum("bin,bjn->bij", x, sm)                    # (B, cin, 1)
    g = jnp.einsum("oi,bij->boj", p["wg1"], pooled) + p["bg1"][None, :, None]
    g = jnp.einsum("oi,bij->boj", p["wg2"], jax.nn.silu(g)) + p["bg2"][None, :, None]
    gate = jax.nn.sigmoid(g)

    res = jnp.einsum("oc,bcn->bon", p["wr"], x) + p["br"][None, :, None]
    return h * gate + res


if __name__ == "__main__":
    key = jax.random.PRNGKey(0)
    kx, kt, kp = jax.random.split(key, 3)

    B, cin, dout, demb, n = 2, 8, 16, 32, 256     # two sequence tiles of 128
    x = jax.random.normal(kx, (B, cin, n), jnp.float32)
    time_emb = jax.random.normal(kt, (B, demb), jnp.float32)
    params = init_params(kp, cin, dout, demb)

    out = jax.block_until_ready(residual_block_v2(x, time_emb, params))
    ref = jax.block_until_ready(reference(x, time_emb, params))

    assert out.shape == (B, dout, n)
    out_np, ref_np = np.asarray(out), np.asarray(ref)
    # Kernel runs the two 7-tap convs + residual conv in bf16 on the MXU, so
    # compare against the fp32 reference with bf16-appropriate tolerances:
    # a tight aggregate (relative L2) check plus a loose element-wise bound.
    rel_l2 = np.linalg.norm(out_np - ref_np) / np.linalg.norm(ref_np)
    assert rel_l2 < 2e-2, f"relative L2 error too large: {rel_l2}"
    np.testing.assert_allclose(out_np, ref_np, rtol=5e-2, atol=5e-2)

    print("KERNEL_OK")
</pallas_src>

<mosaic_0001>
module attributes {stable_mosaic.version = 11 : i64} {
  func.func @_stats_gca_kernel(%arg0: i32, %arg1: i32, %arg2: memref<1x8x128xf32, #tpu.memory_space<vmem>>, %arg3: memref<8x1xf32, #tpu.memory_space<vmem>>, %arg4: memref<1x24x1xf32, #tpu.memory_space<vmem>>, %arg5: memref<1x8x1xf32, #tpu.memory_space<vmem>>, %arg6: memref<1x1xf32, #tpu.memory_space<vmem>>, %arg7: memref<1x1xf32, #tpu.memory_space<vmem>>, %arg8: memref<8x1xf32, #tpu.memory_space<vmem>>) attributes {dimension_semantics = [#tpu.dimension_semantics<parallel>, #tpu.dimension_semantics<arbitrary>], iteration_bounds = array<i64: 2, 2>, scalar_prefetch = 0 : i64, scratch_operands = 3 : i64, tpu.core_type = #tpu.core_type<tc>, window_params = [{transform_indices = @transform_0, window_bounds = array<i64: 1, 8, 128>}, {pipeline_mode = #tpu.pipeline_mode<synchronous>, transform_indices = @transform_1, window_bounds = array<i64: 8, 1>}, {transform_indices = @transform_2, window_bounds = array<i64: 1, 24, 1>}, {transform_indices = @transform_3, window_bounds = array<i64: 1, 8, 1>}]} {
    %c0 = arith.constant 0 : index
    %c0_0 = arith.constant 0 : index
    %c0_1 = arith.constant 0 : index
    %0 = vector.load %arg2[%c0, %c0_0, %c0_1] : memref<1x8x128xf32, #tpu.memory_space<vmem>>, vector<1x8x128xf32>
    %1 = vector.shape_cast %0 : vector<1x8x128xf32> to vector<8x128xf32>
    %c0_i32 = arith.constant 0 : i32
    %2 = arith.cmpi eq, %arg1, %c0_i32 : i32
    %3 = arith.extui %2 : i1 to i32
    %c0_i32_2 = arith.constant 0 : i32
    %4 = arith.cmpi ne, %3, %c0_i32_2 : i32
    scf.if %4 {
      %cst_32 = arith.constant 0.000000e+00 : f32
      %56 = vector.broadcast %cst_32 : f32 to vector<1x24x1xf32>
      %c0_33 = arith.constant 0 : index
      %c0_34 = arith.constant 0 : index
      %c0_35 = arith.constant 0 : index
      %57 = vector.load %arg4[%c0_33, %c0_34, %c0_35] : memref<1x24x1xf32, #tpu.memory_space<vmem>>, vector<1x24x1xf32>
      tpu.vector_store %arg4[%c0_33, %c0_34, %c0_35], %56 {strides = array<i32>} : memref<1x24x1xf32, #tpu.memory_space<vmem>>, vector<1x24x1xf32>,
      %cst_36 = arith.constant 0xFF800000 : f32
      %58 = vector.broadcast %cst_36 : f32 to vector<1x1xf32>
      %c0_37 = arith.constant 0 : index
      %c0_38 = arith.constant 0 : index
      %59 = vector.load %arg6[%c0_37, %c0_38] : memref<1x1xf32, #tpu.memory_space<vmem>>, vector<1x1xf32>
      tpu.vector_store %arg6[%c0_37, %c0_38], %58 {strides = array<i32>} : memref<1x1xf32, #tpu.memory_space<vmem>>, vector<1x1xf32>,
      %cst_39 = arith.constant 0.000000e+00 : f32
      %60 = vector.broadcast %cst_39 : f32 to vector<1x1xf32>
      %c0_40 = arith.constant 0 : index
      %c0_41 = arith.constant 0 : index
      %61 = vector.load %arg7[%c0_40, %c0_41] : memref<1x1xf32, #tpu.memory_space<vmem>>, vector<1x1xf32>
      tpu.vector_store %arg7[%c0_40, %c0_41], %60 {strides = array<i32>} : memref<1x1xf32, #tpu.memory_space<vmem>>, vector<1x1xf32>,
      %cst_42 = arith.constant 0.000000e+00 : f32
      %62 = vector.broadcast %cst_42 : f32 to vector<8x1xf32>
      %c0_43 = arith.constant 0 : index
      %c0_44 = arith.constant 0 : index
      %63 = vector.load %arg8[%c0_43, %c0_44] : memref<8x1xf32, #tpu.memory_space<vmem>>, vector<8x1xf32>
      tpu.vector_store %arg8[%c0_43, %c0_44], %62 {strides = array<i32>} : memref<8x1xf32, #tpu.memory_space<vmem>>, vector<8x1xf32>,
    } else {
    }
    %c0_3 = arith.constant 0 : index
    %c0_4 = arith.constant 0 : index
    %c0_5 = arith.constant 0 : index
    %5 = vector.load %arg4[%c0_3, %c0_4, %c0_5] : memref<1x24x1xf32, #tpu.memory_space<vmem>>, vector<1x24x1xf32>
    %6 = vector.shape_cast %5 : vector<1x24x1xf32> to vector<24x1xf32>
    %cst = arith.constant dense<0.000000e+00> : vector<8xf32>
    %7 = vector.multi_reduction <add>, %1, %cst [1] : vector<8x128xf32> to vector<8xf32>
    %8 = vector.shape_cast %7 : vector<8xf32> to vector<8x1xf32>
    %cst_6 = arith.constant 7.812500e-03 : f32
    %9 = vector.broadcast %cst_6 : f32 to vector<8x1xf32>
    %10 = arith.mulf %8, %9 : vector<8x1xf32>
    %11 = vector.broadcast %10 : vector<8x1xf32> to vector<8x128xf32>
    %12 = arith.subf %1, %11 : vector<8x128xf32>
    %13 = arith.mulf %12, %12 : vector<8x128xf32>
    %cst_7 = arith.constant dense<0.000000e+00> : vector<8xf32>
    %14 = vector.multi_reduction <add>, %13, %cst_7 [1] : vector<8x128xf32> to vector<8xf32>
    %15 = vector.shape_cast %14 : vector<8xf32> to vector<8x1xf32>
    %16 = arith.mulf %10, %10 : vector<8x1xf32>
    %17 = tpu.concatenate %8, %15, %16 in 0 : vector<8x1xf32>, vector<8x1xf32>, vector<8x1xf32> -> vector<24x1xf32>
    %18 = arith.addf %6, %17 : vector<24x1xf32>
    %c0_8 = arith.constant 0 : index
    %c0_9 = arith.constant 0 : index
    %c0_10 = arith.constant 0 : index
    %19 = vector.load %arg4[%c0_8, %c0_9, %c0_10] : memref<1x24x1xf32, #tpu.memory_space<vmem>>, vector<1x24x1xf32>
    %20 = vector.shape_cast %19 : vector<1x24x1xf32> to vector<24x1xf32>
    %21 = vector.shape_cast %18 : vector<24x1xf32> to vector<1x24x1xf32>
    tpu.vector_store %arg4[%c0_8, %c0_9, %c0_10], %21 {strides = array<i32>} : memref<1x24x1xf32, #tpu.memory_space<vmem>>, vector<1x24x1xf32>,
    %c0_11 = arith.constant 0 : index
    %c0_12 = arith.constant 0 : index
    %22 = vector.load %arg3[%c0_11, %c0_12] : memref<8x1xf32, #tpu.memory_space<vmem>>, vector<8x1xf32>
    %23 = vector.broadcast %22 : vector<8x1xf32> to vector<8x128xf32>
    %24 = arith.mulf %1, %23 : vector<8x128xf32>
    %cst_13 = arith.constant dense<0.000000e+00> : vector<128xf32>
    %25 = vector.multi_reduction <add>, %24, %cst_13 [0] : vector<8x128xf32> to vector<128xf32>
    %26 = vector.shape_cast %25 : vector<128xf32> to vector<1x128xf32>
    %cst_14 = arith.constant dense<0xFF800000> : vector<1xf32>
    %27 = vector.multi_reduction <maximumf>, %26, %cst_14 [1] : vector<1x128xf32> to vector<1xf32>
    %28 = vector.shape_cast %27 : vector<1xf32> to vector<1x1xf32>
    %c0_15 = arith.constant 0 : index
    %c0_16 = arith.constant 0 : index
    %29 = vector.load %arg6[%c0_15, %c0_16] : memref<1x1xf32, #tpu.memory_space<vmem>>, vector<1x1xf32>
    %30 = arith.maximumf %29, %28 : vector<1x1xf32>
    %c0_17 = arith.constant 0 : index
    %c0_18 = arith.constant 0 : index
    %31 = vector.load %arg6[%c0_17, %c0_18] : memref<1x1xf32, #tpu.memory_space<vmem>>, vector<1x1xf32>
    %32 = arith.subf %31, %30 : vector<1x1xf32>
    %33 = math.exp %32 : vector<1x1xf32>
    %34 = vector.broadcast %30 : vector<1x1xf32> to vector<1x128xf32>
    %35 = arith.subf %26, %34 : vector<1x128xf32>
    %36 = math.exp %35 : vector<1x128xf32>
    %c0_19 = arith.constant 0 : index
    %c0_20 = arith.constant 0 : index
    %37 = vector.load %arg7[%c0_19, %c0_20] : memref<1x1xf32, #tpu.memory_space<vmem>>, vector<1x1xf32>
    %38 = arith.mulf %37, %33 : vector<1x1xf32>
    %cst_21 = arith.constant dense<0.000000e+00> : vector<1xf32>
    %39 = vector.multi_reduction <add>, %36, %cst_21 [1] : vector<1x128xf32> to vector<1xf32>
    %40 = vector.shape_cast %39 : vector<1xf32> to vector<1x1xf32>
    %41 = arith.addf %38, %40 : vector<1x1xf32>
    %c0_22 = arith.constant 0 : index
    %c0_23 = arith.constant 0 : index
    %42 = vector.load %arg7[%c0_22, %c0_23] : memref<1x1xf32, #tpu.memory_space<vmem>>, vector<1x1xf32>
    tpu.vector_store %arg7[%c0_22, %c0_23], %41 {strides = array<i32>} : memref<1x1xf32, #tpu.memory_space<vmem>>, vector<1x1xf32>,
    %c0_24 = arith.constant 0 : index
    %c0_25 = arith.constant 0 : index
    %43 = vector.load %arg8[%c0_24, %c0_25] : memref<8x1xf32, #tpu.memory_space<vmem>>, vector<8x1xf32>
    %44 = vector.broadcast %33 : vector<1x1xf32> to vector<8x1xf32>
    %45 = arith.mulf %43, %44 : vector<8x1xf32>
    %46 = vector.broadcast %36 : vector<1x128xf32> to vector<8x128xf32>
    %47 = arith.mulf %1, %46 : vector<8x128xf32>
    %cst_26 = arith.constant dense<0.000000e+00> : vector<8xf32>
    %48 = vector.multi_reduction <add>, %47, %cst_26 [1] : vector<8x128xf32> to vector<8xf32>
    %49 = vector.shape_cast %48 : vector<8xf32> to vector<8x1xf32>
    %50 = arith.addf %45, %49 : vector<8x1xf32>
    %c0_27 = arith.constant 0 : index
    %c0_28 = arith.constant 0 : index
    %51 = vector.load %arg8[%c0_27, %c0_28] : memref<8x1xf32, #tpu.memory_space<vmem>>, vector<8x1xf32>
    tpu.vector_store %arg8[%c0_27, %c0_28], %50 {strides = array<i32>} : memref<8x1xf32, #tpu.memory_space<vmem>>, vector<8x1xf32>,
    %c0_29 = arith.constant 0 : index
    %c0_30 = arith.constant 0 : index
    %52 = vector.load %arg6[%c0_29, %c0_30] : memref<1x1xf32, #tpu.memory_space<vmem>>, vector<1x1xf32>
    tpu.vector_store %arg6[%c0_29, %c0_30], %30 {strides = array<i32>} : memref<1x1xf32, #tpu.memory_space<vmem>>, vector<1x1xf32>,
    %c1_i32 = arith.constant 1 : i32
    %53 = arith.cmpi eq, %arg1, %c1_i32 : i32
    %54 = arith.extui %53 : i1 to i32
    %c0_i32_31 = arith.constant 0 : i32
    %55 = arith.cmpi ne, %54, %c0_i32_31 : i32
    scf.if %55 {
      %c0_32 = arith.constant 0 : index
      %c0_33 = arith.constant 0 : index
      %56 = vector.load %arg8[%c0_32, %c0_33] : memref<8x1xf32, #tpu.memory_space<vmem>>, vector<8x1xf32>
      %c0_34 = arith.constant 0 : index
      %c0_35 = arith.constant 0 : index
      %57 = vector.load %arg7[%c0_34, %c0_35] : memref<1x1xf32, #tpu.memory_space<vmem>>, vector<1x1xf32>
      %58 = tpu.reciprocal %57 {approx = true} : vector<1x1xf32> -> vector<1x1xf32>
      %59 = vector.broadcast %58 : vector<1x1xf32> to vector<8x1xf32>
      %60 = arith.mulf %56, %59 : vector<8x1xf32>
      %c0_36 = arith.constant 0 : index
      %c0_37 = arith.constant 0 : index
      %c0_38 = arith.constant 0 : index
      %61 = vector.load %arg5[%c0_36, %c0_37, %c0_38] : memref<1x8x1xf32, #tpu.memory_space<vmem>>, vector<1x8x1xf32>
      %62 = vector.shape_cast %61 : vector<1x8x1xf32> to vector<8x1xf32>
      %63 = vector.shape_cast %60 : vector<8x1xf32> to vector<1x8x1xf32>
      tpu.vector_store %arg5[%c0_36, %c0_37, %c0_38], %63 {strides = array<i32>} : memref<1x8x1xf32, #tpu.memory_space<vmem>>, vector<1x8x1xf32>,
    } else {
    }
    return
  }
  func.func @transform_0(%arg0: i32, %arg1: i32) -> (i32, i32, i32) {
    %c0_i32 = arith.constant 0 : i32
    %c0_i32_0 = arith.constant 0 : i32
    return %arg0, %c0_i32, %arg1 : i32, i32, i32
  }
  func.func @transform_1(%arg0: i32, %arg1: i32) -> (i32, i32) {
    %c0_i32 = arith.constant 0 : i32
    %c0_i32_0 = arith.constant 0 : i32
    %c0_i32_1 = arith.constant 0 : i32
    return %c0_i32, %c0_i32_0 : i32, i32
  }
  func.func @transform_2(%arg0: i32, %arg1: i32) -> (i32, i32, i32) {
    %c0_i32 = arith.constant 0 : i32
    %c0_i32_0 = arith.constant 0 : i32
    %c0_i32_1 = arith.constant 0 : i32
    return %arg0, %c0_i32, %c0_i32_0 : i32, i32, i32
  }
  func.func @transform_3(%arg0: i32, %arg1: i32) -> (i32, i32, i32) {
    %c0_i32 = arith.constant 0 : i32
    %c0_i32_0 = arith.constant 0 : i32
    %c0_i32_1 = arith.constant 0 : i32
    return %arg0, %c0_i32, %c0_i32_0 : i32, i32, i32
  }
}

module attributes {stable_mosaic.version = 11 : i64} {
  func.func @_block1_kernel(%arg0: i32, %arg1: i32, %arg2: memref<1x1x8x256xf32, #tpu.memory_space<vmem>>, %arg3: memref<1x8x1xf32, #tpu.memory_space<vmem>>, %arg4: memref<1x8x1xf32, #tpu.memory_space<vmem>>, %arg5: memref<16x56xbf16, #tpu.memory_space<vmem>>, %arg6: memref<16x1xf32, #tpu.memory_space<vmem>>, %arg7: memref<1x16x128xf32, #tpu.memory_space<vmem>>, %arg8: memref<1x48x1xf32, #tpu.memory_space<vmem>>) attributes {dimension_semantics = [#tpu.dimension_semantics<parallel>, #tpu.dimension_semantics<arbitrary>], iteration_bounds = array<i64: 2, 2>, scalar_prefetch = 0 : i64, scratch_operands = 0 : i64, tpu.core_type = #tpu.core_type<tc>, window_params = [{transform_indices = @transform_0, window_bounds = array<i64: 1, 1, 8, 256>}, {transform_indices = @transform_1, window_bounds = array<i64: 1, 8, 1>}, {transform_indices = @transform_2, window_bounds = array<i64: 1, 8, 1>}, {pipeline_mode = #tpu.pipeline_mode<synchronous>, transform_indices = @transform_3, window_bounds = array<i64: 16, 56>}, {pipeline_mode = #tpu.pipeline_mode<synchronous>, transform_indices = @transform_4, window_bounds = array<i64: 16, 1>}, {transform_indices = @transform_5, window_bounds = array<i64: 1, 16, 128>}, {transform_indices = @transform_6, window_bounds = array<i64: 1, 48, 1>}]} {
    %c0_i32 = arith.constant 0 : i32
    %0 = arith.cmpi eq, %arg1, %c0_i32 : i32
    %1 = arith.extui %0 : i1 to i32
    %c0_i32_0 = arith.constant 0 : i32
    %2 = arith.cmpi ne, %1, %c0_i32_0 : i32
    scf.if %2 {
      %cst_29 = arith.constant 0.000000e+00 : f32
      %71 = vector.broadcast %cst_29 : f32 to vector<1x48x1xf32>
      %c0_30 = arith.constant 0 : index
      %c0_31 = arith.constant 0 : index
      %c0_32 = arith.constant 0 : index
      %72 = vector.load %arg8[%c0_30, %c0_31, %c0_32] : memref<1x48x1xf32, #tpu.memory_space<vmem>>, vector<1x48x1xf32>
      tpu.vector_store %arg8[%c0_30, %c0_31, %c0_32], %71 {strides = array<i32>} : memref<1x48x1xf32, #tpu.memory_space<vmem>>, vector<1x48x1xf32>,
    } else {
    }
    %c0 = arith.constant 0 : index
    %c0_1 = arith.constant 0 : index
    %c0_2 = arith.constant 0 : index
    %c0_3 = arith.constant 0 : index
    %3 = vector.load %arg2[%c0, %c0_1, %c0_2, %c0_3] : memref<1x1x8x256xf32, #tpu.memory_space<vmem>>, vector<1x1x8x256xf32>
    %4 = vector.shape_cast %3 : vector<1x1x8x256xf32> to vector<8x256xf32>
    %c0_4 = arith.constant 0 : index
    %c0_5 = arith.constant 0 : index
    %c0_6 = arith.constant 0 : index
    %5 = vector.load %arg3[%c0_4, %c0_5, %c0_6] : memref<1x8x1xf32, #tpu.memory_space<vmem>>, vector<1x8x1xf32>
    %6 = vector.shape_cast %5 : vector<1x8x1xf32> to vector<8x1xf32>
    %c0_7 = arith.constant 0 : index
    %c0_8 = arith.constant 0 : index
    %c0_9 = arith.constant 0 : index
    %7 = vector.load %arg4[%c0_7, %c0_8, %c0_9] : memref<1x8x1xf32, #tpu.memory_space<vmem>>, vector<1x8x1xf32>
    %8 = vector.shape_cast %7 : vector<1x8x1xf32> to vector<8x1xf32>
    %9 = vector.broadcast %6 : vector<8x1xf32> to vector<8x256xf32>
    %10 = arith.mulf %4, %9 : vector<8x256xf32>
    %11 = vector.broadcast %8 : vector<8x1xf32> to vector<8x256xf32>
    %12 = arith.addf %10, %11 : vector<8x256xf32>
    %13 = arith.negf %12 : vector<8x256xf32>
    %14 = math.exp %13 : vector<8x256xf32>
    %cst = arith.constant 1.000000e+00 : f32
    %15 = vector.broadcast %cst : f32 to vector<8x256xf32>
    %16 = arith.addf %15, %14 : vector<8x256xf32>
    %17 = arith.divf %15, %16 : vector<8x256xf32>
    %18 = arith.mulf %12, %17 : vector<8x256xf32>
    %19 = tpu.iota {dimensions = array<i32: 1>} : vector<8x256xi32>
    %c128_i32 = arith.constant 128 : i32
    %20 = arith.muli %arg1, %c128_i32 : i32
    %c3_i32 = arith.constant 3 : i32
    %21 = arith.subi %20, %c3_i32 : i32
    %22 = vector.broadcast %21 : i32 to vector<8x256xi32>
    %23 = arith.addi %19, %22 : vector<8x256xi32>
    %c0_i32_10 = arith.constant 0 : i32
    %24 = vector.broadcast %c0_i32_10 : i32 to vector<8x256xi32>
    %25 = arith.cmpi sge, %23, %24 : vector<8x256xi32>
    %c256_i32 = arith.constant 256 : i32
    %26 = vector.broadcast %c256_i32 : i32 to vector<8x256xi32>
    %27 = arith.cmpi slt, %23, %26 : vector<8x256xi32>
    %28 = arith.andi %25, %27 : vector<8x256xi1>
    %cst_11 = arith.constant 0.000000e+00 : f32
    %29 = vector.broadcast %cst_11 : f32 to vector<8x256xf32>
    %30 = arith.select %28, %18, %29 : vector<8x256xi1>, vector<8x256xf32>
    %31 = vector.extract_strided_slice %30 {offsets = [0, 0], sizes = [8, 128], strides = [1, 1]} : vector<8x256xf32> to vector<8x128xf32>
    %c255_i32 = arith.constant 255 : i32
    %32 = tpu.dynamic_rotate %30 by %c255_i32 dim 1 : vector<8x256xf32>, i32 -> vector<8x256xf32>
    %33 = vector.extract_strided_slice %32 {offsets = [0, 0], sizes = [8, 128], strides = [1, 1]} : vector<8x256xf32> to vector<8x128xf32>
    %c254_i32 = arith.constant 254 : i32
    %34 = tpu.dynamic_rotate %30 by %c254_i32 dim 1 : vector<8x256xf32>, i32 -> vector<8x256xf32>
    %35 = vector.extract_strided_slice %34 {offsets = [0, 0], sizes = [8, 128], strides = [1, 1]} : vector<8x256xf32> to vector<8x128xf32>
    %c253_i32 = arith.constant 253 : i32
    %36 = tpu.dynamic_rotate %30 by %c253_i32 dim 1 : vector<8x256xf32>, i32 -> vector<8x256xf32>
    %37 = vector.extract_strided_slice %36 {offsets = [0, 0], sizes = [8, 128], strides = [1, 1]} : vector<8x256xf32> to vector<8x128xf32>
    %c252_i32 = arith.constant 252 : i32
    %38 = tpu.dynamic_rotate %30 by %c252_i32 dim 1 : vector<8x256xf32>, i32 -> vector<8x256xf32>
    %39 = vector.extract_strided_slice %38 {offsets = [0, 0], sizes = [8, 128], strides = [1, 1]} : vector<8x256xf32> to vector<8x128xf32>
    %c251_i32 = arith.constant 251 : i32
    %40 = tpu.dynamic_rotate %30 by %c251_i32 dim 1 : vector<8x256xf32>, i32 -> vector<8x256xf32>
    %41 = vector.extract_strided_slice %40 {offsets = [0, 0], sizes = [8, 128], strides = [1, 1]} : vector<8x256xf32> to vector<8x128xf32>
    %c250_i32 = arith.constant 250 : i32
    %42 = tpu.dynamic_rotate %30 by %c250_i32 dim 1 : vector<8x256xf32>, i32 -> vector<8x256xf32>
    %43 = vector.extract_strided_slice %42 {offsets = [0, 0], sizes = [8, 128], strides = [1, 1]} : vector<8x256xf32> to vector<8x128xf32>
    %44 = tpu.concatenate %31, %33, %35, %37, %39, %41, %43 in 0 : vector<8x128xf32>, vector<8x128xf32>, vector<8x128xf32>, vector<8x128xf32>, vector<8x128xf32>, vector<8x128xf32>, vector<8x128xf32> -> vector<56x128xf32>
    %45 = arith.truncf %44 : vector<56x128xf32> to vector<56x128xbf16>
    %c0_12 = arith.constant 0 : index
    %c0_13 = arith.constant 0 : index
    %46 = vector.load %arg5[%c0_12, %c0_13] : memref<16x56xbf16, #tpu.memory_space<vmem>>, vector<16x56xbf16>
    %cst_14 = arith.constant dense<0.000000e+00> : vector<16x128xf32>
    %47 = tpu.matmul %46, %45, %cst_14 {dimension_numbers = #tpu.dot_dimension_numbers<[1], [0], [0], [1], [0, 0, 1, 1], [], []>} : vector<16x56xbf16>, vector<56x128xbf16>, vector<16x128xf32> -> vector<16x128xf32>
    %c0_15 = arith.constant 0 : index
    %c0_16 = arith.constant 0 : index
    %48 = vector.load %arg6[%c0_15, %c0_16] : memref<16x1xf32, #tpu.memory_space<vmem>>, vector<16x1xf32>
    %49 = vector.broadcast %48 : vector<16x1xf32> to vector<16x128xf32>
    %50 = arith.addf %47, %49 : vector<16x128xf32>
    %c0_17 = arith.constant 0 : index
    %c0_18 = arith.constant 0 : index
    %c0_19 = arith.constant 0 : index
    %51 = vector.load %arg7[%c0_17, %c0_18, %c0_19] : memref<1x16x128xf32, #tpu.memory_space<vmem>>, vector<1x16x128xf32>
    %52 = vector.shape_cast %51 : vector<1x16x128xf32> to vector<16x128xf32>
    %53 = vector.shape_cast %50 : vector<16x128xf32> to vector<1x16x128xf32>
    tpu.vector_store %arg7[%c0_17, %c0_18, %c0_19], %53 {strides = array<i32>} : memref<1x16x128xf32, #tpu.memory_space<vmem>>, vector<1x16x128xf32>,
    %c0_20 = arith.constant 0 : index
    %c0_21 = arith.constant 0 : index
    %c0_22 = arith.constant 0 : index
    %54 = vector.load %arg8[%c0_20, %c0_21, %c0_22] : memref<1x48x1xf32, #tpu.memory_space<vmem>>, vector<1x48x1xf32>
    %55 = vector.shape_cast %54 : vector<1x48x1xf32> to vector<48x1xf32>
    %cst_23 = arith.constant dense<0.000000e+00> : vector<16xf32>
    %56 = vector.multi_reduction <add>, %50, %cst_23 [1] : vector<16x128xf32> to vector<16xf32>
    %57 = vector.shape_cast %56 : vector<16xf32> to vector<16x1xf32>
    %cst_24 = arith.constant 7.812500e-03 : f32
    %58 = vector.broadcast %cst_24 : f32 to vector<16x1xf32>
    %59 = arith.mulf %57, %58 : vector<16x1xf32>
    %60 = vector.broadcast %59 : vector<16x1xf32> to vector<16x128xf32>
    %61 = arith.subf %50, %60 : vector<16x128xf32>
    %62 = arith.mulf %61, %61 : vector<16x128xf32>
    %cst_25 = arith.constant dense<0.000000e+00> : vector<16xf32>
    %63 = vector.multi_reduction <add>, %62, %cst_25 [1] : vector<16x128xf32> to vector<16xf32>
    %64 = vector.shape_cast %63 : vector<16xf32> to vector<16x1xf32>
    %65 = arith.mulf %59, %59 : vector<16x1xf32>
    %66 = tpu.concatenate %57, %64, %65 in 0 : vector<16x1xf32>, vector<16x1xf32>, vector<16x1xf32> -> vector<48x1xf32>
    %67 = arith.addf %55, %66 : vector<48x1xf32>
    %c0_26 = arith.constant 0 : index
    %c0_27 = arith.constant 0 : index
    %c0_28 = arith.constant 0 : index
    %68 = vector.load %arg8[%c0_26, %c0_27, %c0_28] : memref<1x48x1xf32, #tpu.memory_space<vmem>>, vector<1x48x1xf32>
    %69 = vector.shape_cast %68 : vector<1x48x1xf32> to vector<48x1xf32>
    %70 = vector.shape_cast %67 : vector<48x1xf32> to vector<1x48x1xf32>
    tpu.vector_store %arg8[%c0_26, %c0_27, %c0_28], %70 {strides = array<i32>} : memref<1x48x1xf32, #tpu.memory_space<vmem>>, vector<1x48x1xf32>,
    return
  }
  func.func @transform_0(%arg0: i32, %arg1: i32) -> (i32, i32, i32, i32) {
    %c0_i32 = arith.constant 0 : i32
    %c0_i32_0 = arith.constant 0 : i32
    %c0_i32_1 = arith.constant 0 : i32
    return %arg0, %arg1, %c0_i32, %c0_i32_0 : i32, i32, i32, i32
  }
  func.func @transform_1(%arg0: i32, %arg1: i32) -> (i32, i32, i32) {
    %c0_i32 = arith.constant 0 : i32
    %c0_i32_0 = arith.constant 0 : i32
    %c0_i32_1 = arith.constant 0 : i32
    return %arg0, %c0_i32, %c0_i32_0 : i32, i32, i32
  }
  func.func @transform_2(%arg0: i32, %arg1: i32) -> (i32, i32, i32) {
    %c0_i32 = arith.constant 0 : i32
    %c0_i32_0 = arith.constant 0 : i32
    %c0_i32_1 = arith.constant 0 : i32
    return %arg0, %c0_i32, %c0_i32_0 : i32, i32, i32
  }
  func.func @transform_3(%arg0: i32, %arg1: i32) -> (i32, i32) {
    %c0_i32 = arith.constant 0 : i32
    %c0_i32_0 = arith.constant 0 : i32
    %c0_i32_1 = arith.constant 0 : i32
    return %c0_i32, %c0_i32_0 : i32, i32
  }
  func.func @transform_4(%arg0: i32, %arg1: i32) -> (i32, i32) {
    %c0_i32 = arith.constant 0 : i32
    %c0_i32_0 = arith.constant 0 : i32
    %c0_i32_1 = arith.constant 0 : i32
    return %c0_i32, %c0_i32_0 : i32, i32
  }
  func.func @transform_5(%arg0: i32, %arg1: i32) -> (i32, i32, i32) {
    %c0_i32 = arith.constant 0 : i32
    %c0_i32_0 = arith.constant 0 : i32
    return %arg0, %c0_i32, %arg1 : i32, i32, i32
  }
  func.func @transform_6(%arg0: i32, %arg1: i32) -> (i32, i32, i32) {
    %c0_i32 = arith.constant 0 : i32
    %c0_i32_0 = arith.constant 0 : i32
    %c0_i32_1 = arith.constant 0 : i32
    return %arg0, %c0_i32, %c0_i32_0 : i32, i32, i32
  }
}

module attributes {stable_mosaic.version = 11 : i64} {
  func.func @_block2_kernel(%arg0: i32, %arg1: i32, %arg2: memref<1x1x16x256xf32, #tpu.memory_space<vmem>>, %arg3: memref<1x8x128xf32, #tpu.memory_space<vmem>>, %arg4: memref<1x16x1xf32, #tpu.memory_space<vmem>>, %arg5: memref<1x16x1xf32, #tpu.memory_space<vmem>>, %arg6: memref<1x16x1xf32, #tpu.memory_space<vmem>>, %arg7: memref<16x112xbf16, #tpu.memory_space<vmem>>, %arg8: memref<16x1xf32, #tpu.memory_space<vmem>>, %arg9: memref<16x8xbf16, #tpu.memory_space<vmem>>, %arg10: memref<16x1xf32, #tpu.memory_space<vmem>>, %arg11: memref<1x16x128xf32, #tpu.memory_space<vmem>>) attributes {dimension_semantics = [#tpu.dimension_semantics<parallel>, #tpu.dimension_semantics<arbitrary>], iteration_bounds = array<i64: 2, 2>, scalar_prefetch = 0 : i64, scratch_operands = 0 : i64, tpu.core_type = #tpu.core_type<tc>, window_params = [{transform_indices = @transform_0, window_bounds = array<i64: 1, 1, 16, 256>}, {transform_indices = @transform_1, window_bounds = array<i64: 1, 8, 128>}, {transform_indices = @transform_2, window_bounds = array<i64: 1, 16, 1>}, {transform_indices = @transform_3, window_bounds = array<i64: 1, 16, 1>}, {transform_indices = @transform_4, window_bounds = array<i64: 1, 16, 1>}, {pipeline_mode = #tpu.pipeline_mode<synchronous>, transform_indices = @transform_5, window_bounds = array<i64: 16, 112>}, {pipeline_mode = #tpu.pipeline_mode<synchronous>, transform_indices = @transform_6, window_bounds = array<i64: 16, 1>}, {pipeline_mode = #tpu.pipeline_mode<synchronous>, transform_indices = @transform_7, window_bounds = array<i64: 16, 8>}, {pipeline_mode = #tpu.pipeline_mode<synchronous>, transform_indices = @transform_8, window_bounds = array<i64: 16, 1>}, {transform_indices = @transform_9, window_bounds = array<i64: 1, 16, 128>}]} {
    %c0 = arith.constant 0 : index
    %c0_0 = arith.constant 0 : index
    %c0_1 = arith.constant 0 : index
    %c0_2 = arith.constant 0 : index
    %0 = vector.load %arg2[%c0, %c0_0, %c0_1, %c0_2] : memref<1x1x16x256xf32, #tpu.memory_space<vmem>>, vector<1x1x16x256xf32>
    %1 = vector.shape_cast %0 : vector<1x1x16x256xf32> to vector<16x256xf32>
    %c0_3 = arith.constant 0 : index
    %c0_4 = arith.constant 0 : index
    %c0_5 = arith.constant 0 : index
    %2 = vector.load %arg4[%c0_3, %c0_4, %c0_5] : memref<1x16x1xf32, #tpu.memory_space<vmem>>, vector<1x16x1xf32>
    %3 = vector.shape_cast %2 : vector<1x16x1xf32> to vector<16x1xf32>
    %c0_6 = arith.constant 0 : index
    %c0_7 = arith.constant 0 : index
    %c0_8 = arith.constant 0 : index
    %4 = vector.load %arg5[%c0_6, %c0_7, %c0_8] : memref<1x16x1xf32, #tpu.memory_space<vmem>>, vector<1x16x1xf32>
    %5 = vector.shape_cast %4 : vector<1x16x1xf32> to vector<16x1xf32>
    %6 = vector.broadcast %3 : vector<16x1xf32> to vector<16x256xf32>
    %7 = arith.mulf %1, %6 : vector<16x256xf32>
    %8 = vector.broadcast %5 : vector<16x1xf32> to vector<16x256xf32>
    %9 = arith.addf %7, %8 : vector<16x256xf32>
    %10 = arith.negf %9 : vector<16x256xf32>
    %11 = math.exp %10 : vector<16x256xf32>
    %cst = arith.constant 1.000000e+00 : f32
    %12 = vector.broadcast %cst : f32 to vector<16x256xf32>
    %13 = arith.addf %12, %11 : vector<16x256xf32>
    %14 = arith.divf %12, %13 : vector<16x256xf32>
    %15 = arith.mulf %9, %14 : vector<16x256xf32>
    %16 = tpu.iota {dimensions = array<i32: 1>} : vector<16x256xi32>
    %c128_i32 = arith.constant 128 : i32
    %17 = arith.muli %arg1, %c128_i32 : i32
    %c3_i32 = arith.constant 3 : i32
    %18 = arith.subi %17, %c3_i32 : i32
    %19 = vector.broadcast %18 : i32 to vector<16x256xi32>
    %20 = arith.addi %16, %19 : vector<16x256xi32>
    %c0_i32 = arith.constant 0 : i32
    %21 = vector.broadcast %c0_i32 : i32 to vector<16x256xi32>
    %22 = arith.cmpi sge, %20, %21 : vector<16x256xi32>
    %c256_i32 = arith.constant 256 : i32
    %23 = vector.broadcast %c256_i32 : i32 to vector<16x256xi32>
    %24 = arith.cmpi slt, %20, %23 : vector<16x256xi32>
    %25 = arith.andi %22, %24 : vector<16x256xi1>
    %cst_9 = arith.constant 0.000000e+00 : f32
    %26 = vector.broadcast %cst_9 : f32 to vector<16x256xf32>
    %27 = arith.select %25, %15, %26 : vector<16x256xi1>, vector<16x256xf32>
    %28 = vector.extract_strided_slice %27 {offsets = [0, 0], sizes = [16, 128], strides = [1, 1]} : vector<16x256xf32> to vector<16x128xf32>
    %c255_i32 = arith.constant 255 : i32
    %29 = tpu.dynamic_rotate %27 by %c255_i32 dim 1 : vector<16x256xf32>, i32 -> vector<16x256xf32>
    %30 = vector.extract_strided_slice %29 {offsets = [0, 0], sizes = [16, 128], strides = [1, 1]} : vector<16x256xf32> to vector<16x128xf32>
    %c254_i32 = arith.constant 254 : i32
    %31 = tpu.dynamic_rotate %27 by %c254_i32 dim 1 : vector<16x256xf32>, i32 -> vector<16x256xf32>
    %32 = vector.extract_strided_slice %31 {offsets = [0, 0], sizes = [16, 128], strides = [1, 1]} : vector<16x256xf32> to vector<16x128xf32>
    %c253_i32 = arith.constant 253 : i32
    %33 = tpu.dynamic_rotate %27 by %c253_i32 dim 1 : vector<16x256xf32>, i32 -> vector<16x256xf32>
    %34 = vector.extract_strided_slice %33 {offsets = [0, 0], sizes = [16, 128], strides = [1, 1]} : vector<16x256xf32> to vector<16x128xf32>
    %c252_i32 = arith.constant 252 : i32
    %35 = tpu.dynamic_rotate %27 by %c252_i32 dim 1 : vector<16x256xf32>, i32 -> vector<16x256xf32>
    %36 = vector.extract_strided_slice %35 {offsets = [0, 0], sizes = [16, 128], strides = [1, 1]} : vector<16x256xf32> to vector<16x128xf32>
    %c251_i32 = arith.constant 251 : i32
    %37 = tpu.dynamic_rotate %27 by %c251_i32 dim 1 : vector<16x256xf32>, i32 -> vector<16x256xf32>
    %38 = vector.extract_strided_slice %37 {offsets = [0, 0], sizes = [16, 128], strides = [1, 1]} : vector<16x256xf32> to vector<16x128xf32>
    %c250_i32 = arith.constant 250 : i32
    %39 = tpu.dynamic_rotate %27 by %c250_i32 dim 1 : vector<16x256xf32>, i32 -> vector<16x256xf32>
    %40 = vector.extract_strided_slice %39 {offsets = [0, 0], sizes = [16, 128], strides = [1, 1]} : vector<16x256xf32> to vector<16x128xf32>
    %41 = tpu.concatenate %28, %30, %32, %34, %36, %38, %40 in 0 : vector<16x128xf32>, vector<16x128xf32>, vector<16x128xf32>, vector<16x128xf32>, vector<16x128xf32>, vector<16x128xf32>, vector<16x128xf32> -> vector<112x128xf32>
    %42 = arith.truncf %41 : vector<112x128xf32> to vector<112x128xbf16>
    %c0_10 = arith.constant 0 : index
    %c0_11 = arith.constant 0 : index
    %43 = vector.load %arg7[%c0_10, %c0_11] : memref<16x112xbf16, #tpu.memory_space<vmem>>, vector<16x112xbf16>
    %cst_12 = arith.constant dense<0.000000e+00> : vector<16x128xf32>
    %44 = tpu.matmul %43, %42, %cst_12 {dimension_numbers = #tpu.dot_dimension_numbers<[1], [0], [0], [1], [0, 0, 1, 1], [], []>} : vector<16x112xbf16>, vector<112x128xbf16>, vector<16x128xf32> -> vector<16x128xf32>
    %c0_13 = arith.constant 0 : index
    %c0_14 = arith.constant 0 : index
    %45 = vector.load %arg8[%c0_13, %c0_14] : memref<16x1xf32, #tpu.memory_space<vmem>>, vector<16x1xf32>
    %46 = vector.broadcast %45 : vector<16x1xf32> to vector<16x128xf32>
    %47 = arith.addf %44, %46 : vector<16x128xf32>
    %c0_15 = arith.constant 0 : index
    %c0_16 = arith.constant 0 : index
    %48 = vector.load %arg9[%c0_15, %c0_16] : memref<16x8xbf16, #tpu.memory_space<vmem>>, vector<16x8xbf16>
    %c0_17 = arith.constant 0 : index
    %c0_18 = arith.constant 0 : index
    %c0_19 = arith.constant 0 : index
    %49 = vector.load %arg3[%c0_17, %c0_18, %c0_19] : memref<1x8x128xf32, #tpu.memory_space<vmem>>, vector<1x8x128xf32>
    %50 = vector.shape_cast %49 : vector<1x8x128xf32> to vector<8x128xf32>
    %51 = arith.truncf %50 : vector<8x128xf32> to vector<8x128xbf16>
    %cst_20 = arith.constant dense<0.000000e+00> : vector<16x128xf32>
    %52 = tpu.matmul %48, %51, %cst_20 {dimension_numbers = #tpu.dot_dimension_numbers<[1], [0], [0], [1], [0, 0, 1, 1], [], []>} : vector<16x8xbf16>, vector<8x128xbf16>, vector<16x128xf32> -> vector<16x128xf32>
    %c0_21 = arith.constant 0 : index
    %c0_22 = arith.constant 0 : index
    %53 = vector.load %arg10[%c0_21, %c0_22] : memref<16x1xf32, #tpu.memory_space<vmem>>, vector<16x1xf32>
    %54 = vector.broadcast %53 : vector<16x1xf32> to vector<16x128xf32>
    %55 = arith.addf %52, %54 : vector<16x128xf32>
    %c0_23 = arith.constant 0 : index
    %c0_24 = arith.constant 0 : index
    %c0_25 = arith.constant 0 : index
    %56 = vector.load %arg6[%c0_23, %c0_24, %c0_25] : memref<1x16x1xf32, #tpu.memory_space<vmem>>, vector<1x16x1xf32>
    %57 = vector.shape_cast %56 : vector<1x16x1xf32> to vector<16x1xf32>
    %58 = vector.broadcast %57 : vector<16x1xf32> to vector<16x128xf32>
    %59 = arith.mulf %47, %58 : vector<16x128xf32>
    %60 = arith.addf %59, %55 : vector<16x128xf32>
    %c0_26 = arith.constant 0 : index
    %c0_27 = arith.constant 0 : index
    %c0_28 = arith.constant 0 : index
    %61 = vector.load %arg11[%c0_26, %c0_27, %c0_28] : memref<1x16x128xf32, #tpu.memory_space<vmem>>, vector<1x16x128xf32>
    %62 = vector.shape_cast %61 : vector<1x16x128xf32> to vector<16x128xf32>
    %63 = vector.shape_cast %60 : vector<16x128xf32> to vector<1x16x128xf32>
    tpu.vector_store %arg11[%c0_26, %c0_27, %c0_28], %63 {strides = array<i32>} : memref<1x16x128xf32, #tpu.memory_space<vmem>>, vector<1x16x128xf32>,
    return
  }
  func.func @transform_0(%arg0: i32, %arg1: i32) -> (i32, i32, i32, i32) {
    %c0_i32 = arith.constant 0 : i32
    %c0_i32_0 = arith.constant 0 : i32
    %c0_i32_1 = arith.constant 0 : i32
    return %arg0, %arg1, %c0_i32, %c0_i32_0 : i32, i32, i32, i32
  }
  func.func @transform_1(%arg0: i32, %arg1: i32) -> (i32, i32, i32) {
    %c0_i32 = arith.constant 0 : i32
    %c0_i32_0 = arith.constant 0 : i32
    return %arg0, %c0_i32, %arg1 : i32, i32, i32
  }
  func.func @transform_2(%arg0: i32, %arg1: i32) -> (i32, i32, i32) {
    %c0_i32 = arith.constant 0 : i32
    %c0_i32_0 = arith.constant 0 : i32
    %c0_i32_1 = arith.constant 0 : i32
    return %arg0, %c0_i32, %c0_i32_0 : i32, i32, i32
  }
  func.func @transform_3(%arg0: i32, %arg1: i32) -> (i32, i32, i32) {
    %c0_i32 = arith.constant 0 : i32
    %c0_i32_0 = arith.constant 0 : i32
    %c0_i32_1 = arith.constant 0 : i32
    return %arg0, %c0_i32, %c0_i32_0 : i32, i32, i32
  }
  func.func @transform_4(%arg0: i32, %arg1: i32) -> (i32, i32, i32) {
    %c0_i32 = arith.constant 0 : i32
    %c0_i32_0 = arith.constant 0 : i32
    %c0_i32_1 = arith.constant 0 : i32
    return %arg0, %c0_i32, %c0_i32_0 : i32, i32, i32
  }
  func.func @transform_5(%arg0: i32, %arg1: i32) -> (i32, i32) {
    %c0_i32 = arith.constant 0 : i32
    %c0_i32_0 = arith.constant 0 : i32
    %c0_i32_1 = arith.constant 0 : i32
    return %c0_i32, %c0_i32_0 : i32, i32
  }
  func.func @transform_6(%arg0: i32, %arg1: i32) -> (i32, i32) {
    %c0_i32 = arith.constant 0 : i32
    %c0_i32_0 = arith.constant 0 : i32
    %c0_i32_1 = arith.constant 0 : i32
    return %c0_i32, %c0_i32_0 : i32, i32
  }
  func.func @transform_7(%arg0: i32, %arg1: i32) -> (i32, i32) {
    %c0_i32 = arith.constant 0 : i32
    %c0_i32_0 = arith.constant 0 : i32
    %c0_i32_1 = arith.constant 0 : i32
    return %c0_i32, %c0_i32_0 : i32, i32
  }
  func.func @transform_8(%arg0: i32, %arg1: i32) -> (i32, i32) {
    %c0_i32 = arith.constant 0 : i32
    %c0_i32_0 = arith.constant 0 : i32
    %c0_i32_1 = arith.constant 0 : i32
    return %c0_i32, %c0_i32_0 : i32, i32
  }
  func.func @transform_9(%arg0: i32, %arg1: i32) -> (i32, i32, i32) {
    %c0_i32 = arith.constant 0 : i32
    %c0_i32_0 = arith.constant 0 : i32
    return %arg0, %c0_i32, %arg1 : i32, i32, i32
  }
}

</mosaic_0001>

<bundles_post_ra>
// kernel: squeeze.5
= control target key start
LH: loop header
LB: loop body
LE: loop exit
PB: predicated region body
PF: predicated region fallthrough
CT: control target
= control target key end

     0   :  { %s66_s8 = smov 122   ;;  %vm7_vm0 = vcmask 15360   ;;  %s67_s11 = smov 124   ;;  %s117_s0 = inlined_call_operand.vmem [shape: f32[2,16], index: 0, kind: input, shape index: {}]   ;;  %s118_s1 = inlined_call_operand.vmem [shape: f32[2,8,2], index: 1, kind: output, shape index: {}]  }
   0x1   :  { %v4_v0 = vld [vmem:[%s117_s0] sm:$0x3]  ;;  %s65_s0 = smov 126   ;;  %s68_s12 = smov 120  }
   0x2   :  { %5 = vst [vmem:[#allocation0] sm:$0x3] %v4_v0  ;;  %s69_s13 = smov 118   ;;  %s70_s14 = smov 116  }
   0x3   :  { %s71_s15 = smov 114  }
   0x9   :  { %v9_v1 = vld [vmem:[#allocation0] sm:$0x3]  }
   0xa   :  { %v21_v2 = vld [vmem:[#allocation0] sm:$0x3]   ;;  %10 = vrot.lane.b32.xlu0 %v9_v1, %s65_s0 }
   0xb   :  { %22 = vrot.lane.b32.xlu1 %v21_v2, %s66_s8  ;;  %v15_v3 = vld [vmem:[#allocation0] sm:$0x3]  }
   0xc   :  { %v27_v4 = vld [vmem:[#allocation0] sm:$0x3]  }
   0xd   :  { %v6_v5 = vld [vmem:[#allocation0] sm:$0x3]  }
   0xe   :  { %8 = vst.msk [vmem:[%s118_s1] ss:$8 sm:$0x3] %vm7_vm0, %v6_v5   ;;  %16 = vrot.lane.b32.xlu0 %v15_v3, %s67_s11  ;;  %v33_v6 = vld [vmem:[#allocation0] sm:$0x3]  }
   0xf   :  { %28 = vrot.lane.b32.xlu1 %v27_v4, %s68_s12  ;;  %v39_v7 = vld [vmem:[#allocation0] sm:$0x3]  }
  0x10   :  { %v45_v8 = vld [vmem:[#allocation0] sm:$0x3]  }
  0x12   :  { %34 = vrot.lane.b32.xlu0 %v33_v6, %s69_s13 }
  0x13   :  { %40 = vrot.lane.b32.xlu1 %v39_v7, %s70_s14 }
  0x16   :  { %46 = vrot.lane.b32.xlu0 %v45_v8, %s71_s15 }
  0x7c   :  { %v11_v9 = vpop.permute.xlu0 %10  }
  0x7d   :  { %v23_v10 = vpop.permute.xlu1 %22   ;;  %51 = vst.msk [vmem:[%s118_s1 + $0x1] ss:$8 sm:$0x3] %vm7_vm0, %v11_v9  }
  0x7e   :  { %53 = vst.msk [vmem:[%s118_s1 + $0x3] ss:$8 sm:$0x3] %vm7_vm0, %v23_v10  }
  0x80   :  { %v17_v11 = vpop.permute.xlu0 %16  }
  0x81   :  { %v29_v12 = vpop.permute.xlu1 %28   ;;  %52 = vst.msk [vmem:[%s118_s1 + $0x2] ss:$8 sm:$0x3] %vm7_vm0, %v17_v11  }
  0x82   :  { %54 = vst.msk [vmem:[%s118_s1 + $0x4] ss:$8 sm:$0x3] %vm7_vm0, %v29_v12  }
  0x84   :  { %v35_v13 = vpop.permute.xlu0 %34  }
  0x85   :  { %v41_v14 = vpop.permute.xlu1 %40   ;;  %55 = vst.msk [vmem:[%s118_s1 + $0x5] ss:$8 sm:$0x3] %vm7_vm0, %v35_v13  }
  0x86   :  { %56 = vst.msk [vmem:[%s118_s1 + $0x6] ss:$8 sm:$0x3] %vm7_vm0, %v41_v14  }
  0x88   :  { %v47_v15 = vpop.permute.xlu0 %46  }
  0x89   :  { %57 = vst.msk [vmem:[%s118_s1 + $0x7] ss:$8 sm:$0x3] %vm7_vm0, %v47_v15  }

// kernel: residual_block_v2.3
= control target key start
LH: loop header
LB: loop body
LE: loop exit
PB: predicated region body
PF: predicated region fallthrough
CT: control target
= control target key end

     0   :  { %s1198_s0 = inlined_call_operand.hbm [shape: f32[2,8,256], index: 0, kind: input, shape index: {}]   ;;  %s1199_s1 = inlined_call_operand.hbm [shape: f32[8,1], index: 1, kind: input, shape index: {}]   ;;  %s1200_s2 = inlined_call_operand.hbm [shape: f32[2,24,1], index: 2, kind: output, shape index: {0}]   ;;  %s1201_s3 = inlined_call_operand.hbm [shape: f32[2,8,1], index: 3, kind: output, shape index: {1}]  }
   0x1   :  { %1215 = sst [smem:[#allocation22_spill]] %s1198_s0 }
   0x2   :  { %1216 = sst [smem:[#allocation23_spill]] %s1199_s1 }
   0x3   :  { %1217 = sst [smem:[#allocation24_spill]] %s1200_s2 }
   0x4   :  { %1218 = sst [smem:[#allocation25_spill]] %s1201_s3 }
   0x5   :  { %9 = vsyncpa [#allocation6], 0 }
   0x6   :  { %11 = vsyncpa [#allocation6 + $0x1], 0 }
   0x7   :  { %12 = vsyncpa [#allocation9], 0 }
   0x8   :  { %13 = vsyncpa [#allocation7], 0 }
   0x9   :  { %15 = vsyncpa [#allocation7 + $0x1], 0 }
   0xa   :  { %16 = vsyncpa [#allocation12], 0 }
   0xb   :  { %18 = vsyncpa [#allocation12 + $0x1], 0  ;;  %s884_s12 = smov 0   ;;  %s886_s13 = smov 0  }
   0xc   :  { %s888_s14 = smov 0   ;;  %s890_s15 = smov 0  }
   0xd   :  { %s892_s16 = smov 0   ;;  %s894_s17 = smov 0  }
   0xe   :  { %s896_s18 = smov 0   ;;  %s898_s19 = smov 0  }
   0xf   :  { %s900_s20 = smov 0   ;;  %s902_s21 = smov 0  }
  0x10   :  { %s904_s22 = smov 0  }
  0x11 LB: > { %1219 = sst [smem:[#allocation17_spill]] %s813_s12  ;;  %s485_s23 = sadd.s32 4294967295, %s853_s22   ;;  %s853_s22 = sphi %s904_s22, %s24_s22   ;;  %s849_s21 = sphi %s902_s21, %s1256_s21   ;;  %s845_s20 = sphi %s900_s20, %s1255_s20   ;;  %s841_s19 = sphi %s898_s19, %s1254_s19   ;;  %s837_s18 = sphi %s896_s18, %s1253_s18   ;;  %s833_s17 = sphi %s894_s17, %s1252_s17   ;;  %s829_s16 = sphi %s892_s16, %s1251_s16   ;;  %s825_s15 = sphi %s890_s15, %s1250_s15   ;;  %s821_s14 = sphi %s888_s14, %s1249_s14   ;;  %s817_s13 = sphi %s886_s13, %s1248_s13   ;;  %s813_s12 = sphi %s884_s12, %s1247_s12  }
  0x12   : > { %1220 = sst [smem:[#allocation18_spill]] %s841_s19  ;;  %s486_s24 = sadd.s32 4294967294, %s853_s22  }
  0x13   : > { %p58_p0 = scmp.ne.s32.totalorder %s829_s16, %s825_s15  ;;  %p940_p1 = scmp.eq.s32.totalorder %s485_s23, 0 }
  0x14   : > { %s92_s26 = sadd.s32 1, %s821_s14  ;;  %p102_p2 = scmp.ne.s32.totalorder %s821_s14, %s817_s13 }
  0x15   : > { %s1221_s25 = scalar_select %p940_p1, 1, 0 }
  0x16   : > { %p949_p3 = por %p940_p1, %p58_p0  ;;  %p103_p4 = scmp.eq.s32.totalorder %s485_s23, 3 }
  0x17   : > { %p108_p5 = scmp.ne.s32.totalorder %s817_s13, %s813_s12  ;;  %p109_p6 = scmp.eq.s32.totalorder %s486_s24, 3 }
  0x18   : > { %s1222_s27 = scalar_select %p949_p3, 1, 0 }
  0x19   : > { %p955_p7 = por %p103_p4, %p102_p2  ;;  %p487_p8 = scmp.ge.s32.totalorder %s853_s22, 1 }
  0x1a   : > { %p960_p9 = por %p109_p6, %p108_p5  ;;  %p142_p10 = scmp.lt.s32.totalorder %s853_s22, 5 }
  0x1b   : > { %s1223_s28 = scalar_select %p955_p7, 1, 0 }
  0x1c   : > { %s1225_s29 = scalar_select %p960_p9, 1, 0 }
  0x1d   : > { %1224 = sst [smem:[#allocation19_spill]] %s1223_s28  ;;  %p965_p11 = pnand %p487_p8, %p142_p10 }
  0x1e   : > { %1226 = sst [smem:[#allocation20_spill]] %s1225_s29  ;;  %s855_s4 = smov [#allocation8]  }
  0x1f   : > { %s1227_s30 = scalar_select %p965_p11, 1, 0 }
  0x20   : > { %s155_s5 = sshll.u32 %s855_s4, 4  ;;  %p516_p12 = pneg %p965_p11  ;;  %s156_s5 = int_to_ptr.vmem [resolvable:$true] %s155_s5 }
  0x21   : > { %s33_s7 = sadd.s32 1, %s845_s20  ;;  %s1229_s1 = sld [smem:[#allocation23_spill]] }
  0x22   : > { %p973_p13 = pnand %p516_p12, %p940_p1 }
  0x24   : > { %p639_p2 = pneg %p973_p13 }
  0x27   : > { %s637_s10 = scalar_lea.hbm %s1229_s1, 128 }
  0x28   : > { %p638_p0 = scmp.ne.s32.totalorder %s1229_s1, %s637_s10  ;;  %p644_p6 = scmp.lt.u32.totalorder %s637_s10, %s1229_s1 }
  0x2a   : > { %p640_p4 = pnand %p639_p2, %p638_p0 }
  0x2c   : > { %p641_p5 = pneg %p640_p4 }
  0x2e   : > { %p646_p8 = pnand %p644_p6, %p641_p5 }
  0x30   : > { %649 = shalt.err (!%p646_p8)
}
  0x31   : > { %s650_s4 = scalar_lea.vmem %s156_s5, 128  ;;  %p658_p7 = scmp.lt.s32.totalorder %s156_s5, %s156_s5 }
  0x32   : > { %p651_p10 = scmp.ne.s32.totalorder %s156_s5, %s650_s4  ;;  %p659_p1 = scmp.lt.s32.totalorder %s650_s4, %s650_s4 }
  0x34   : > { %p653_p12 = pnand %p651_p10, %p639_p2  ;;  %p660_p3 = por %p659_p1, %p658_p7 }
  0x36   : > { %p654_p9 = pneg %p653_p12 }
  0x38   : > { %p661_p11 = pnand %p660_p3, %p654_p9 }
  0x3a   : > { %664 = shalt.err (!%p661_p11)
}
  0x3b   : > { %519 = dma.hbm_to_vmem [thread:$0]  (!%p973_p13), %s1229_s1, 128, %s156_s5, [#allocation9]  }
  0x3c   : > { %p34_p0 = scmp.ge.s32.totalorder %s33_s7, 2  ;;  %s36_s10 = sadd.s32 1, %s849_s21 }
  0x3d   : > { %s45_s11 = sadd.s32 1, %s833_s17  ;;  %p52_p1 = scmp.ne.s32.totalorder %s833_s17, %s829_s16 }
  0x3e   : > { %s1258_s7 = smov (%p34_p0, %s33_s7), 0  ;;  %s1260_s10 = smov (!%p34_p0, %s36_s10), %s849_s21 }
  0x3f   : > { %1230 = sst [smem:[#allocation21_spill]] %s1258_s7  ;;  %s41_s6 = ssub.s32 %s845_s20, %s1258_s7 }
  0x40   : > { %p53_p3 = scmp.eq.s32.totalorder %s853_s22, 0  ;;  %p38_p7 = scmp.ge.s32.totalorder %s1260_s10, 2 }
  0x41   : > { %p532_p9 = scmp.lt.s32.totalorder %s853_s22, 4  ;;  %s166_s5 = sand.u32 1, %s833_s17  }
  0x42   : > { %p1005_p11 = por %p53_p3, %p52_p1  ;;  %s1262_s10 = smov (%p38_p7, %s1260_s10), 0 }
  0x43   : > { %s490_s23 = sshll.u32 %s166_s5, 3  ;;  %s40_s24 = ssub.s32 %s849_s21, %s1262_s10 }
  0x44   : > { %s42_s4 = sor.u32 %s41_s6, %s40_s24  ;;  %p90_p13 = scmp.eq.s32.totalorder %s40_s24, 0 }
  0x45   : > { %p43_p2 = scmp.eq.s32.totalorder %s42_s4, 0  ;;  %s491_s8 = sshll.u32 %s849_s21, 1 }
  0x46   : > { %s1018_s9 = scalar_select %p90_p13, %s821_s14, %s92_s26  }
  0x47   : > { %s1021_s1 = scalar_select %p43_p2, %s833_s17, %s45_s11  }
  0x48   : > { %s175_s7 = sadd.s32 %s845_s20, %s491_s8  ;;  %s170_s29 = scalar_lea.vmem [#allocation5], %s490_s23 }
  0x49   : > { %s179_s12 = sshll.u32 %s170_s29, 4  ;;  %s492_s3 = sshll.u32 %s175_s7, 7  ;;  %s1024_s12 = int_to_ptr.vmem [resolvable:$true] %s179_s12 }
  0x4a   : > { %s1232_s0 = sld [smem:[#allocation22_spill]]  ;;  %p1035_p4 = pnand %p532_p9, %p1005_p11 }
  0x4b   : > { %s167_s29 = scalar_lea.sflag [#allocation6], %s166_s5 }
  0x4c   : > { %p667_p6 = pneg %p1035_p4 }
  0x50   : > { %s1029_s19 = scalar_lea.hbm %s1232_s0, %s492_s3  ;;  %s670_s28 = scalar_lea.hbm %s1232_s0, 512 }
  0x51   : > { %s665_s7 = scalar_lea.hbm %s1029_s19, 128  ;;  %p671_p12 = scmp.lt.u32.totalorder %s1029_s19, %s1232_s0 }
  0x52   : > { %p666_p5 = scmp.ne.s32.totalorder %s1029_s19, %s665_s7  ;;  %p672_p0 = scmp.lt.u32.totalorder %s670_s28, %s665_s7 }
  0x53   : > { %p674_p3 = scmp.lt.u32.totalorder %s665_s7, %s1029_s19 }
  0x54   : > { %p668_p8 = pnand %p667_p6, %p666_p5  ;;  %p673_p1 = por %p672_p0, %p671_p12 }
  0x56   : > { %p669_p10 = pneg %p668_p8  ;;  %p675_p7 = por %p674_p3, %p673_p1 }
  0x58   : > { %p676_p9 = pnand %p675_p7, %p669_p10 }
  0x5a   : > { %679 = shalt.err (!%p676_p9)
}
  0x5b   : > { %s680_s15 = scalar_lea.vmem %s1024_s12, 128  ;;  %s856_s5 = smov [#allocation5]  }
  0x5c   : > { %p681_p11 = scmp.ne.s32.totalorder %s1024_s12, %s680_s15  ;;  %s685_s23 = sshll.u32 %s856_s5, 4  ;;  %s686_s23 = int_to_ptr.vmem [resolvable:$false] %s685_s23 }
  0x5d   : > { %s687_s24 = scalar_lea.vmem %s686_s23, 256  ;;  %p688_p5 = scmp.lt.s32.totalorder %s1024_s12, %s686_s23 }
  0x5e   : > { %p683_p13 = pnand %p681_p11, %p667_p6  ;;  %p689_p8 = scmp.lt.s32.totalorder %s687_s24, %s680_s15 }
  0x60   : > { %p684_p2 = pneg %p683_p13  ;;  %p690_p12 = por %p689_p8, %p688_p5 }
  0x62   : > { %p691_p0 = pnand %p690_p12, %p684_p2 }
  0x64   : > { %694 = shalt.err (!%p691_p0)
}
  0x65   : > { %523 = dma.hbm_to_vmem [thread:$0]  (!%p1035_p4), %s1029_s19, 128, %s1024_s12, %s167_s29  }
  0x66   : > { %p1234_p10 = scmp.ne.s32.totalorder %s1227_s30, 0 }
  0x67   : > { %s190_s4 = sand.u32 (!%p1234_p10), 1, %s829_s16   ;;  %p1235_p6 = scmp.ne.s32.totalorder (!%p1234_p10), %s1222_s27, 0 }
  0x68   : > { %188 = sbr.rel (%p1234_p10) target bundleno = 821 (0x335), region = 28  ;;  %s494_s8 = sshll.u32 (!%p1234_p10), %s190_s4, 3 }
  0x69   : > { %s191_s7 = scalar_lea.sflag (!%p1234_p10), [#allocation6], %s190_s4  ;;  %s194_s2 = scalar_lea.vmem (!%p1234_p10), [#allocation5], %s494_s8 }
  0x6f   : > { %796 = dma.done.wait (%p1235_p6), %s191_s7, 128  }
  0x70   : > { %798 = vsyncadd (%p1235_p6), %s191_s7, 4294967168  ;;  %p1236_p1 = scmp.ne.s32.totalorder %s1221_s25, 0 }
  0x72   : > { %800 = dma.done.wait (%p1236_p1), [#allocation9], 128  }
  0x73   : > { %802 = vsyncadd (%p1236_p1), [#allocation9], 4294967168  ;;  %s1076_s12 = sand.u32 1, %s817_s13   ;;  %v226_v0 = vld [vmem:[%s194_s2] sm:$0xff]  ;;  %p497_p4 = scmp.ne.s32.totalorder %s837_s18, 0 }
  0x74   : > { %s504_s19 = smul.u32 24, %s1076_s12  ;;  %s496_s30 = sshll.u32 %s1076_s12, 3  ;;  %vm231_vm0 = vcmask (!%p497_p4), 7168   ;;  %vm235_vm1 = vcmask (!%p497_p4), 0   ;;  %v857_v1 = vmov (!%p497_p4), 0.0   ;;  %v858_v2 = vmov (!%p497_p4), -inf  }
  0x75   : > { %s1082_s29 = scalar_lea.vmem [#allocation11], %s496_s30  ;;  %230 = sbr.rel (%p497_p4) target bundleno = 124 (0x7c), region = 40  ;;  %238 = vst.msk [vmem:[#allocation4] sm:$0xff] (!%p497_p4), %vm231_vm0, %v857_v1 }
  0x76   : > { %s1080_s26 = scalar_lea.vmem [#allocation10], %s504_s19  ;;  %236 = vst.msk [vmem:[#allocation2] sm:$0x1] (!%p497_p4), %vm235_vm1, %v858_v2  ;;  %237 = vst.msk [vmem:[#allocation3] sm:$0x1] (!%p497_p4), %vm235_vm1, %v857_v1 }
  0x77   : > { %232 = vst.msk [vmem:[%s1080_s26] sm:$0xff] (!%p497_p4), %vm231_vm0, %v857_v1  ;;  %233 = vst.msk [vmem:[%s1080_s26 + $0x8] sm:$0xff] (!%p497_p4), %vm231_vm0, %v857_v1 }
  0x78   : > { %234 = vst.msk [vmem:[%s1080_s26 + $0x10] sm:$0xff] (!%p497_p4), %vm231_vm0, %v857_v1 }
  0x7c PF: > { %v257_v3 = vld [vmem:[#allocation8] sm:$0xff]  ;;  %v859_v4 = vmov 0   ;;  %vm294_vm2 = vcmask 0   ;;  %v282_v17 = vlaneseq  ;;  %vm253_vm3 = vcmask 7168   ;;  %v296_v38 = vld [vmem:[#allocation4] sm:$0xff]  ;;  %p498_p3 = scmp.ne.s32.totalorder %s837_s18, 1 }
  0x7d   : > { %629 = vset.pattern.permute.xlu0 %v859_v4  ;;  %630 = vset.pattern.permute.xlu1 %v859_v4  ;;  %v272_v13 = vld [vmem:[#allocation2] sm:$0x1]  ;;  %v289_v44 = vld [vmem:[#allocation3] sm:$0x1] }
  0x7e   : > { %260 = vperm.xlu0 %629, %v257_v3   ;;  %v283_v18 = vshrl.u32 %v282_v17, 7  ;;  %v239_v26 = vld [vmem:[%s1080_s26] sm:$0xff]  ;;  %v240_v42 = vld [vmem:[%s1080_s26 + $0x8] sm:$0xff] }
  0x7f   : > { %v241_v30 = vld [vmem:[%s1080_s26 + $0x10] sm:$0xff] }
  0x80   : > { %v284_v19 = vsub.s32 0, %v283_v18 }
  0xfd   : > { %v261_v5 = vpop.permute.xlu0 %260 }
  0xfe   : > { %v263_v6 = vmul.f32 %v261_v5, %v226_v0 }
 0x100   : > { %v264_v7 = vrot.slane %v263_v6, 4 }
 0x102   : > { %v265_v8 = vadd.f32 %v264_v7, %v263_v6 }
 0x104   : > { %v266_v9 = vrot.slane %v265_v8, 2 }
 0x106   : > { %v267_v10 = vadd.f32 %v266_v9, %v265_v8 }
 0x108   : > { %v268_v11 = vrot.slane %v267_v10, 1 }
 0x10a   : > { %v269_v12 = vadd.f32 %v268_v11, %v267_v10 }
 0x10c   : > { %270 = vmax.xlane.f32.xlu0 %v269_v12 }
 0x199   : > { %v271_v14 = vpop.xlane.xlu0 %270 }
 0x19a   : > { %v273_v15 = vmax.f32 %v272_v13, %v271_v14 }
 0x19c   : > { %v274_v16 = vsub.f32 %v272_v13, %v273_v15  ;;  %309 = vst.msk [vmem:[#allocation2] sm:$0x1] %vm294_vm2, %v273_v15  ;;  %279 = vperm.xlu1 %630, %v273_v15  }
 0x19e   : > { %v275_v35 = vmul.f32 1.442695, %v274_v16 }
 0x1c0   : > { %242 = vadd.xlane.f32.xlu1 %v226_v0 }
 0x21b   : > { %v280_v20 = vpop.permute.xlu1 %279 }
 0x21c   : > { %v285_v21 = vrot.slane %v280_v20, %v284_v19 }
 0x21e   : > { %v286_v22 = vsub.f32 %v269_v12, %v285_v21 }
 0x220   : > { %v287_v23 = vmul.f32 1.442695, %v286_v22 }
 0x222   : > { %631 = vpow2.f32 %v287_v23 }
 0x223   : > { %633 = vpow2.f32 %v275_v35 }
 0x22c   : > { %v632_v24 = vpop.eup %631 }
 0x22d   : > { %v304_v25 = vmul.f32 %v632_v24, %v226_v0  ;;  %v634_v36 = vpop.eup %633 }
 0x22e   : > { %v301_v37 = vrot.slane %v634_v36, %v284_v19  ;;  %v290_v46 = vmul.f32 %v634_v36, %v289_v44 }
 0x22f   : > { %305 = vadd.xlane.f32.xlu1 %v304_v25 }
 0x230   : > { %v303_v39 = vmul.f32 %v301_v37, %v296_v38 }
 0x24d   : > { %v243_v27 = vpop.xlane.xlu1 %242 }
 0x24e   : > { %v244_v28 = vmul.f32 0.0078125, %v243_v27  ;;  %v250_v29 = vadd.f32 %v243_v27, %v239_v26 }
 0x250   : > { %v249_v31 = vmul.f32 %v244_v28, %v244_v28  ;;  %254 = vst.msk [vmem:[%s1080_s26] sm:$0xff] %vm253_vm3, %v250_v29  ;;  %v245_v32 = vsub.f32 %v226_v0, %v244_v28 }
 0x252   : > { %v252_v33 = vadd.f32 %v249_v31, %v241_v30  ;;  %v246_v34 = vmul.f32 %v245_v32, %v245_v32 }
 0x254   : > { %256 = vst.msk [vmem:[%s1080_s26 + $0x10] sm:$0xff] %vm253_vm3, %v252_v33  ;;  %247 = vadd.xlane.f32.xlu0 %v246_v34 }
 0x258   : > { %291 = vadd.xlane.f32.xlu0 %v632_v24 }
 0x2bc   : > { %v306_v40 = vpop.xlane.xlu1 %305 }
 0x2bd   : > { %v307_v41 = vadd.f32 %v306_v40, %v303_v39 }
 0x2bf   : > { %308 = vst.msk [vmem:[#allocation4] sm:$0xff] %vm253_vm3, %v307_v41 }
 0x2c6   : > { %v314_v51 = vld [vmem:[#allocation4] sm:$0xff] (!%p498_p3) }
 0x2e1   : > { %v248_v43 = vpop.xlane.xlu0 %247 }
 0x2e2   : > { %v251_v45 = vadd.f32 %v248_v43, %v240_v42  ;;  %313 = sbr.rel (%p498_p3) target bundleno = 768 (0x300), region = 44 }
 0x2e4   : > { %255 = vst.msk [vmem:[%s1080_s26 + $0x8] sm:$0xff] %vm253_vm3, %v251_v45 }
 0x2e5   : > { %v292_v47 = vpop.xlane.xlu0 %291 }
 0x2e6   : > { %v293_v48 = vadd.f32 %v292_v47, %v290_v46 }
 0x2e8   : > { %295 = vst.msk [vmem:[#allocation3] sm:$0x1] %vm294_vm2, %v293_v48 }
 0x2ef   : > { %v315_v49 = vld [vmem:[#allocation3] sm:$0x1] }
 0x2f0   : > { %635 = vrcp.f32 %v315_v49 }
 0x2fa   : > { %v636_v50 = vpop.eup %635 }
 0x2fb   : > { %v321_v52 = vrot.slane %v636_v50, %v284_v19 }
 0x2fd   : > { %v323_v53 = vmul.f32 %v321_v52, %v314_v51 }
 0x2ff   : > { %324 = vst.msk [vmem:[%s1082_s29] sm:$0xff] %vm253_vm3, %v323_v53 }
 0x300 PF: > { %s1237_s25 = sld [smem:[#allocation18_spill]]  ;;  %s1238_s27 = sld [smem:[#allocation19_spill]] }
 0x301   : > { %s344_s28 = sshll.u32 %s1080_s26, 4  ;;  %s1239_s18 = sld [smem:[#allocation24_spill]]  ;;  %s1110_s28 = int_to_ptr.vmem [resolvable:$true] %s344_s28 }
 0x302   : > { %s326_s23 = scalar_lea.sflag [#allocation7], %s1076_s12  ;;  %s695_s24 = scalar_lea.vmem %s1110_s28, 384 }
 0x303   : > { %p696_p7 = scmp.ne.s32.totalorder %s1110_s28, %s695_s24  ;;  %s860_s4 = smov [#allocation10]  }
 0x304   : > { %s699_s8 = sshll.u32 %s860_s4, 4  ;;  %s700_s8 = int_to_ptr.vmem [resolvable:$false] %s699_s8 }
 0x305   : > { %s701_s7 = scalar_lea.vmem %s700_s8, 768  ;;  %p702_p2 = scmp.lt.s32.totalorder %s1110_s28, %s700_s8 }
 0x306   : > { %s505_s3 = smul.u32 384, %s1237_s25  ;;  %p1241_p9 = scmp.ne.s32.totalorder %s1238_s27, 0 }
 0x307   : > { %s1240_s5 = smov %s1239_s18  ;;  %p703_p5 = scmp.lt.s32.totalorder %s701_s7, %s695_s24 }
 0x308   : > { %s1108_s15 = scalar_lea.hbm %s1239_s18, %s505_s3  ;;  %p697_p11 = pnand %p696_p7, %p1241_p9 }
 0x309   : > { %p704_p8 = por %p703_p5, %p702_p2 }
 0x30a   : > { %p698_p13 = pneg %p697_p11 }
 0x30c   : > { %p705_p12 = pnand %p704_p8, %p698_p13 }
 0x30e   : > { %708 = shalt.err (!%p705_p12)
}
 0x30f   : > { %s709_s2 = scalar_lea.hbm %s1108_s15, 384  ;;  %s713_s26 = scalar_lea.hbm %s1240_s5, 768 }
 0x310   : > { %p710_p0 = scmp.ne.s32.totalorder %s1108_s15, %s709_s2  ;;  %p714_p1 = scmp.lt.u32.totalorder %s1108_s15, %s1240_s5 }
 0x311   : > { %p715_p4 = scmp.lt.u32.totalorder %s713_s26, %s709_s2  ;;  %p717_p7 = scmp.lt.u32.totalorder %s709_s2, %s1108_s15 }
 0x312   : > { %p711_p10 = pnand %p710_p0, %p1241_p9 }
 0x313   : > { %p716_p3 = por %p715_p4, %p714_p1 }
 0x314   : > { %p712_p6 = pneg %p711_p10 }
 0x315   : > { %p718_p11 = por %p717_p7, %p716_p3 }
 0x317   : > { %p719_p13 = pnand %p718_p11, %p712_p6 }
 0x319   : > { %722 = shalt.err (!%p719_p13)
}
 0x31a   : > { %s861_s6 = smov 128   ;;  %s862_s18 = smov 8  }
 0x31b   : > { %512 = dma.vmem_to_hbm [thread:$0]  (%p1241_p9), %s1110_s28, 384, %s1108_s15, %s326_s23, %s861_s6, %s861_s6, %s862_s18  }
 0x31c   : > { %s501_s24 = sshll.u32 %s1237_s25, 7  ;;  %s360_s4 = sshll.u32 %s1082_s29, 4  ;;  %s361_s4 = int_to_ptr.vmem [resolvable:$true] %s360_s4 }
 0x31d   : > { %s1242_s2 = sld [smem:[#allocation25_spill]]  ;;  %s331_s30 = scalar_lea.sflag [#allocation12], %s1076_s12 }
 0x31e   : > { %s723_s26 = scalar_lea.vmem %s361_s4, 128  ;;  %s863_s3 = smov [#allocation11]  }
 0x31f   : > { %p724_p2 = scmp.ne.s32.totalorder %s361_s4, %s723_s26  ;;  %s727_s11 = sshll.u32 %s863_s3, 4  ;;  %s728_s11 = int_to_ptr.vmem [resolvable:$false] %s727_s11 }
 0x320   : > { %s729_s0 = scalar_lea.vmem %s728_s11, 256  ;;  %p730_p12 = scmp.lt.s32.totalorder %s361_s4, %s728_s11 }
 0x321   : > { %p725_p5 = pnand %p724_p2, %p1241_p9  ;;  %p731_p0 = scmp.lt.s32.totalorder %s729_s0, %s723_s26 }
 0x323   : > { %s1141_s19 = scalar_lea.hbm %s1242_s2, %s501_s24  ;;  %p726_p8 = pneg %p725_p5 }
 0x324   : > { %p732_p10 = por %p731_p0, %p730_p12 }
 0x326   : > { %p733_p6 = pnand %p732_p10, %p726_p8 }
 0x328   : > { %736 = shalt.err (!%p733_p6)
}
 0x329   : > { %s737_s12 = scalar_lea.hbm %s1141_s19, 128  ;;  %s741_s28 = scalar_lea.hbm %s1242_s2, 256 }
 0x32a   : > { %p738_p1 = scmp.ne.s32.totalorder %s1141_s19, %s737_s12  ;;  %p742_p7 = scmp.lt.u32.totalorder %s1141_s19, %s1242_s2 }
 0x32b   : > { %p743_p11 = scmp.lt.u32.totalorder %s741_s28, %s737_s12  ;;  %p745_p2 = scmp.lt.u32.totalorder %s737_s12, %s1141_s19 }
 0x32c   : > { %p739_p4 = pnand %p738_p1, %p1241_p9 }
 0x32d   : > { %p744_p13 = por %p743_p11, %p742_p7 }
 0x32e   : > { %p740_p3 = pneg %p739_p4 }
 0x32f   : > { %p746_p5 = por %p745_p2, %p744_p13 }
 0x331   : > { %p747_p8 = pnand %p746_p5, %p740_p3 }
 0x333   : > { %750 = shalt.err (!%p747_p8)
}
 0x334   : > { %513 = dma.vmem_to_hbm [thread:$0]  (%p1241_p9), %s361_s4, 128, %s1141_s19, %s331_s30  }
 0x335 PF: > { %s1243_s0 = sld [smem:[#allocation17_spill]]  ;;  %s1244_s6 = sld [smem:[#allocation20_spill]] }
 0x336   : > { %p534_p12 = scmp.ge.s32.totalorder %s853_s22, 2 }
 0x33b   : > { %s372_s18 = sand.u32 1, %s1243_s0   ;;  %p1245_p0 = scmp.ne.s32.totalorder %s1244_s6, 0 }
 0x33c   : > { %s373_s24 = scalar_lea.sflag [#allocation7], %s372_s18 }
 0x33d   : > { %p525_p10 = pnand %p534_p12, %p1245_p0 }
 0x33f   : > { %804 = dma.done.wait (!%p525_p10), %s373_s24, 384  }
 0x340   : > { %806 = vsyncadd (!%p525_p10), %s373_s24, 4294966912  ;;  %s382_s8 = scalar_lea.sflag [#allocation12], %s372_s18 }
 0x341   : > { %808 = dma.done.wait (!%p525_p10), %s382_s8, 128  }
 0x342   : > { %810 = vsyncadd (!%p525_p10), %s382_s8, 4294967168  ;;  %s24_s22 = sadd.s32 1, %s853_s22   ;;  %s1246_s27 = sld [smem:[#allocation21_spill]] }
 0x343   : > { %p21_p6 = scmp.ge.s32.totalorder %s24_s22, 6   ;;  %s1247_s12 = smov %s817_s13 }
 0x344   : > { %s1248_s13 = smov %s821_s14  ;;  %s1249_s14 = smov %s1018_s9 }
 0x345   : > { %s1250_s15 = smov %s829_s16  ;;  %s1251_s16 = smov %s833_s17 }
 0x346   : > { %s1252_s17 = smov %s1021_s1  ;;  %s1253_s18 = smov %s845_s20 }
 0x347   : > { %s1254_s19 = smov %s849_s21  ;;  %s1256_s21 = smov %s1262_s10 }
 0x348   : > { %s1255_s20 = smov %s1246_s27  ;;  %23 = sbr.rel (!%p21_p6) target bundleno = 17 (0x11), region = 102 }
 0x34f   :  { %387 = vsyncpa [#allocation6], 1 }
 0x350   :  { %389 = vsyncpa [#allocation6 + $0x1], 1 }
 0x351   :  { %390 = vsyncpa [#allocation9], 1 }
 0x352   :  { %391 = vsyncpa [#allocation7], 1 }
 0x353   :  { %393 = vsyncpa [#allocation7 + $0x1], 1 }
 0x354   :  { %394 = vsyncpa [#allocation12], 1 }
 0x355   :  { %396 = vsyncpa [#allocation12 + $0x1], 1 }

// kernel: residual_block_v2.4
= control target key start
LH: loop header
LB: loop body
LE: loop exit
PB: predicated region body
PF: predicated region fallthrough
CT: control target
= control target key end

     0   :  { %s1966_s0 = inlined_call_operand.hbm [shape: f32[2,2,8,256], index: 0, kind: input, shape index: {}]   ;;  %s1967_s1 = inlined_call_operand.hbm [shape: f32[2,8,1], index: 1, kind: input, shape index: {}]   ;;  %s1968_s2 = inlined_call_operand.hbm [shape: f32[2,8,1], index: 2, kind: input, shape index: {}]   ;;  %s1969_s3 = inlined_call_operand.hbm [shape: bf16[16,56], index: 3, kind: input, shape index: {}]   ;;  %s1970_s4 = inlined_call_operand.hbm [shape: f32[16,1], index: 4, kind: input, shape index: {}]   ;;  %s1971_s5 = inlined_call_operand.hbm [shape: f32[2,16,256], index: 5, kind: output, shape index: {0}]   ;;  %s1972_s6 = inlined_call_operand.hbm [shape: f32[2,48,1], index: 6, kind: output, shape index: {1}]  }
   0x1   :  { %2005 = sst [smem:[#allocation32_spill]] %s1967_s1 }
   0x2   :  { %2006 = sst [smem:[#allocation33_spill]] %s1969_s3 }
   0x3   :  { %2007 = sst [smem:[#allocation34_spill]] %s1970_s4 }
   0x4   :  { %2008 = sst [smem:[#allocation35_spill]] %s1971_s5 }
   0x5   :  { %2009 = sst [smem:[#allocation36_spill]] %s1972_s6 }
   0x6   :  { %12 = vsyncpa [#allocation3], 0 }
   0x7   :  { %14 = vsyncpa [#allocation3 + $0x1], 0 }
   0x8   :  { %15 = vsyncpa [#allocation6], 0 }
   0x9   :  { %17 = vsyncpa [#allocation6 + $0x1], 0 }
   0xa   :  { %18 = vsyncpa [#allocation9], 0 }
   0xb   :  { %19 = vsyncpa [#allocation4], 0 }
   0xc   :  { %21 = vsyncpa [#allocation4 + $0x1], 0 }
   0xd   :  { %22 = vsyncpa [#allocation13], 0 }
   0xe   :  { %24 = vsyncpa [#allocation13 + $0x1], 0  ;;  %s1444_s21 = smov 0   ;;  %s1446_s22 = smov 0  }
   0xf   :  { %s1448_s23 = smov 0   ;;  %s1450_s24 = smov 0  }
  0x10   :  { %s1452_s25 = smov 0   ;;  %s1454_s26 = smov 0  }
  0x11   :  { %s1456_s27 = smov 0   ;;  %s1458_s28 = smov 0  }
  0x12   :  { %s1460_s29 = smov 0   ;;  %s1462_s30 = smov 0  }
  0x13   :  { %s1464_s7 = smov 0  }
  0x14 LB: > { %2010 = sst [smem:[#allocation19_spill]] %s1342_s21  ;;  %s1500_s8 = sadd.s32 4294967295, %s1382_s7   ;;  %s1382_s7 = sphi %s1464_s7, %s30_s7   ;;  %s1378_s30 = sphi %s1462_s30, %s2087_s30   ;;  %s1374_s29 = sphi %s1460_s29, %s2086_s29   ;;  %s1370_s28 = sphi %s1458_s28, %s2085_s28   ;;  %s1366_s27 = sphi %s1456_s27, %s2084_s27   ;;  %s1362_s26 = sphi %s1454_s26, %s2083_s26   ;;  %s1358_s25 = sphi %s1452_s25, %s2082_s25   ;;  %s1354_s24 = sphi %s1450_s24, %s2081_s24   ;;  %s1350_s23 = sphi %s1448_s23, %s2080_s23   ;;  %s1346_s22 = sphi %s1446_s22, %s2079_s22   ;;  %s1342_s21 = sphi %s1444_s21, %s2076_s21  }
  0x15   : > { %2011 = sst [smem:[#allocation20_spill]] %s1346_s22  ;;  %p823_p0 = scmp.ge.s32.totalorder %s1382_s7, 1 }
  0x16   : > { %2012 = sst [smem:[#allocation21_spill]] %s1354_s24  ;;  %p1973_p1 = scmp.eq.s32.totalorder %s1500_s8, 0 }
  0x17   : > { %2013 = sst [smem:[#allocation22_spill]] %s1366_s27  ;;  %p223_p2 = scmp.lt.s32.totalorder %s1382_s7, 5 }
  0x18   : > { %2014 = sst [smem:[#allocation23_spill]] %s1370_s28  ;;  %s1384_s10 = smov [#allocation8]  }
  0x19   : > { %2015 = sst [smem:[#allocation24_spill]] %s1500_s8  ;;  %p1505_p3 = pnand %p823_p0, %p223_p2 }
  0x1a   : > { %s235_s11 = sshll.u32 %s1384_s10, 4  ;;  %s2018_s3 = sld [smem:[#allocation33_spill]]  ;;  %s236_s11 = int_to_ptr.vmem [resolvable:$true] %s235_s11 }
  0x1b   : > { %s2016_s9 = scalar_select %p1505_p3, 1, 0 }
  0x1c   : > { %p895_p4 = pneg %p1505_p3 }
  0x1e   : > { %p1513_p5 = pnand %p895_p4, %p1973_p1 }
  0x20   : > { %s1074_s15 = scalar_lea.hbm %s2018_s3, 128  ;;  %p1988_p7 = pneg %p1513_p5 }
  0x21   : > { %p1075_p6 = scmp.ne.s32.totalorder %s2018_s3, %s1074_s15  ;;  %p1081_p10 = scmp.lt.u32.totalorder %s1074_s15, %s2018_s3 }
  0x23   : > { %p1077_p8 = pnand %p1988_p7, %p1075_p6 }
  0x25   : > { %p1078_p9 = pneg %p1077_p8 }
  0x27   : > { %p1083_p11 = pnand %p1081_p10, %p1078_p9 }
  0x29   : > { %1086 = shalt.err (!%p1083_p11)
}
  0x2a   : > { %s1087_s20 = scalar_lea.vmem %s236_s11, 128  ;;  %p1095_p2 = scmp.lt.s32.totalorder %s236_s11, %s236_s11 }
  0x2b   : > { %p1088_p12 = scmp.ne.s32.totalorder %s236_s11, %s1087_s20  ;;  %p1096_p4 = scmp.lt.s32.totalorder %s1087_s20, %s1087_s20 }
  0x2d   : > { %p1090_p13 = pnand %p1088_p12, %p1988_p7  ;;  %p1097_p1 = por %p1096_p4, %p1095_p2 }
  0x2f   : > { %p1091_p0 = pneg %p1090_p13 }
  0x31   : > { %p1098_p3 = pnand %p1097_p1, %p1091_p0 }
  0x33   : > { %1101 = shalt.err (!%p1098_p3)
}
  0x34   : > { %s1385_s10 = smov 64   ;;  %s1386_s13 = smov 4  }
  0x35   : > { %898 = dma.hbm_to_vmem [thread:$0]  (!%p1513_p5), %s2018_s3, 128, %s236_s11, [#allocation9], %s1385_s10, %s1385_s10, %s1386_s13  }
  0x36   : > { %s822_s16 = sadd.s32 4294967294, %s1382_s7   ;;  %p1987_p1 = scmp.eq.s32.totalorder %s1382_s7, 0 }
  0x37   : > { %p84_p3 = scmp.ne.s32.totalorder %s1350_s23, %s1346_s22  ;;  %p90_p6 = scmp.ne.s32.totalorder %s1346_s22, %s1342_s21 }
  0x38   : > { %p1986_p8 = scmp.eq.s32.totalorder %s1500_s8, 3  ;;  %p1554_p10 = scmp.eq.s32.totalorder %s822_s16, 3 }
  0x39   : > { %p1550_p9 = por %p84_p3, %p1987_p1  ;;  %p2021_p11 = scmp.eq.s32.totalorder %s1500_s8, 0 }
  0x3a   : > { %s2020_s20 = scalar_select %p1554_p10, 1, 0 }
  0x3b   : > { %p1560_p12 = por %p90_p6, %p2021_p11  ;;  %p1566_p13 = por %p1986_p8, %p84_p3 }
  0x3c   : > { %p1572_p0 = por %p1554_p10, %p90_p6  ;;  %p1985_p2 = scmp.lt.s32.totalorder %s1382_s7, 4 }
  0x3d   : > { %s2022_s11 = scalar_select %p1560_p12, 1, 0 }
  0x3e   : > { %s2024_s10 = scalar_select %p1566_p13, 1, 0 }
  0x3f   : > { %2023 = sst [smem:[#allocation25_spill]] %s2022_s11  ;;  %s283_s14 = sand.u32 1, %s1382_s7  }
  0x40   : > { %2025 = sst [smem:[#allocation26_spill]] %s2024_s10  ;;  %s285_s15 = sand.u32 1, %s1350_s23  }
  0x41   : > { %s2026_s13 = scalar_select %p1572_p0, 1, 0 }
  0x42   : > { %s1579_s16 = sshll.u32 %s285_s15, 3  ;;  %s832_s18 = sshll.u32 %s1378_s30, 7 }
  0x43   : > { %2027 = sst [smem:[#allocation27_spill]] %s2026_s13  ;;  %s2028_s1 = sld [smem:[#allocation32_spill]] }
  0x44   : > { %s287_s6 = scalar_lea.vmem [#allocation5], %s1579_s16  ;;  %p1594_p4 = pnand %p1985_p2, %p1550_p9 }
  0x45   : > { %s294_s10 = sshll.u32 %s287_s6, 4  ;;  %s1601_s3 = scalar_lea.hbm %s1968_s2, %s832_s18  ;;  %s1588_s10 = int_to_ptr.vmem [resolvable:$true] %s294_s10 }
  0x46   : > { %s2029_s15 = scalar_select %p1594_p4, 1, 0 }
  0x47   : > { %s1603_s17 = scalar_lea.sflag [#allocation6], %s283_s14  ;;  %p1992_p6 = pneg %p1594_p4 }
  0x49   : > { %s1585_s21 = scalar_lea.hbm %s2028_s1, %s832_s18  ;;  %s1107_s27 = scalar_lea.hbm %s2028_s1, 256 }
  0x4a   : > { %s1102_s28 = scalar_lea.hbm %s1585_s21, 128  ;;  %p1108_p2 = scmp.lt.u32.totalorder %s1585_s21, %s2028_s1 }
  0x4b   : > { %p1103_p3 = scmp.ne.s32.totalorder %s1585_s21, %s1102_s28  ;;  %p1109_p8 = scmp.lt.u32.totalorder %s1107_s27, %s1102_s28 }
  0x4c   : > { %p1111_p7 = scmp.lt.u32.totalorder %s1102_s28, %s1585_s21 }
  0x4d   : > { %p1105_p11 = pnand %p1992_p6, %p1103_p3  ;;  %p1110_p1 = por %p1109_p8, %p1108_p2 }
  0x4f   : > { %p1106_p9 = pneg %p1105_p11  ;;  %p1112_p0 = por %p1111_p7, %p1110_p1 }
  0x51   : > { %p1113_p13 = pnand %p1112_p0, %p1106_p9 }
  0x53   : > { %1116 = shalt.err (!%p1113_p13)
}
  0x54   : > { %s1117_s18 = scalar_lea.vmem %s1588_s10, 128  ;;  %s1387_s13 = smov [#allocation5]  }
  0x55   : > { %p1118_p3 = scmp.ne.s32.totalorder %s1588_s10, %s1117_s18  ;;  %s1122_s14 = sshll.u32 %s1387_s13, 4  ;;  %s1123_s14 = int_to_ptr.vmem [resolvable:$false] %s1122_s14 }
  0x56   : > { %s1124_s11 = scalar_lea.vmem %s1123_s14, 256  ;;  %p1125_p10 = scmp.lt.s32.totalorder %s1588_s10, %s1123_s14 }
  0x57   : > { %p1120_p11 = pnand %p1118_p3, %p1992_p6  ;;  %p1126_p8 = scmp.lt.s32.totalorder %s1124_s11, %s1117_s18 }
  0x59   : > { %p1121_p12 = pneg %p1120_p11  ;;  %p1127_p2 = por %p1126_p8, %p1125_p10 }
  0x5b   : > { %p1128_p7 = pnand %p1127_p2, %p1121_p12 }
  0x5d   : > { %1131 = shalt.err (!%p1128_p7)
}
  0x5e   : > { %908 = dma.hbm_to_vmem [thread:$0]  (!%p1594_p4), %s1585_s21, 128, %s1588_s10, %s1603_s17  }
  0x5f   : > { %s1388_s27 = smov [#allocation10]   ;;  %s2030_s4 = sld [smem:[#allocation34_spill]] }
  0x60   : > { %s248_s28 = sshll.u32 %s1388_s27, 4  ;;  %p2031_p10 = pneg %p1513_p5  ;;  %s249_s28 = int_to_ptr.vmem [resolvable:$true] %s248_s28 }
  0x65   : > { %s1132_s5 = scalar_lea.hbm %s2030_s4, 256 }
  0x66   : > { %p1133_p1 = scmp.ne.s32.totalorder %s2030_s4, %s1132_s5  ;;  %p1139_p0 = scmp.lt.u32.totalorder %s1132_s5, %s2030_s4 }
  0x68   : > { %p1135_p12 = pnand %p1133_p1, %p2031_p10 }
  0x6a   : > { %p1136_p13 = pneg %p1135_p12 }
  0x6c   : > { %p1141_p9 = pnand %p1139_p0, %p1136_p13 }
  0x6e   : > { %1144 = shalt.err (!%p1141_p9)
}
  0x6f   : > { %s1145_s21 = scalar_lea.vmem %s249_s28, 256  ;;  %p2032_p11 = pmov %p2031_p10 }
  0x70   : > { %p1146_p3 = scmp.ne.s32.totalorder %s249_s28, %s1145_s21  ;;  %p1153_p7 = scmp.lt.s32.totalorder %s249_s28, %s249_s28 }
  0x71   : > { %p1154_p6 = scmp.lt.s32.totalorder %s1145_s21, %s1145_s21 }
  0x72   : > { %p1148_p8 = pnand %p1146_p3, %p2032_p11 }
  0x73   : > { %p1155_p4 = por %p1154_p6, %p1153_p7 }
  0x74   : > { %p1149_p2 = pneg %p1148_p8 }
  0x76   : > { %p1156_p1 = pnand %p1155_p4, %p1149_p2 }
  0x78   : > { %1159 = shalt.err (!%p1156_p1)
}
  0x79   : > { %s1389_s10 = smov 128   ;;  %s1390_s27 = smov 8  }
  0x7a   : > { %901 = dma.hbm_to_vmem [thread:$0]  (!%p1513_p5), %s2030_s4, 256, %s249_s28, [#allocation9], %s1389_s10, %s1389_s10, %s1390_s27  }
  0x7b   : > { %s39_s5 = sadd.s32 1, %s1374_s29  ;;  %s51_s13 = sadd.s32 1, %s1362_s26 }
  0x7c   : > { %p40_p4 = scmp.ge.s32.totalorder %s39_s5, 2  ;;  %p58_p6 = scmp.ne.s32.totalorder %s1362_s26, %s1358_s25 }
  0x7d   : > { %p64_p10 = scmp.ne.s32.totalorder %s1358_s25, %s1354_s24  ;;  %s262_s14 = sand.u32 1, %s1362_s26  }
  0x7e   : > { %s2089_s5 = smov (%p40_p4, %s39_s5), 0  ;;  %s2034_s18 = sadd.s32 1, %s1378_s30 }
  0x7f   : > { %2033 = sst [smem:[#allocation28_spill]] %s2089_s5  ;;  %s2091_s18 = smov (!%p40_p4, %s2034_s18), %s1378_s30 }
  0x80   : > { %s47_s12 = ssub.s32 %s1374_s29, %s2089_s5  ;;  %p2035_p12 = scmp.eq.s32.totalorder %s1382_s7, 0 }
  0x81   : > { %p44_p13 = scmp.ge.s32.totalorder %s2091_s18, 2  ;;  %p2037_p0 = scmp.eq.s32.totalorder %s1500_s8, 0 }
  0x82   : > { %p1667_p5 = por %p2035_p12, %p58_p6  ;;  %p2039_p3 = scmp.eq.s32.totalorder %s1500_s8, 3 }
  0x83   : > { %p1673_p9 = por %p2037_p0, %p64_p10  ;;  %p2042_p8 = scmp.ne.s32.totalorder %s2020_s20, 0 }
  0x84   : > { %p1679_p11 = por %p2039_p3, %p58_p6  ;;  %s2093_s18 = smov (%p44_p13, %s2091_s18), 0 }
  0x85   : > { %p1685_p2 = por %p2042_p8, %p64_p10  ;;  %2045 = sst [smem:[#allocation31_spill]] %s2093_s18 }
  0x86   : > { %s2040_s21 = scalar_select %p1679_p11, 1, 0 }
  0x87   : > { %s2043_s10 = scalar_select %p1685_p2, 1, 0 }
  0x88   : > { %2041 = sst [smem:[#allocation29_spill]] %s2040_s21  ;;  %s827_s27 = sshll.u32 %s262_s14, 4 }
  0x89   : > { %2044 = sst [smem:[#allocation30_spill]] %s2043_s10  ;;  %s46_s6 = ssub.s32 %s1378_s30, %s2093_s18 }
  0x8a   : > { %s48_s19 = sor.u32 %s47_s12, %s46_s6  ;;  %p75_p7 = scmp.eq.s32.totalorder %s46_s6, 0 }
  0x8b   : > { %p49_p1 = scmp.eq.s32.totalorder %s48_s19, 0  ;;  %s828_s1 = sshll.u32 %s1374_s29, 1 }
  0x8c   : > { %s2046_s4 = sadd.s32 1, %s1350_s23  ;;  %s829_s24 = sshll.u32 %s1378_s30, 2 }
  0x8d   : > { %s1697_s5 = scalar_select %p75_p7, %s1350_s23, %s2046_s4  }
  0x8e   : > { %s1700_s20 = scalar_select %p49_p1, %s1362_s26, %s51_s13  }
  0x8f   : > { %s266_s21 = scalar_lea.vmem [#allocation2], %s827_s27  ;;  %s272_s22 = sadd.s32 %s829_s24, %s828_s1 }
  0x90   : > { %s276_s10 = sshll.u32 %s266_s21, 4  ;;  %s830_s8 = sshll.u32 %s272_s22, 7  ;;  %s1703_s10 = int_to_ptr.vmem [resolvable:$true] %s276_s10 }
  0x91   : > { %p2047_p4 = scmp.lt.s32.totalorder %s1382_s7, 4  ;;  %s1716_s4 = scalar_lea.hbm %s1966_s0, %s830_s8 }
  0x92   : > { %s305_s1 = scalar_lea.vmem [#allocation7], %s1579_s16  ;;  %s263_s22 = scalar_lea.sflag [#allocation3], %s262_s14 }
  0x93   : > { %p1709_p6 = pnand %p2047_p4, %p1667_p5  ;;  %s312_s24 = sshll.u32 %s305_s1, 4  ;;  %s1719_s24 = int_to_ptr.vmem [resolvable:$true] %s312_s24 }
  0x94   : > { %s1160_s13 = scalar_lea.hbm %s1716_s4, 256  ;;  %s1165_s21 = scalar_lea.hbm %s1966_s0, 1024 }
  0x95   : > { %p1161_p10 = scmp.ne.s32.totalorder %s1716_s4, %s1160_s13  ;;  %p1162_p12 = pneg %p1709_p6 }
  0x96   : > { %p1166_p0 = scmp.lt.u32.totalorder %s1716_s4, %s1966_s0  ;;  %p1167_p3 = scmp.lt.u32.totalorder %s1165_s21, %s1160_s13 }
  0x97   : > { %p1163_p5 = pnand %p1162_p12, %p1161_p10  ;;  %p1169_p7 = scmp.lt.u32.totalorder %s1160_s13, %s1716_s4 }
  0x98   : > { %p1168_p8 = por %p1167_p3, %p1166_p0 }
  0x99   : > { %p1164_p13 = pneg %p1163_p5 }
  0x9a   : > { %p1170_p1 = por %p1169_p7, %p1168_p8 }
  0x9c   : > { %p1171_p4 = pnand %p1170_p1, %p1164_p13 }
  0x9e   : > { %1174 = shalt.err (!%p1171_p4)
}
  0x9f   : > { %s1175_s16 = scalar_lea.vmem %s1703_s10, 256  ;;  %s1391_s14 = smov [#allocation2]  }
  0xa0   : > { %p1176_p10 = scmp.ne.s32.totalorder %s1703_s10, %s1175_s16  ;;  %s1180_s12 = sshll.u32 %s1391_s14, 4  ;;  %s1181_s12 = int_to_ptr.vmem [resolvable:$false] %s1180_s12 }
  0xa1   : > { %s1182_s6 = scalar_lea.vmem %s1181_s12, 512  ;;  %p1183_p11 = scmp.lt.s32.totalorder %s1703_s10, %s1181_s12 }
  0xa2   : > { %p1178_p5 = pnand %p1176_p10, %p1162_p12  ;;  %p1184_p0 = scmp.lt.s32.totalorder %s1182_s6, %s1175_s16 }
  0xa4   : > { %p1179_p2 = pneg %p1178_p5  ;;  %p1185_p3 = por %p1184_p0, %p1183_p11 }
  0xa6   : > { %p1186_p8 = pnand %p1185_p3, %p1179_p2 }
  0xa8   : > { %1189 = shalt.err (!%p1186_p8)
}
  0xa9   : > { %905 = dma.hbm_to_vmem [thread:$0]  (!%p1709_p6), %s1716_s4, 256, %s1703_s10, %s263_s22  }
  0xaa   : > { %s1190_s1 = scalar_lea.hbm %s1601_s3, 128  ;;  %p2049_p13 = scmp.ne.s32.totalorder %s2029_s15, 0 }
  0xab   : > { %p1191_p12 = scmp.ne.s32.totalorder %s1601_s3, %s1190_s1  ;;  %s1195_s8 = scalar_lea.hbm %s1968_s2, 256 }
  0xac   : > { %p2050_p7 = pneg %p2049_p13  ;;  %p1196_p11 = scmp.lt.u32.totalorder %s1601_s3, %s1968_s2 }
  0xad   : > { %p1197_p2 = scmp.lt.u32.totalorder %s1195_s8, %s1190_s1  ;;  %p1199_p5 = scmp.lt.u32.totalorder %s1190_s1, %s1601_s3 }
  0xae   : > { %p1193_p1 = pnand %p1191_p12, %p2050_p7 }
  0xaf   : > { %p1198_p10 = por %p1197_p2, %p1196_p11 }
  0xb0   : > { %p1194_p4 = pneg %p1193_p1 }
  0xb1   : > { %p1200_p0 = por %p1199_p5, %p1198_p10 }
  0xb3   : > { %p1201_p3 = pnand %p1200_p0, %p1194_p4 }
  0xb5   : > { %1204 = shalt.err (!%p1201_p3)
}
  0xb6   : > { %s1205_s10 = scalar_lea.vmem %s1719_s24, 128  ;;  %p2051_p8 = pmov %p2050_p7 }
  0xb7   : > { %p1206_p6 = scmp.ne.s32.totalorder %s1719_s24, %s1205_s10  ;;  %s1392_s4 = smov [#allocation7]  }
  0xb8   : > { %s1210_s22 = sshll.u32 %s1392_s4, 4  ;;  %s1211_s22 = int_to_ptr.vmem [resolvable:$false] %s1210_s22 }
  0xb9   : > { %p1208_p12 = pnand %p1206_p6, %p2051_p8  ;;  %s1212_s27 = scalar_lea.vmem %s1211_s22, 256 }
  0xba   : > { %p1213_p1 = scmp.lt.s32.totalorder %s1719_s24, %s1211_s22  ;;  %p1214_p11 = scmp.lt.s32.totalorder %s1212_s27, %s1205_s10 }
  0xbb   : > { %p1209_p7 = pneg %p1208_p12 }
  0xbc   : > { %p1215_p2 = por %p1214_p11, %p1213_p1 }
  0xbe   : > { %p1216_p10 = pnand %p1215_p2, %p1209_p7 }
  0xc0   : > { %1219 = shalt.err (!%p1216_p10)
}
  0xc1   : > { %911 = dma.hbm_to_vmem [thread:$0]  (!%p2049_p13), %s1601_s3, 128, %s1719_s24, %s1603_s17  }
  0xc2   : > { %p2052_p4 = scmp.ne.s32.totalorder %s2016_s9, 0 }
  0xc3   : > { %s1773_s19 = sand.u32 (!%p2052_p4), 1, %s1358_s25  }
  0xc4   : > { %321 = sbr.rel (%p2052_p4) target bundleno = 1062 (0x426), region = 40  ;;  %s836_s16 = sshll.u32 (!%p2052_p4), %s1773_s19, 4 }
  0xc5   : > { %s324_s14 = scalar_lea.sflag (!%p2052_p4), [#allocation3], %s1773_s19  ;;  %s1777_s12 = scalar_lea.vmem (!%p2052_p4), [#allocation2], %s836_s16 }
  0xcb   : > { %1321 = dma.done.wait (%p1673_p9), %s324_s14, 256  }
  0xcc   : > { %1323 = vsyncadd (%p1673_p9), %s324_s14, 4294967040  ;;  %s2053_s15 = sld [smem:[#allocation24_spill]]  ;;  %s2054_s3 = sld [smem:[#allocation20_spill]] }
  0xcd   : > { %s2055_s17 = sld [smem:[#allocation25_spill]] }
  0xd2   : > { %s332_s9 = sand.u32 1, %s2053_s15   ;;  %s1785_s24 = sand.u32 1, %s2054_s3  }
  0xd3   : > { %s837_s6 = sshll.u32 %s1785_s24, 3  ;;  %s333_s1 = scalar_lea.sflag [#allocation6], %s332_s9 }
  0xd4   : > { %s336_s13 = scalar_lea.vmem [#allocation5], %s837_s6  ;;  %p2056_p13 = scmp.ne.s32.totalorder %s2055_s17, 0 }
  0xd6   : > { %1325 = dma.done.wait (%p2056_p13), %s333_s1, 256  }
  0xd7   : > { %1327 = vsyncadd (%p2056_p13), %s333_s1, 4294967040  ;;  %s345_s28 = scalar_lea.vmem [#allocation7], %s837_s6  ;;  %p2057_p5 = scmp.eq.s32.totalorder %s2053_s15, 0 }
  0xd9   : > { %1329 = dma.done.wait (%p2057_p5), [#allocation9], 384   ;;  %p2058_p9 = pmov %p2057_p5 }
  0xda   : > { %s875_s11 = smul.u32 48, %s1785_s24  ;;  %s1797_s8 = scalar_lea.vmem [#allocation11], %s836_s16 }
  0xdb   : > { %1331 = vsyncadd (%p2058_p9), [#allocation9], 4294966912  ;;  %s2059_s18 = sld [smem:[#allocation22_spill]] }
  0xdc   : > { %s1799_s21 = scalar_lea.vmem [#allocation12], %s875_s11 }
  0xe1   : > { %p842_p0 = scmp.ne.s32.totalorder %s2059_s18, 0 }
  0xe2   : > { %vm402_vm0 = vcmask (!%p842_p0), 7168   ;;  %v1393_v0 = vmov (!%p842_p0), 0.0  }
  0xe3   : > { %401 = sbr.rel (%p842_p0) target bundleno = 234 (0xea), region = 64  ;;  %403 = vst.msk [vmem:[%s1799_s21] sm:$0xff] (!%p842_p0), %vm402_vm0, %v1393_v0  ;;  %404 = vst.msk [vmem:[%s1799_s21 + $0x8] sm:$0xff] (!%p842_p0), %vm402_vm0, %v1393_v0 }
  0xe4   : > { %405 = vst.msk [vmem:[%s1799_s21 + $0x10] sm:$0xff] (!%p842_p0), %vm402_vm0, %v1393_v0  ;;  %406 = vst.msk [vmem:[%s1799_s21 + $0x18] sm:$0xff] (!%p842_p0), %vm402_vm0, %v1393_v0 }
  0xe5   : > { %407 = vst.msk [vmem:[%s1799_s21 + $0x20] sm:$0xff] (!%p842_p0), %vm402_vm0, %v1393_v0  ;;  %408 = vst.msk [vmem:[%s1799_s21 + $0x28] sm:$0xff] (!%p842_p0), %vm402_vm0, %v1393_v0 }
  0xea PF: > { %v411_v1 = vld [vmem:[%s336_s13] sm:$0xff]  ;;  %v1394_v2 = vmov 0   ;;  %s2060_s10 = sld [smem:[#allocation22_spill]]  ;;  %v412_v3 = vld [vmem:[%s345_s28] sm:$0xff]  ;;  %v441_v14 = vlaneseq  ;;  %v1395_v24 = vmov 0.0   ;;  %s1396_s27 = smov 125  }
  0xeb   : > { %1033 = vset.pattern.permute.xlu0 %v1394_v2  ;;  %1064 = vset.pattern.permute.xlu1 %v1394_v2  ;;  %v409_v5 = vld [vmem:[%s1777_s12] sm:$0xff]  ;;  %v410_v6 = vld [vmem:[%s1777_s12 + $0x8] sm:$0xff]  ;;  %s1397_s16 = smov 127   ;;  %s1398_s14 = smov 123   ;;  %vm1400_vm7 = vmmov 0   ;;  %vm1403_vm9 = vmmov 1  }
  0xec   : > { %415 = vperm.xlu0 %1033, %v411_v1   ;;  %v1811_v15 = vand.u32 127, %v441_v14  ;;  %863 = vmatprep.subr.bf16.mxu0 %v1395_v24  ;;  %s1399_s12 = smov 126   ;;  %v499_v33 = vld [vmem:[#allocation10] sm:$0xff]  ;;  %s1401_s15 = smov 124   ;;  %v500_v34 = vld [vmem:[#allocation10 + $0x8] sm:$0xff]  ;;  %vm520_vm0 = vcmask 1043456  }
  0xed   : > { %871 = vmatprep.mubr.msk.bf16.mxu0 %vm1400_vm7, %v1395_v24  ;;  %s1402_s3 = smov 122   ;;  %v1065_v0 = vld [vmem:[#allocation8] sm:$0xff]   ;;  %v571_v14 = vld [vmem:[%s1799_s21 + $0x20] sm:$0xff]  ;;  %s2063_s17 = sld [smem:[#allocation23_spill]] }
  0xee   : > { %v443_v20 = vadd.s32 128, %v1811_v15  ;;  %vm461_vm8 = vcmp.lt.s32.totalorder %v1811_v15, 127  ;;  %vm467_vm11 = vcmp.lt.s32.totalorder %v1811_v15, 126  ;;  %vm473_vm12 = vcmp.lt.s32.totalorder %v1811_v15, 125  ;;  %s2064_s9 = sld [smem:[#allocation29_spill]]  ;;  %s2065_s18 = sld [smem:[#allocation35_spill]] }
  0xef   : > { %vm479_vm13 = vcmp.lt.s32.totalorder %v1811_v15, 124  ;;  %vm485_vm14 = vcmp.lt.s32.totalorder %v1811_v15, 123  ;;  %vm491_vm15 = vcmp.lt.s32.totalorder %v1811_v15, 122 }
  0xf0   : > { %422 = vperm.xlu0 %1033, %v412_v3   ;;  %s845_s4 = sshll.u32 %s2060_s10, 7 }
  0xf1   : > { %s846_s22 = sadd.s32 4294967293, %s845_s4 }
  0xf2   : > { %v446_v21 = vstv %s846_s22  ;;  %s622_s22 = sshll.u32 %s1797_s8, 4  ;;  %s1856_s22 = int_to_ptr.vmem [resolvable:$true] %s622_s22 }
  0xf3   : > { %v447_v22 = vadd.s32 %v446_v21, %v1811_v15  ;;  %v448_v23 = vadd.s32 %v446_v21, %v443_v20  ;;  %v572_v20 = vld [vmem:[%s1799_s21 + $0x28] sm:$0xff]  ;;  %s853_s6 = sshll.u32 %s2063_s17, 2 }
  0xf4   : > { %s619_s1 = sadd.s32 %s2060_s10, %s853_s6  ;;  %p2066_p6 = scmp.ne.s32.totalorder %s2064_s9, 0 }
  0xf5   : > { %vm449_vm1 = vcmp.ge.s32.totalorder %v447_v22, 0  ;;  %vm451_vm2 = vcmp.lt.s32.totalorder %v447_v22, 256  ;;  %vm450_vm3 = vcmp.ge.s32.totalorder %v448_v23, 0  ;;  %vm452_vm4 = vcmp.lt.s32.totalorder %v448_v23, 256  ;;  %s854_s13 = sshll.u32 %s619_s1, 7 }
  0xf6   : > { %vm1816_vm5 = vmand %vm449_vm1, %vm451_vm2  ;;  %vm516_vm1 = vcmask 457728   ;;  %vm595_vm2 = vcmask 7168   ;;  %s1853_s4 = scalar_lea.hbm %s2065_s18, %s854_s13 }
  0xf7   : > { %vm454_vm6 = vmand %vm450_vm3, %vm452_vm4 }
  0xf8   : > { %vm848_vm10 = vmpackc.low %vm1403_vm9, %vm1816_vm5 }
 0x16b   : > { %v416_v4 = vpop.permute.xlu0 %415 }
 0x16c   : > { %v418_v7 = vmul.f32 %v416_v4, %v409_v5  ;;  %v419_v8 = vmul.f32 %v416_v4, %v410_v6 }
 0x16f   : > { %v423_v9 = vpop.permute.xlu0 %422 }
 0x170   : > { %v425_v10 = vadd.f32 %v423_v9, %v418_v7  ;;  %v426_v11 = vadd.f32 %v423_v9, %v419_v8  ;;  %v567_v9 = vld [vmem:[%s1799_s21] sm:$0xff] }
 0x172   : > { %v843_v12 = vmul.f32 -1.442695, %v425_v10  ;;  %v844_v13 = vmul.f32 -1.442695, %v426_v11 }
 0x174   : > { %1066 = vpow2.f32 %v843_v12 }
 0x175   : > { %1068 = vpow2.f32 %v844_v13 }
 0x17e   : > { %v1067_v16 = vpop.eup %1066 }
 0x17f   : > { %v1069_v17 = vpop.eup %1068  ;;  %v433_v18 = vadd.f32 1.0, %v1067_v16 }
 0x180   : > { %v434_v19 = vadd.f32 1.0, %v1069_v17 }
 0x181   : > { %1070 = vrcp.f32 %v433_v18 }
 0x182   : > { %1072 = vrcp.f32 %v434_v19 }
 0x18b   : > { %v1071_v25 = vpop.eup %1070 }
 0x18c   : > { %v1073_v27 = vpop.eup %1072  ;;  %v439_v28 = vmul.f32 %v1071_v25, %v425_v10 }
 0x18d   : > { %v440_v29 = vmul.f32 %v1073_v27, %v426_v11  ;;  %v568_v11 = vld [vmem:[%s1799_s21 + $0x8] sm:$0xff] }
 0x18e   : > { %v455_v30 = vsel %vm1816_vm5, %v439_v28, 0.0 }
 0x18f   : > { %v456_v31 = vsel %vm454_vm6, %v440_v29, 0.0 }
 0x190   : > { %v1044_v32 = vpack.i.bf16 %v456_v31, %v455_v30 }
 0x192   : > { %1045 = vrot.lane.b32.xlu0 %v1044_v32, %s1396_s27  ;;  %1035 = vrot.lane.b32.xlu1 %v1044_v32, %s1397_s16  ;;  %s603_s27 = scalar_lea.sflag [#allocation4], %s1773_s19  ;;  %s1220_s16 = scalar_lea.vmem %s1856_s22, 256 }
 0x193   : > { %p1221_p3 = scmp.ne.s32.totalorder %s1856_s22, %s1220_s16 }
 0x195   : > { %p1222_p8 = pnand %p1221_p3, %p2066_p6 }
 0x196   : > { %1055 = vrot.lane.b32.xlu0 %v1044_v32, %s1398_s14  ;;  %1040 = vrot.lane.b32.xlu1 %v1044_v32, %s1399_s12  ;;  %s1404_s14 = smov [#allocation11]  }
 0x197   : > { %p1223_p12 = pneg %p1222_p8  ;;  %s1224_s10 = sshll.u32 %s1404_s14, 4  ;;  %s1225_s10 = int_to_ptr.vmem [resolvable:$false] %s1224_s10 }
 0x198   : > { %s1226_s12 = scalar_lea.vmem %s1225_s10, 512  ;;  %p1227_p7 = scmp.lt.s32.totalorder %s1856_s22, %s1225_s10 }
 0x199   : > { %p1228_p1 = scmp.lt.s32.totalorder %s1226_s12, %s1220_s16 }
 0x19a   : > { %503 = vperm.xlu0 %1033, %v499_v33   ;;  %1050 = vrot.lane.b32.xlu1 %v1044_v32, %s1401_s15 }
 0x19b   : > { %p1229_p11 = por %p1228_p1, %p1227_p7 }
 0x19d   : > { %p1230_p2 = pnand %p1229_p11, %p1223_p12 }
 0x19e   : > { %1060 = vrot.lane.b32.xlu1 %v1044_v32, %s1402_s3 }
 0x1a2   : > { %508 = vperm.xlu1 %1064, %v500_v34  }
 0x204   : > { %v1046_v35 = vpop.permute.xlu0 %1045  ;;  %v1036_v36 = vpop.permute.xlu1 %1035 }
 0x205   : > { %v1038_v37 = vunpack.i.h.bf16 %v1036_v36  ;;  %v1037_v38 = vunpack.i.l.bf16 %v1036_v36  ;;  %v1048_v39 = vunpack.i.h.bf16 %v1046_v35  ;;  %v1047_v40 = vunpack.i.l.bf16 %v1046_v35 }
 0x207   : > { %v462_v41 = vsel %vm461_vm8, %v1037_v38, %v1038_v37  ;;  %v474_v50 = vsel %vm473_vm12, %v1047_v40, %v1048_v39 }
 0x208   : > { %v1056_v42 = vpop.permute.xlu0 %1055  ;;  %v1041_v43 = vpop.permute.xlu1 %1040  ;;  %v849_v44 = vpack.c.bf16 %v462_v41, %v439_v28 }
 0x209   : > { %v1043_v45 = vunpack.i.h.bf16 %v1041_v43  ;;  %v1042_v46 = vunpack.i.l.bf16 %v1041_v43  ;;  %v1058_v47 = vunpack.i.h.bf16 %v1056_v42  ;;  %v1057_v48 = vunpack.i.l.bf16 %v1056_v42 }
 0x20a   : > { %864 = vmatpush3.bf16.msk.msra.mxu0 %vm848_vm10, %v849_v44 }
 0x20b   : > { %865 = vmatprep.subr.bf16.mxu0 %v1395_v24  ;;  %v468_v49 = vsel %vm467_vm11, %v1042_v46, %v1043_v45  ;;  %v486_v56 = vsel %vm485_vm14, %v1057_v48, %v1058_v47 }
 0x20c   : > { %v1051_v51 = vpop.permute.xlu1 %1050  ;;  %v494_v52 = vpack.c.bf16 %v474_v50, %v468_v49 }
 0x20d   : > { %v1053_v53 = vunpack.i.h.bf16 %v1051_v51  ;;  %v1052_v54 = vunpack.i.l.bf16 %v1051_v51 }
 0x20e   : > { %866 = vmatpush3.bf16.msra.mxu0 %v494_v52 }
 0x20f   : > { %867 = vmatprep.subr.bf16.mxu0 %v1395_v24  ;;  %v480_v55 = vsel %vm479_vm13, %v1052_v54, %v1053_v53 }
 0x210   : > { %v1061_v57 = vpop.permute.xlu1 %1060  ;;  %v495_v58 = vpack.c.bf16 %v486_v56, %v480_v55 }
 0x211   : > { %v1063_v59 = vunpack.i.h.bf16 %v1061_v57  ;;  %v1062_v60 = vunpack.i.l.bf16 %v1061_v57 }
 0x212   : > { %868 = vmatpush3.bf16.msra.mxu0 %v495_v58 }
 0x213   : > { %869 = vmatprep.subr.bf16.mxu0 %v1395_v24  ;;  %v492_v61 = vsel %vm491_vm15, %v1062_v60, %v1063_v59 }
 0x214   : > { %v496_v62 = vpack.c.bf16 %v492_v61, %v492_v61 }
 0x216   : > { %v522_v63 = vsel %vm520_vm0, %v496_v62, 0 }
 0x217   : > { %870 = vmatpush3.bf16.msra.mxu0 %v522_v63 }
 0x219   : > { %v504_v1 = vpop.permute.xlu0 %503 }
 0x21a   : > { %872 = vmatmul.mubr.msk.bf16.vlgmr.msra.gmra.mrb[0].mxu0 %vm516_vm1, %v1065_v0 }
 0x221   : > { %v509_v3 = vpop.permute.xlu1 %508 }
 0x2ed   : > { %v558_v2 = vpop.f32.mrb[0].mxu0 }
 0x2ee   : > { %v559_v4 = vadd.f32 %v558_v2, %v504_v1  ;;  %v873_v5 = vpop.f32.mrb[1].mxu0 }
 0x2ef   : > { %v561_v6 = vpop.f32.mrb[2].mxu0 }
 0x2f0   : > { %565 = vst [vmem:[%s1797_s8] sm:$0xff] %v559_v4  ;;  %v562_v7 = vadd.f32 %v561_v6, %v509_v3  ;;  %573 = vadd.xlane.f32.xlu0 %v559_v4  ;;  %v874_v8 = vpop.f32.mrb[3].mxu0 }
 0x2f2   : > { %566 = vst [vmem:[%s1797_s8 + $0x8] sm:$0xff] %v562_v7  ;;  %575 = vadd.xlane.f32.xlu1 %v562_v7 }
 0x37d   : > { %v574_v10 = vpop.xlane.xlu0 %573 }
 0x37e   : > { %v577_v12 = vmul.f32 0.0078125, %v574_v10  ;;  %v589_v13 = vadd.f32 %v574_v10, %v567_v9 }
 0x37f   : > { %v576_v15 = vpop.xlane.xlu1 %575 }
 0x380   : > { %v587_v16 = vmul.f32 %v577_v12, %v577_v12  ;;  %596 = vst.msk [vmem:[%s1799_s21] sm:$0xff] %vm595_vm2, %v589_v13  ;;  %v578_v17 = vmul.f32 0.0078125, %v576_v15  ;;  %v590_v18 = vadd.f32 %v576_v15, %v568_v11  ;;  %v579_v19 = vsub.f32 %v559_v4, %v577_v12 }
 0x382   : > { %v593_v21 = vadd.f32 %v587_v16, %v571_v14  ;;  %v588_v22 = vmul.f32 %v578_v17, %v578_v17  ;;  %597 = vst.msk [vmem:[%s1799_s21 + $0x8] sm:$0xff] %vm595_vm2, %v590_v18  ;;  %v581_v23 = vmul.f32 %v579_v19, %v579_v19  ;;  %v580_v24 = vsub.f32 %v562_v7, %v578_v17 }
 0x384   : > { %600 = vst.msk [vmem:[%s1799_s21 + $0x20] sm:$0xff] %vm595_vm2, %v593_v21  ;;  %v594_v25 = vadd.f32 %v588_v22, %v572_v20  ;;  %583 = vadd.xlane.f32.xlu0 %v581_v23  ;;  %v582_v26 = vmul.f32 %v580_v24, %v580_v24 }
 0x386   : > { %601 = vst.msk [vmem:[%s1799_s21 + $0x28] sm:$0xff] %vm595_vm2, %v594_v25 }
 0x388   : > { %585 = vadd.xlane.f32.xlu0 %v582_v26 }
 0x389   : > { %1233 = shalt.err (!%p1230_p2)
}
 0x38a   : > { %s1234_s8 = scalar_lea.hbm %s1853_s4, 256  ;;  %s1238_s6 = scalar_lea.hbm %s2065_s18, 1024 }
 0x38b   : > { %p1235_p10 = scmp.ne.s32.totalorder %s1853_s4, %s1234_s8  ;;  %p1239_p5 = scmp.lt.u32.totalorder %s1853_s4, %s2065_s18 }
 0x38c   : > { %p1240_p9 = scmp.lt.u32.totalorder %s1238_s6, %s1234_s8  ;;  %p1242_p3 = scmp.lt.u32.totalorder %s1234_s8, %s1853_s4 }
 0x38d   : > { %p1236_p4 = pnand %p1235_p10, %p2066_p6 }
 0x38e   : > { %p1241_p0 = por %p1240_p9, %p1239_p5 }
 0x38f   : > { %p1237_p13 = pneg %p1236_p4 }
 0x390   : > { %p1243_p8 = por %p1242_p3, %p1241_p0 }
 0x392   : > { %p1244_p12 = pnand %p1243_p8, %p1237_p13 }
 0x394   : > { %1247 = shalt.err (!%p1244_p12)
}
 0x395   : > { %s1405_s28 = smov 128   ;;  %s1406_s11 = smov 256   ;;  %v569_v27 = vld [vmem:[%s1799_s21 + $0x10] sm:$0xff]  ;;  %v570_v30 = vld [vmem:[%s1799_s21 + $0x18] sm:$0xff] }
 0x396   : > { %s1407_s16 = smov 8   ;;  %s2067_s14 = sld [smem:[#allocation26_spill]] }
 0x397   : > { %891 = dma.vmem_to_hbm [thread:$0]  (%p2066_p6), %s1856_s22, 256, %s1853_s4, %s603_s27, %s1405_s28, %s1406_s11, %s1407_s16  }
 0x398   : > { %s876_s10 = smul.u32 768, %s2063_s17  ;;  %s638_s12 = sshll.u32 %s1799_s21, 4  ;;  %s1895_s12 = int_to_ptr.vmem [resolvable:$true] %s638_s12 }
 0x399   : > { %s2068_s3 = sld [smem:[#allocation36_spill]]  ;;  %s608_s19 = scalar_lea.sflag [#allocation13], %s1785_s24 }
 0x39a   : > { %s1248_s17 = scalar_lea.vmem %s1895_s12, 768  ;;  %s1408_s9 = smov [#allocation12]  }
 0x39b   : > { %p1249_p6 = scmp.ne.s32.totalorder %s1895_s12, %s1248_s17  ;;  %s1252_s4 = sshll.u32 %s1408_s9, 4  ;;  %s1253_s4 = int_to_ptr.vmem [resolvable:$false] %s1252_s4 }
 0x39c   : > { %p2069_p7 = scmp.ne.s32.totalorder %s2067_s14, 0  ;;  %s1254_s22 = scalar_lea.vmem %s1253_s4, 1536 }
 0x39d   : > { %p1255_p2 = scmp.lt.s32.totalorder %s1895_s12, %s1253_s4  ;;  %p1256_p10 = scmp.lt.s32.totalorder %s1254_s22, %s1248_s17 }
 0x39e   : > { %p1250_p1 = pnand %p1249_p6, %p2069_p7 }
 0x39f   : > { %s1893_s6 = scalar_lea.hbm %s2068_s3, %s876_s10  ;;  %p1257_p4 = por %p1256_p10, %p1255_p2 }
 0x3a0   : > { %p1251_p11 = pneg %p1250_p1 }
 0x3a2   : > { %p1258_p13 = pnand %p1257_p4, %p1251_p11 }
 0x411   : > { %v584_v28 = vpop.xlane.xlu0 %583 }
 0x412   : > { %v591_v29 = vadd.f32 %v584_v28, %v569_v27 }
 0x414   : > { %598 = vst.msk [vmem:[%s1799_s21 + $0x10] sm:$0xff] %vm595_vm2, %v591_v29 }
 0x415   : > { %v586_v31 = vpop.xlane.xlu0 %585 }
 0x416   : > { %v592_v32 = vadd.f32 %v586_v31, %v570_v30 }
 0x418   : > { %599 = vst.msk [vmem:[%s1799_s21 + $0x18] sm:$0xff] %vm595_vm2, %v592_v32 }
 0x419   : > { %1261 = shalt.err (!%p1258_p13)
}
 0x41a   : > { %s1262_s21 = scalar_lea.hbm %s1893_s6, 768  ;;  %s1266_s13 = scalar_lea.hbm %s2068_s3, 1536 }
 0x41b   : > { %p1263_p5 = scmp.ne.s32.totalorder %s1893_s6, %s1262_s21  ;;  %p1267_p3 = scmp.lt.u32.totalorder %s1893_s6, %s2068_s3 }
 0x41c   : > { %p1268_p8 = scmp.lt.u32.totalorder %s1266_s13, %s1262_s21  ;;  %p1270_p6 = scmp.lt.u32.totalorder %s1262_s21, %s1893_s6 }
 0x41d   : > { %p1264_p9 = pnand %p1263_p5, %p2069_p7 }
 0x41e   : > { %p1269_p12 = por %p1268_p8, %p1267_p3 }
 0x41f   : > { %p1265_p0 = pneg %p1264_p9 }
 0x420   : > { %p1271_p1 = por %p1270_p6, %p1269_p12 }
 0x422   : > { %p1272_p11 = pnand %p1271_p1, %p1265_p0 }
 0x424   : > { %1275 = shalt.err (!%p1272_p11)
}
 0x425   : > { %892 = dma.vmem_to_hbm [thread:$0]  (%p2069_p7), %s1895_s12, 768, %s1893_s6, %s608_s19, %s1405_s28, %s1405_s28, %s1407_s16  }
 0x426 PF: > { %s2070_s8 = sld [smem:[#allocation21_spill]]  ;;  %p924_p2 = scmp.ge.s32.totalorder %s1382_s7, 2 }
 0x427   : > { %s2071_s15 = sld [smem:[#allocation30_spill]] }
 0x42c   : > { %s653_s17 = sand.u32 1, %s2070_s8  }
 0x42d   : > { %p2072_p10 = scmp.ne.s32.totalorder %s2071_s15, 0  ;;  %s654_s9 = scalar_lea.sflag [#allocation4], %s653_s17 }
 0x42f   : > { %p913_p4 = pnand %p924_p2, %p2072_p10 }
 0x431   : > { %1333 = dma.done.wait (!%p913_p4), %s654_s9, 256  }
 0x432   : > { %1335 = vsyncadd (!%p913_p4), %s654_s9, 4294967040  ;;  %s2073_s14 = sld [smem:[#allocation19_spill]]  ;;  %s2074_s4 = sld [smem:[#allocation27_spill]] }
 0x438   : > { %s662_s22 = sand.u32 1, %s2073_s14   ;;  %p2075_p13 = scmp.ne.s32.totalorder %s2074_s4, 0 }
 0x439   : > { %s663_s24 = scalar_lea.sflag [#allocation13], %s662_s22 }
 0x43a   : > { %p916_p5 = pnand %p924_p2, %p2075_p13 }
 0x43c   : > { %1337 = dma.done.wait (!%p916_p5), %s663_s24, 768  }
 0x43d   : > { %1339 = vsyncadd (!%p916_p5), %s663_s24, 4294966528  ;;  %s30_s7 = sadd.s32 1, %s1382_s7   ;;  %s2076_s21 = sld [smem:[#allocation20_spill]] }
 0x43e   : > { %p27_p7 = scmp.ge.s32.totalorder %s30_s7, 6   ;;  %s2077_s16 = sld [smem:[#allocation28_spill]] }
 0x43f   : > { %s2078_s12 = sld [smem:[#allocation31_spill]]  ;;  %s2079_s22 = smov %s1350_s23 }
 0x440   : > { %s2080_s23 = smov %s1697_s5  ;;  %s2081_s24 = smov %s1358_s25 }
 0x441   : > { %s2082_s25 = smov %s1362_s26  ;;  %s2083_s26 = smov %s1700_s20 }
 0x442   : > { %s2084_s27 = smov %s1374_s29  ;;  %s2085_s28 = smov %s1378_s30 }
 0x443   :  { %29 = sbr.rel (!%p27_p7) target bundleno = 20 (0x14), region = 138 }
 0x444   : > { %s2086_s29 = smov %s2077_s16 }
 0x445   : > { %s2087_s30 = smov %s2078_s12 }
 0x44a   :  { %668 = vsyncpa [#allocation3], 1 }
 0x44b   :  { %670 = vsyncpa [#allocation3 + $0x1], 1 }
 0x44c   :  { %671 = vsyncpa [#allocation6], 1 }
 0x44d   :  { %673 = vsyncpa [#allocation6 + $0x1], 1 }
 0x44e   :  { %674 = vsyncpa [#allocation9], 1 }
 0x44f   :  { %675 = vsyncpa [#allocation4], 1 }
 0x450   :  { %677 = vsyncpa [#allocation4 + $0x1], 1 }
 0x451   :  { %678 = vsyncpa [#allocation13], 1 }
 0x452   :  { %680 = vsyncpa [#allocation13 + $0x1], 1 }

// kernel: residual_block_v2.5
= control target key start
LH: loop header
LB: loop body
LE: loop exit
PB: predicated region body
PF: predicated region fallthrough
CT: control target
= control target key end

     0   :  { %s2560_s0 = inlined_call_operand.hbm [shape: f32[2,2,16,256], index: 0, kind: input, shape index: {}]   ;;  %s2561_s1 = inlined_call_operand.hbm [shape: f32[2,8,256], index: 1, kind: input, shape index: {}]   ;;  %s2562_s2 = inlined_call_operand.hbm [shape: f32[2,16,1], index: 2, kind: input, shape index: {}]   ;;  %s2563_s3 = inlined_call_operand.hbm [shape: f32[2,16,1], index: 3, kind: input, shape index: {}]   ;;  %s2564_s4 = inlined_call_operand.hbm [shape: f32[2,16,1], index: 4, kind: input, shape index: {}]   ;;  %s2565_s5 = inlined_call_operand.hbm [shape: bf16[16,112], index: 5, kind: input, shape index: {}]   ;;  %s2566_s6 = inlined_call_operand.hbm [shape: f32[16,1], index: 6, kind: input, shape index: {}]   ;;  %s2567_s7 = inlined_call_operand.hbm [shape: bf16[16,8], index: 7, kind: input, shape index: {}]   ;;  %s2568_s8 = inlined_call_operand.hbm [shape: f32[16,1], index: 8, kind: input, shape index: {}]   ;;  %s2569_s9 = inlined_call_operand.hbm [shape: f32[2,16,256], index: 9, kind: output, shape index: {}]  }
   0x1   :  { %2608 = sst [smem:[#allocation40_spill]] %s2560_s0 }
   0x2   :  { %2609 = sst [smem:[#allocation41_spill]] %s2561_s1 }
   0x3   :  { %2610 = sst [smem:[#allocation42_spill]] %s2562_s2 }
   0x4   :  { %2611 = sst [smem:[#allocation43_spill]] %s2563_s3 }
   0x5   :  { %2612 = sst [smem:[#allocation44_spill]] %s2564_s4 }
   0x6   :  { %2613 = sst [smem:[#allocation45_spill]] %s2565_s5 }
   0x7   :  { %2614 = sst [smem:[#allocation46_spill]] %s2566_s6 }
   0x8   :  { %2615 = sst [smem:[#allocation47_spill]] %s2567_s7 }
   0x9   :  { %2616 = sst [smem:[#allocation48_spill]] %s2569_s9 }
   0xa   :  { %14 = vsyncpa [#allocation3], 0 }
   0xb   :  { %16 = vsyncpa [#allocation3 + $0x1], 0 }
   0xc   :  { %17 = vsyncpa [#allocation6], 0 }
   0xd   :  { %19 = vsyncpa [#allocation6 + $0x1], 0 }
   0xe   :  { %20 = vsyncpa [#allocation9], 0 }
   0xf   :  { %22 = vsyncpa [#allocation9 + $0x1], 0 }
  0x10   :  { %23 = vsyncpa [#allocation12], 0 }
  0x11   :  { %24 = vsyncpa [#allocation15], 0 }
  0x12   :  { %25 = vsyncpa [#allocation4], 0 }
  0x13   :  { %27 = vsyncpa [#allocation4 + $0x1], 0  ;;  %s1955_s30 = smov 0   ;;  %s1957_s10 = smov 0  }
  0x14   :  { %s1959_s11 = smov 0   ;;  %s1961_s12 = smov 0  }
  0x15   :  { %s1963_s13 = smov 0   ;;  %s1965_s14 = smov 0  }
  0x16   :  { %s1967_s15 = smov 0   ;;  %s1969_s16 = smov 0  }
  0x17   :  { %s1971_s17 = smov 0   ;;  %s1973_s18 = smov 0  }
  0x18   :  { %s1975_s19 = smov 0  }
  0x19 LB: > { %2617 = sst [smem:[#allocation25_spill]] %s1839_s10  ;;  %s2011_s20 = sadd.s32 4294967295, %s1875_s19   ;;  %s1875_s19 = sphi %s1975_s19, %s33_s19   ;;  %s1871_s18 = sphi %s1973_s18, %s2698_s18   ;;  %s1867_s17 = sphi %s1971_s17, %s2697_s17   ;;  %s1863_s16 = sphi %s1969_s16, %s2696_s16   ;;  %s1859_s15 = sphi %s1967_s15, %s2695_s15   ;;  %s1855_s14 = sphi %s1965_s14, %s2690_s14   ;;  %s1851_s13 = sphi %s1963_s13, %s2694_s13   ;;  %s1847_s12 = sphi %s1961_s12, %s2693_s12   ;;  %s1843_s11 = sphi %s1959_s11, %s2688_s11   ;;  %s1839_s10 = sphi %s1957_s10, %s2687_s10   ;;  %s1835_s30 = sphi %s1955_s30, %s2686_s30  }
  0x1a   : > { %2618 = sst [smem:[#allocation26_spill]] %s1843_s11  ;;  %p1122_p0 = scmp.ge.s32.totalorder %s1875_s19, 1 }
  0x1b   : > { %2619 = sst [smem:[#allocation27_spill]] %s1847_s12  ;;  %p2572_p1 = scmp.eq.s32.totalorder %s2011_s20, 0 }
  0x1c   : > { %2620 = sst [smem:[#allocation28_spill]] %s1855_s14  ;;  %p296_p2 = scmp.lt.s32.totalorder %s1875_s19, 5 }
  0x1d   : > { %2621 = sst [smem:[#allocation29_spill]] %s1859_s15  ;;  %s1877_s22 = smov [#allocation11]  }
  0x1e   : > { %2622 = sst [smem:[#allocation30_spill]] %s1863_s16  ;;  %p2016_p3 = pnand %p1122_p0, %p296_p2 }
  0x1f   : > { %2623 = sst [smem:[#allocation31_spill]] %s1875_s19  ;;  %s308_s23 = sshll.u32 %s1877_s22, 4  ;;  %s309_s23 = int_to_ptr.vmem [resolvable:$true] %s308_s23 }
  0x20   : > { %s2624_s21 = scalar_select %p2016_p3, 1, 0 }
  0x21   : > { %p1238_p4 = pneg %p2016_p3  ;;  %s1878_s25 = smov [#allocation14]  }
  0x22   : > { %2625 = sst [smem:[#allocation32_spill]] %s2624_s21  ;;  %s334_s26 = sshll.u32 %s1878_s25, 4  ;;  %s2028_s26 = int_to_ptr.vmem [resolvable:$true] %s334_s26 }
  0x23   : > { %p2024_p5 = pnand %p1238_p4, %p2572_p1  ;;  %s2627_s5 = sld [smem:[#allocation45_spill]] }
  0x25   : > { %s2626_s24 = scalar_select %p2024_p5, 1, 0 }
  0x26   : > { %p2038_p7 = pneg %p2024_p5 }
  0x28   : > { %s2628_s22 = scalar_select %p2038_p7, 1, 0 }
  0x29   : > { %s1471_s29 = scalar_lea.hbm %s2627_s5, 128 }
  0x2a   : > { %p1472_p6 = scmp.ne.s32.totalorder %s2627_s5, %s1471_s29  ;;  %p1478_p10 = scmp.lt.u32.totalorder %s1471_s29, %s2627_s5 }
  0x2c   : > { %p1474_p8 = pnand %p2038_p7, %p1472_p6 }
  0x2e   : > { %p1475_p9 = pneg %p1474_p8 }
  0x30   : > { %p1480_p11 = pnand %p1478_p10, %p1475_p9 }
  0x32   : > { %1483 = shalt.err (!%p1480_p11)
}
  0x33   : > { %s1484_s27 = scalar_lea.vmem %s309_s23, 128  ;;  %p1492_p2 = scmp.lt.s32.totalorder %s309_s23, %s309_s23 }
  0x34   : > { %p1485_p12 = scmp.ne.s32.totalorder %s309_s23, %s1484_s27  ;;  %p1493_p4 = scmp.lt.s32.totalorder %s1484_s27, %s1484_s27 }
  0x36   : > { %p1487_p13 = pnand %p1485_p12, %p2038_p7  ;;  %p1494_p1 = por %p1493_p4, %p1492_p2 }
  0x38   : > { %p1488_p0 = pneg %p1487_p13 }
  0x3a   : > { %p1495_p3 = pnand %p1494_p1, %p1488_p0 }
  0x3c   : > { %1498 = shalt.err (!%p1495_p3)
}
  0x3d   : > { %s1879_s9 = smov 64   ;;  %s1880_s16 = smov 4  }
  0x3e   : > { %1241 = dma.hbm_to_vmem [thread:$0]  (!%p2024_p5), %s2627_s5, 128, %s309_s23, [#allocation12], %s1879_s9, %s1879_s9, %s1880_s16  }
  0x3f   : > { %s2629_s7 = sld [smem:[#allocation47_spill]] }
  0x45   : > { %s1499_s21 = scalar_lea.hbm %s2629_s7, 128 }
  0x46   : > { %p1500_p6 = scmp.ne.s32.totalorder %s2629_s7, %s1499_s21  ;;  %p1506_p8 = scmp.lt.u32.totalorder %s1499_s21, %s2629_s7 }
  0x48   : > { %p1502_p1 = pnand %p1500_p6, %p2038_p7 }
  0x4a   : > { %p1503_p3 = pneg %p1502_p1 }
  0x4c   : > { %p1508_p9 = pnand %p1506_p8, %p1503_p3 }
  0x4e   : > { %1511 = shalt.err (!%p1508_p9)
}
  0x4f   : > { %s1512_s23 = scalar_lea.vmem %s2028_s26, 128  ;;  %p1520_p13 = scmp.lt.s32.totalorder %s2028_s26, %s2028_s26 }
  0x50   : > { %p1513_p10 = scmp.ne.s32.totalorder %s2028_s26, %s1512_s23  ;;  %p1521_p0 = scmp.lt.s32.totalorder %s1512_s23, %s1512_s23 }
  0x52   : > { %p1515_p11 = pnand %p1513_p10, %p2038_p7  ;;  %p1522_p2 = por %p1521_p0, %p1520_p13 }
  0x54   : > { %p1516_p12 = pneg %p1515_p11 }
  0x56   : > { %p1523_p4 = pnand %p1522_p2, %p1516_p12 }
  0x58   : > { %1526 = shalt.err (!%p1523_p4)
}
  0x59   : > { %1247 = dma.hbm_to_vmem [thread:$0]  (!%p2024_p5), %s2629_s7, 128, %s2028_s26, [#allocation15], %s1879_s9, %s1879_s9, %s1880_s16  }
  0x5a   : > { %s1121_s4 = sadd.s32 4294967294, %s1875_s19   ;;  %s42_s21 = sadd.s32 1, %s1867_s17 }
  0x5b   : > { %p43_p6 = scmp.ge.s32.totalorder %s42_s21, 2  ;;  %s45_s15 = sadd.s32 1, %s1871_s18 }
  0x5c   : > { %s54_s28 = sadd.s32 1, %s1855_s14  ;;  %p2579_p1 = scmp.ne.s32.totalorder %s1855_s14, %s1851_s13 }
  0x5d   : > { %s2700_s21 = smov (%p43_p6, %s42_s21), 0  ;;  %s2702_s15 = smov (!%p43_p6, %s45_s15), %s1871_s18 }
  0x5e   : > { %2630 = sst [smem:[#allocation33_spill]] %s2700_s21  ;;  %s50_s26 = ssub.s32 %s1867_s17, %s2700_s21 }
  0x5f   : > { %p62_p3 = scmp.eq.s32.totalorder %s1875_s19, 0  ;;  %p47_p8 = scmp.ge.s32.totalorder %s2702_s15, 2 }
  0x60   : > { %p2578_p9 = scmp.ne.s32.totalorder %s1851_s13, %s1847_s12  ;;  %s108_s16 = sadd.s32 1, %s1843_s11 }
  0x61   : > { %p2096_p10 = por %p62_p3, %p2579_p1  ;;  %s2704_s15 = smov (%p47_p8, %s2702_s15), 0 }
  0x62   : > { %2632 = sst [smem:[#allocation34_spill]] %s2704_s15  ;;  %p2633_p11 = scmp.eq.s32.totalorder %s2011_s20, 0 }
  0x63   : > { %p115_p13 = scmp.ne.s32.totalorder %s1843_s11, %s1839_s10  ;;  %s49_s25 = ssub.s32 %s1871_s18, %s2704_s15 }
  0x64   : > { %p2108_p12 = por %p2633_p11, %p2578_p9  ;;  %p121_p0 = scmp.ne.s32.totalorder %s1839_s10, %s1835_s30 }
  0x65   : > { %s51_s27 = sor.u32 %s50_s26, %s49_s25  ;;  %p106_p2 = scmp.eq.s32.totalorder %s49_s25, 0 }
  0x66   : > { %s2634_s29 = scalar_select %p2108_p12, 1, 0 }
  0x67   : > { %p52_p4 = scmp.eq.s32.totalorder %s51_s27, 0  ;;  %p2120_p6 = por %p115_p13, %p62_p3 }
  0x68   : > { %s2125_s0 = scalar_select %p106_p2, %s1843_s11, %s108_s16  }
  0x69   : > { %s2128_s2 = scalar_select %p52_p4, %s1855_s14, %s54_s28  }
  0x6a   : > { %2636 = sst [smem:[#allocation35_spill]] %s2125_s0  ;;  %p2638_p8 = pmov %p2633_p11 }
  0x6b   : > { %2637 = sst [smem:[#allocation36_spill]] %s2128_s2  ;;  %p283_p9 = scmp.eq.s32.totalorder %s2011_s20, 3 }
  0x6c   : > { %p2132_p11 = por %p121_p0, %p2638_p8  ;;  %p289_p1 = scmp.eq.s32.totalorder %s1121_s4, 3 }
  0x6d   : > { %p1275_p12 = scmp.lt.s32.totalorder %s1875_s19, 4  ;;  %p2641_p5 = scmp.ne.s32.totalorder %s1855_s14, %s1851_s13 }
  0x6e   : > { %s2639_s5 = scalar_select %p2132_p11, 1, 0 }
  0x6f   : > { %p2141_p3 = por %p283_p9, %p2641_p5  ;;  %s2146_s26 = sand.u32 1, %s1855_s14  }
  0x70   : > { %2640 = sst [smem:[#allocation37_spill]] %s2639_s5  ;;  %p2644_p13 = scmp.ne.s32.totalorder %s1851_s13, %s1847_s12 }
  0x71   : > { %s2642_s30 = scalar_select %p2141_p3, 1, 0 }
  0x72   : > { %p2151_p0 = por %p289_p1, %p2644_p13  ;;  %p2160_p2 = pnand %p1275_p12, %p2096_p10 }
  0x73   : > { %2643 = sst [smem:[#allocation38_spill]] %s2642_s30  ;;  %s2591_s25 = sand.u32 1, %s1875_s19  }
  0x74   : > { %s2645_s28 = scalar_select %p2151_p0, 1, 0 }
  0x75   : > { %s2647_s4 = scalar_select %p2160_p2, 1, 0 }
  0x76   : > { %2646 = sst [smem:[#allocation39_spill]] %s2645_s28  ;;  %s1132_s27 = sshll.u32 %s2146_s26, 3 }
  0x77   : > { %s1133_s7 = sshll.u32 %s1871_s18, 1  ;;  %s388_s15 = scalar_lea.vmem [#allocation5], %s1132_s27 }
  0x78   : > { %s397_s21 = sshll.u32 %s388_s15, 4  ;;  %s393_s2 = sadd.s32 %s1867_s17, %s1133_s7  ;;  %s2168_s21 = int_to_ptr.vmem [resolvable:$true] %s397_s21 }
  0x79   : > { %s1134_s14 = sshll.u32 %s393_s2, 7  ;;  %p2174_p5 = pnand %p1275_p12, %p2120_p6 }
  0x7a   : > { %s2649_s1 = sld [smem:[#allocation41_spill]]  ;;  %s2185_s7 = scalar_lea.sflag [#allocation6], %s2591_s25 }
  0x7b   : > { %s2648_s9 = scalar_select %p2174_p5, 1, 0 }
  0x7c   : > { %p2596_p9 = pneg %p2160_p2 }
  0x80   : > { %s2181_s28 = scalar_lea.hbm %s2649_s1, %s1134_s14  ;;  %s1532_s14 = scalar_lea.hbm %s2649_s1, 512 }
  0x81   : > { %s1527_s15 = scalar_lea.hbm %s2181_s28, 128  ;;  %p1533_p4 = scmp.lt.u32.totalorder %s2181_s28, %s2649_s1 }
  0x82   : > { %p1528_p1 = scmp.ne.s32.totalorder %s2181_s28, %s1527_s15  ;;  %p1534_p6 = scmp.lt.u32.totalorder %s1532_s14, %s1527_s15 }
  0x83   : > { %p1536_p13 = scmp.lt.u32.totalorder %s1527_s15, %s2181_s28 }
  0x84   : > { %p1530_p10 = pnand %p2596_p9, %p1528_p1  ;;  %p1535_p8 = por %p1534_p6, %p1533_p4 }
  0x86   : > { %p1531_p12 = pneg %p1530_p10  ;;  %p1537_p0 = por %p1536_p13, %p1535_p8 }
  0x88   : > { %p1538_p3 = pnand %p1537_p0, %p1531_p12 }
  0x8a   : > { %1541 = shalt.err (!%p1538_p3)
}
  0x8b   : > { %s1542_s27 = scalar_lea.vmem %s2168_s21, 128  ;;  %s1881_s23 = smov [#allocation5]  }
  0x8c   : > { %p1543_p1 = scmp.ne.s32.totalorder %s2168_s21, %s1542_s27  ;;  %s1547_s2 = sshll.u32 %s1881_s23, 4  ;;  %s1548_s2 = int_to_ptr.vmem [resolvable:$false] %s1547_s2 }
  0x8d   : > { %s1549_s0 = scalar_lea.vmem %s1548_s2, 256  ;;  %p1550_p7 = scmp.lt.s32.totalorder %s2168_s21, %s1548_s2 }
  0x8e   : > { %p1545_p10 = pnand %p1543_p1, %p2596_p9  ;;  %p1551_p4 = scmp.lt.s32.totalorder %s1549_s0, %s1542_s27 }
  0x90   : > { %p1546_p11 = pneg %p1545_p10  ;;  %p1552_p6 = por %p1551_p4, %p1550_p7 }
  0x92   : > { %p1553_p8 = pnand %p1552_p6, %p1546_p11 }
  0x94   : > { %1556 = shalt.err (!%p1553_p8)
}
  0x95   : > { %1257 = dma.hbm_to_vmem [thread:$0]  (!%p2160_p2), %s2181_s28, 128, %s2168_s21, %s2185_s7  }
  0x96   : > { %s406_s15 = sand.u32 1, %s1843_s11   ;;  %s2217_s16 = sshll.u32 %s1871_s18, 8 }
  0x97   : > { %s2214_s14 = sshll.u32 %s406_s15, 4  ;;  %s2650_s3 = sld [smem:[#allocation43_spill]] }
  0x98   : > { %s429_s0 = scalar_lea.vmem [#allocation8], %s2214_s14  ;;  %s1882_s21 = smov [#allocation13]  }
  0x99   : > { %s436_s25 = sshll.u32 %s429_s0, 4  ;;  %s2228_s28 = sshll.u32 %s1882_s21, 4  ;;  %s2226_s25 = int_to_ptr.vmem [resolvable:$true] %s436_s25  ;;  %s322_s28 = int_to_ptr.vmem [resolvable:$true] %s2228_s28 }
  0x9a   : > { %s2651_s15 = sand.u32 1, %s1875_s19   ;;  %p2238_p11 = pneg %p2174_p5 }
  0x9b   : > { %s2232_s1 = scalar_lea.sflag [#allocation9], %s2651_s15 }
  0x9c   : > { %s2652_s27 = scalar_select %p2238_p11, 1, 0 }
  0x9d   : > { %s2223_s2 = scalar_lea.hbm %s2650_s3, %s2217_s16  ;;  %s1562_s12 = scalar_lea.hbm %s2650_s3, 512 }
  0x9e   : > { %s1557_s11 = scalar_lea.hbm %s2223_s2, 256  ;;  %p1563_p12 = scmp.lt.u32.totalorder %s2223_s2, %s2650_s3 }
  0x9f   : > { %p1558_p7 = scmp.ne.s32.totalorder %s2223_s2, %s1557_s11  ;;  %p1564_p13 = scmp.lt.u32.totalorder %s1562_s12, %s1557_s11 }
  0xa0   : > { %p1566_p10 = scmp.lt.u32.totalorder %s1557_s11, %s2223_s2 }
  0xa1   : > { %p1560_p3 = pnand %p2238_p11, %p1558_p7  ;;  %p1565_p1 = por %p1564_p13, %p1563_p12 }
  0xa3   : > { %p1561_p0 = pneg %p1560_p3  ;;  %p1567_p4 = por %p1566_p10, %p1565_p1 }
  0xa5   : > { %p1568_p6 = pnand %p1567_p4, %p1561_p0 }
  0xa7   : > { %1571 = shalt.err (!%p1568_p6)
}
  0xa8   : > { %s1572_s15 = scalar_lea.vmem %s2226_s25, 256  ;;  %s1883_s23 = smov [#allocation8]  }
  0xa9   : > { %p1573_p8 = scmp.ne.s32.totalorder %s2226_s25, %s1572_s15  ;;  %s1577_s0 = sshll.u32 %s1883_s23, 4  ;;  %s1578_s0 = int_to_ptr.vmem [resolvable:$false] %s1577_s0 }
  0xaa   : > { %s1579_s30 = scalar_lea.vmem %s1578_s0, 512  ;;  %p1580_p9 = scmp.lt.s32.totalorder %s2226_s25, %s1578_s0 }
  0xab   : > { %p1575_p7 = pnand %p1573_p8, %p2238_p11  ;;  %p1581_p2 = scmp.lt.s32.totalorder %s1579_s30, %s1572_s15 }
  0xad   : > { %p1576_p3 = pneg %p1575_p7  ;;  %p1582_p12 = por %p1581_p2, %p1580_p9 }
  0xaf   : > { %p1583_p13 = pnand %p1582_p12, %p1576_p3 }
  0xb1   : > { %1586 = shalt.err (!%p1583_p13)
}
  0xb2   : > { %s1884_s11 = smov 128   ;;  %s1885_s12 = smov 8  }
  0xb3   : > { %1263 = dma.hbm_to_vmem [thread:$0]  (!%p2174_p5), %s2223_s2, 256, %s2226_s25, %s2232_s1, %s1884_s11, %s1884_s11, %s1885_s12  }
  0xb4   : > { %s2653_s6 = sld [smem:[#allocation46_spill]]  ;;  %p2654_p9 = scmp.ne.s32.totalorder %s2628_s22, 0 }
  0xba   : > { %s1587_s15 = scalar_lea.hbm %s2653_s6, 256 }
  0xbb   : > { %p1588_p2 = scmp.ne.s32.totalorder %s2653_s6, %s1587_s15  ;;  %p1594_p10 = scmp.lt.u32.totalorder %s1587_s15, %s2653_s6 }
  0xbd   : > { %p1590_p0 = pnand %p1588_p2, %p2654_p9 }
  0xbf   : > { %p1591_p1 = pneg %p1590_p0 }
  0xc1   : > { %p1596_p4 = pnand %p1594_p10, %p1591_p1 }
  0xc3   : > { %1599 = shalt.err (!%p1596_p4)
}
  0xc4   : > { %s1600_s5 = scalar_lea.vmem %s322_s28, 256  ;;  %p1608_p3 = scmp.lt.s32.totalorder %s322_s28, %s322_s28 }
  0xc5   : > { %p1601_p6 = scmp.ne.s32.totalorder %s322_s28, %s1600_s5  ;;  %p1609_p12 = scmp.lt.s32.totalorder %s1600_s5, %s1600_s5 }
  0xc7   : > { %p1603_p8 = pnand %p1601_p6, %p2654_p9  ;;  %p1610_p13 = por %p1609_p12, %p1608_p3 }
  0xc9   : > { %p1604_p7 = pneg %p1603_p8 }
  0xcb   : > { %p1611_p5 = pnand %p1610_p13, %p1604_p7 }
  0xcd   : > { %1614 = shalt.err (!%p1611_p5)
}
  0xce   : > { %p2655_p2 = scmp.ne.s32.totalorder %s2626_s24, 0  ;;  %s1886_s25 = smov [#allocation16]  }
  0xcf   : > { %s347_s2 = sshll.u32 %s1886_s25, 4  ;;  %s1615_s5 = scalar_lea.hbm %s2568_s8, 256  ;;  %s348_s2 = int_to_ptr.vmem [resolvable:$true] %s347_s2 }
  0xd0   : > { %1244 = dma.hbm_to_vmem [thread:$0]  (!%p2655_p2), %s2653_s6, 256, %s322_s28, [#allocation12], %s1884_s11, %s1884_s11, %s1885_s12  }
  0xd1   : > { %p1616_p5 = scmp.ne.s32.totalorder %s2568_s8, %s1615_s5  ;;  %p1622_p10 = scmp.lt.u32.totalorder %s1615_s5, %s2568_s8 }
  0xd3   : > { %p1618_p0 = pnand %p1616_p5, %p2654_p9 }
  0xd5   : > { %p1619_p1 = pneg %p1618_p0 }
  0xd7   : > { %p1624_p4 = pnand %p1622_p10, %p1619_p1 }
  0xd9   : > { %1627 = shalt.err (!%p1624_p4)
}
  0xda   : > { %s1628_s28 = scalar_lea.vmem %s348_s2, 256  ;;  %p1636_p3 = scmp.lt.s32.totalorder %s348_s2, %s348_s2 }
  0xdb   : > { %p1629_p6 = scmp.ne.s32.totalorder %s348_s2, %s1628_s28  ;;  %p1637_p12 = scmp.lt.s32.totalorder %s1628_s28, %s1628_s28 }
  0xdd   : > { %p1631_p8 = pnand %p1629_p6, %p2654_p9  ;;  %p1638_p13 = por %p1637_p12, %p1636_p3 }
  0xdf   : > { %p1632_p7 = pneg %p1631_p8 }
  0xe1   : > { %p1639_p11 = pnand %p1638_p13, %p1632_p7 }
  0xe3   : > { %1642 = shalt.err (!%p1639_p11)
}
  0xe4   : > { %1250 = dma.hbm_to_vmem [thread:$0]  (!%p2655_p2), %s2568_s8, 256, %s348_s2, [#allocation15], %s1884_s11, %s1884_s11, %s1885_s12  }
  0xe5   : > { %s1129_s22 = sshll.u32 %s1867_s17, 2  ;;  %s1130_s19 = sshll.u32 %s1871_s18, 3 }
  0xe6   : > { %s371_s25 = sadd.s32 %s1130_s19, %s1129_s22  ;;  %s2656_s21 = sshll.u32 %s2146_s26, 5 }
  0xe7   : > { %s365_s23 = scalar_lea.vmem [#allocation2], %s2656_s21  ;;  %s1131_s15 = sshll.u32 %s371_s25, 7 }
  0xe8   : > { %s374_s5 = sshll.u32 %s365_s23, 4  ;;  %s2657_s30 = sld [smem:[#allocation40_spill]]  ;;  %s2312_s5 = int_to_ptr.vmem [resolvable:$true] %s374_s5 }
  0xe9   : > { %s362_s10 = scalar_lea.sflag [#allocation3], %s2146_s26  ;;  %p2659_p9 = scmp.ne.s32.totalorder %s2647_s4, 0 }
  0xeb   : > { %p2660_p2 = pneg %p2659_p9 }
  0xee   : > { %s2658_s28 = smov %s2657_s30  ;;  %s2317_s6 = scalar_lea.hbm %s2657_s30, %s1131_s15 }
  0xef   : > { %s1643_s2 = scalar_lea.hbm %s2317_s6, 512  ;;  %s1648_s19 = scalar_lea.hbm %s2658_s28, 2048 }
  0xf0   : > { %p1644_p11 = scmp.ne.s32.totalorder %s2317_s6, %s1643_s2  ;;  %p1649_p1 = scmp.lt.u32.totalorder %s2317_s6, %s2658_s28 }
  0xf1   : > { %p1650_p10 = scmp.lt.u32.totalorder %s1648_s19, %s1643_s2  ;;  %p1652_p6 = scmp.lt.u32.totalorder %s1643_s2, %s2317_s6 }
  0xf2   : > { %p1646_p5 = pnand %p1644_p11, %p2660_p2 }
  0xf3   : > { %p1651_p4 = por %p1650_p10, %p1649_p1 }
  0xf4   : > { %p1647_p0 = pneg %p1646_p5 }
  0xf5   : > { %p1653_p8 = por %p1652_p6, %p1651_p4 }
  0xf7   : > { %p1654_p7 = pnand %p1653_p8, %p1647_p0 }
  0xf9   : > { %1657 = shalt.err (!%p1654_p7)
}
  0xfa   : > { %s1658_s23 = scalar_lea.vmem %s2312_s5, 512  ;;  %p2661_p12 = pmov %p2660_p2 }
  0xfb   : > { %p1659_p3 = scmp.ne.s32.totalorder %s2312_s5, %s1658_s23  ;;  %s1887_s15 = smov [#allocation2]  }
  0xfc   : > { %s1663_s24 = sshll.u32 %s1887_s15, 4  ;;  %s1664_s24 = int_to_ptr.vmem [resolvable:$false] %s1663_s24 }
  0xfd   : > { %p1661_p13 = pnand %p1659_p3, %p2661_p12  ;;  %s1665_s0 = scalar_lea.vmem %s1664_s24, 1024 }
  0xfe   : > { %p1666_p2 = scmp.lt.s32.totalorder %s2312_s5, %s1664_s24  ;;  %p1667_p5 = scmp.lt.s32.totalorder %s1665_s0, %s1658_s23 }
  0xff   : > { %p1662_p11 = pneg %p1661_p13 }
 0x100   : > { %p1668_p1 = por %p1667_p5, %p1666_p2 }
 0x102   : > { %p1669_p10 = pnand %p1668_p1, %p1662_p11 }
 0x104   : > { %1672 = shalt.err (!%p1669_p10)
}
 0x105   : > { %s1888_s30 = smov 256   ;;  %s1889_s2 = smov 16  }
 0x106   : > { %1254 = dma.hbm_to_vmem [thread:$0]  (!%p2659_p9), %s2317_s6, 512, %s2312_s5, %s362_s10, %s1888_s30, %s1888_s30, %s1889_s2  }
 0x107   : > { %s2662_s19 = sld [smem:[#allocation42_spill]]  ;;  %s408_s23 = scalar_lea.vmem [#allocation7], %s2214_s14 }
 0x108   : > { %s415_s15 = sshll.u32 %s408_s23, 4  ;;  %p2664_p4 = scmp.ne.s32.totalorder %s2652_s27, 0  ;;  %s2352_s15 = int_to_ptr.vmem [resolvable:$true] %s415_s15 }
 0x10d   : > { %s2663_s25 = smov %s2662_s19  ;;  %s2349_s21 = scalar_lea.hbm %s2662_s19, %s2217_s16 }
 0x10e   : > { %s1673_s24 = scalar_lea.hbm %s2349_s21, 256  ;;  %s1678_s4 = scalar_lea.hbm %s2663_s25, 512 }
 0x10f   : > { %p1674_p0 = scmp.ne.s32.totalorder %s2349_s21, %s1673_s24  ;;  %p1679_p9 = scmp.lt.u32.totalorder %s2349_s21, %s2663_s25 }
 0x110   : > { %p1680_p7 = scmp.lt.u32.totalorder %s1678_s4, %s1673_s24  ;;  %p1682_p12 = scmp.lt.u32.totalorder %s1673_s24, %s2349_s21 }
 0x111   : > { %p1676_p6 = pnand %p1674_p0, %p2664_p4 }
 0x112   : > { %p1681_p3 = por %p1680_p7, %p1679_p9 }
 0x113   : > { %p1677_p8 = pneg %p1676_p6 }
 0x114   : > { %p1683_p13 = por %p1682_p12, %p1681_p3 }
 0x116   : > { %p1684_p11 = pnand %p1683_p13, %p1677_p8 }
 0x118   : > { %1687 = shalt.err (!%p1684_p11)
}
 0x119   : > { %s1688_s0 = scalar_lea.vmem %s2352_s15, 256  ;;  %s1890_s30 = smov [#allocation7]  }
 0x11a   : > { %p1689_p2 = scmp.ne.s32.totalorder %s2352_s15, %s1688_s0  ;;  %s1693_s2 = sshll.u32 %s1890_s30, 4  ;;  %s1694_s2 = int_to_ptr.vmem [resolvable:$false] %s1693_s2 }
 0x11b   : > { %s1695_s3 = scalar_lea.vmem %s1694_s2, 512  ;;  %p1696_p10 = scmp.lt.s32.totalorder %s2352_s15, %s1694_s2 }
 0x11c   : > { %p1691_p5 = pnand %p1689_p2, %p2664_p4  ;;  %p1697_p0 = scmp.lt.s32.totalorder %s1695_s3, %s1688_s0 }
 0x11e   : > { %p1692_p1 = pneg %p1691_p5  ;;  %p1698_p6 = por %p1697_p0, %p1696_p10 }
 0x120   : > { %p1699_p9 = pnand %p1698_p6, %p1692_p1 }
 0x122   : > { %1702 = shalt.err (!%p1699_p9)
}
 0x123   : > { %p2665_p8 = scmp.ne.s32.totalorder %s2648_s9, 0  ;;  %s2666_s23 = sld [smem:[#allocation44_spill]] }
 0x124   : > { %s450_s26 = scalar_lea.vmem [#allocation10], %s2214_s14 }
 0x125   : > { %1260 = dma.hbm_to_vmem [thread:$0]  (!%p2665_p8), %s2349_s21, 256, %s2352_s15, %s2185_s7, %s1884_s11, %s1884_s11, %s1885_s12  }
 0x126   : > { %s457_s6 = sshll.u32 %s450_s26, 4  ;;  %s2386_s6 = int_to_ptr.vmem [resolvable:$true] %s457_s6 }
 0x129   : > { %s2383_s24 = scalar_lea.hbm %s2666_s23, %s2217_s16  ;;  %s1708_s21 = scalar_lea.hbm %s2666_s23, 512 }
 0x12a   : > { %s1703_s4 = scalar_lea.hbm %s2383_s24, 256  ;;  %p1709_p13 = scmp.lt.u32.totalorder %s2383_s24, %s2666_s23 }
 0x12b   : > { %p1704_p7 = scmp.ne.s32.totalorder %s2383_s24, %s1703_s4  ;;  %p1710_p11 = scmp.lt.u32.totalorder %s1708_s21, %s1703_s4 }
 0x12c   : > { %p1712_p5 = scmp.lt.u32.totalorder %s1703_s4, %s2383_s24 }
 0x12d   : > { %p1706_p3 = pnand %p1704_p7, %p2664_p4  ;;  %p1711_p2 = por %p1710_p11, %p1709_p13 }
 0x12f   : > { %p1707_p12 = pneg %p1706_p3  ;;  %p1713_p1 = por %p1712_p5, %p1711_p2 }
 0x131   : > { %p1714_p10 = pnand %p1713_p1, %p1707_p12 }
 0x133   : > { %1717 = shalt.err (!%p1714_p10)
}
 0x134   : > { %s1718_s14 = scalar_lea.vmem %s2386_s6, 256  ;;  %s1891_s10 = smov [#allocation10]  }
 0x135   : > { %p1719_p0 = scmp.ne.s32.totalorder %s2386_s6, %s1718_s14  ;;  %s1723_s0 = sshll.u32 %s1891_s10, 4  ;;  %s1724_s0 = int_to_ptr.vmem [resolvable:$false] %s1723_s0 }
 0x136   : > { %s1725_s30 = scalar_lea.vmem %s1724_s0, 512  ;;  %p1726_p7 = scmp.lt.s32.totalorder %s2386_s6, %s1724_s0 }
 0x137   : > { %p1721_p6 = pnand %p1719_p0, %p2664_p4  ;;  %p1727_p3 = scmp.lt.s32.totalorder %s1725_s30, %s1718_s14 }
 0x139   : > { %p1722_p9 = pneg %p1721_p6  ;;  %p1728_p13 = por %p1727_p3, %p1726_p7 }
 0x13b   : > { %p1729_p11 = pnand %p1728_p13, %p1722_p9 }
 0x13d   : > { %1732 = shalt.err (!%p1729_p11)
}
 0x13e   : > { %1266 = dma.hbm_to_vmem [thread:$0]  (!%p2665_p8), %s2383_s24, 256, %s2386_s6, %s2232_s1, %s1884_s11, %s1884_s11, %s1885_s12  }
 0x13f   : > { %s2667_s27 = sld [smem:[#allocation32_spill]] }
 0x145   : > { %p2668_p4 = scmp.ne.s32.totalorder %s2667_s27, 0 }
 0x146   : > { %s2416_s2 = sand.u32 (!%p2668_p4), 1, %s1851_s13   ;;  %p2669_p12 = scmp.ne.s32.totalorder (!%p2668_p4), %s2634_s29, 0 }
 0x147   : > { %469 = sbr.rel (%p2668_p4) target bundleno = 907 (0x38b), region = 56  ;;  %s1145_s3 = sshll.u32 (!%p2668_p4), %s2416_s2, 5 }
 0x148   : > { %s472_s22 = scalar_lea.sflag (!%p2668_p4), [#allocation3], %s2416_s2  ;;  %s2420_s19 = scalar_lea.vmem (!%p2668_p4), [#allocation2], %s1145_s3 }
 0x14e   : > { %1806 = dma.done.wait (%p2669_p12), %s472_s22, 512  }
 0x14f   : > { %1808 = vsyncadd (%p2669_p12), %s472_s22, 4294966784  ;;  %s480_s1 = sand.u32 1, %s2011_s20   ;;  %s1146_s9 = sshll.u32 %s2416_s2, 3 }
 0x150   : > { %s481_s11 = scalar_lea.sflag [#allocation6], %s480_s1  ;;  %s484_s12 = scalar_lea.vmem [#allocation5], %s1146_s9 }
 0x151   : > { %1810 = dma.done.wait (%p2669_p12), %s481_s11, 128  }
 0x152   : > { %1812 = vsyncadd (%p2669_p12), %s481_s11, 4294967168  ;;  %s2670_s24 = sld [smem:[#allocation25_spill]]  ;;  %s2671_s26 = sld [smem:[#allocation37_spill]] }
 0x158   : > { %s491_s6 = sand.u32 1, %s2670_s24   ;;  %p2672_p8 = scmp.ne.s32.totalorder %s2671_s26, 0 }
 0x159   : > { %s2433_s4 = sshll.u32 %s491_s6, 4 }
 0x15a   : > { %s493_s5 = scalar_lea.vmem [#allocation7], %s2433_s4 }
 0x15b   : > { %1814 = dma.done.wait (%p2672_p8), %s481_s11, 256  }
 0x15c   : > { %1816 = vsyncadd (%p2672_p8), %s481_s11, 4294967040  ;;  %s499_s7 = scalar_lea.sflag [#allocation9], %s480_s1  ;;  %s502_s21 = scalar_lea.vmem [#allocation8], %s2433_s4 }
 0x15d   : > { %1818 = dma.done.wait (%p2672_p8), %s499_s7, 512  }
 0x15e   : > { %1820 = vsyncadd (%p2672_p8), %s499_s7, 4294966784  ;;  %s511_s29 = scalar_lea.vmem [#allocation10], %s2433_s4  ;;  %p2673_p2 = scmp.eq.s32.totalorder %s2011_s20, 0 }
 0x160   : > { %1822 = dma.done.wait (%p2673_p2), [#allocation12], 384   ;;  %p2674_p5 = pmov %p2673_p2 }
 0x161   : > { %p2675_p1 = pmov %p2673_p2 }
 0x162   : > { %1824 = vsyncadd (%p2674_p5), [#allocation12], 4294966912 }
 0x163   : > { %1826 = dma.done.wait (%p2675_p1), [#allocation15], 384   ;;  %p2676_p10 = pmov %p2675_p1 }
 0x164   : > { %v1892_v0 = vmov 0   ;;  %v1893_v1 = vmov 0.0   ;;  %vm1894_vm0 = vmmov 0   ;;  %v589_v2 = vld [vmem:[%s502_s21] sm:$0xff]  ;;  %v804_v4 = vld [vmem:[%s484_s12] sm:$0xff]  ;;  %vm827_vm1 = vcmask 1043456  }
 0x165   : > { %1828 = vsyncadd (%p2676_p10), [#allocation15], 4294966912  ;;  %1392 = vset.pattern.permute.xlu1 %v1892_v0  ;;  %1391 = vset.pattern.permute.xlu0 %v1892_v0  ;;  %v587_v3 = vld [vmem:[%s493_s5] sm:$0xff]  ;;  %v590_v5 = vld [vmem:[%s502_s21 + $0x8] sm:$0xff]  ;;  %v805_v7 = vpack.c.bf16 %v804_v4, %v804_v4  ;;  %vm823_vm2 = vcmask 64512   ;;  %s2677_s20 = sld [smem:[#allocation29_spill]]  ;;  %v647_v30 = vlaneseq }
 0x166   : > { %1204 = vmatprep.subr.bf16.mxu1 %v1893_v1  ;;  %1206 = vmatprep.mubr.msk.bf16.mxu1 %vm1894_vm0, %v1893_v1  ;;  %v588_v6 = vld [vmem:[%s493_s5 + $0x8] sm:$0xff]  ;;  %v583_v10 = vld [vmem:[%s2420_s19] sm:$0xff]  ;;  %v585_v16 = vld [vmem:[%s2420_s19 + $0x10] sm:$0xff]  ;;  %s1895_s14 = smov 127   ;;  %s1896_s10 = smov 126  }
 0x167   : > { %1186 = vmatprep.subr.bf16.mxu0 %v1893_v1  ;;  %1200 = vmatprep.mubr.msk.bf16.mxu0 %vm1894_vm0, %v1893_v1  ;;  %v829_v8 = vsel %vm827_vm1, %v805_v7, 0  ;;  %v1453_v9 = vld [vmem:[#allocation14] sm:$0xff]   ;;  %v586_v17 = vld [vmem:[%s2420_s19 + $0x18] sm:$0xff]  ;;  %v2463_v35 = vand.u32 127, %v647_v30  ;;  %s1897_s0 = smov 125   ;;  %s1898_s30 = smov 124  }
 0x168   : > { %607 = vperm.xlu1 %1392, %v589_v2   ;;  %593 = vperm.xlu0 %1391, %v587_v3   ;;  %v584_v11 = vld [vmem:[%s2420_s19 + $0x8] sm:$0xff]  ;;  %s1899_s27 = smov 123   ;;  %s1900_s3 = smov 122   ;;  %v740_v59 = vld [vmem:[#allocation13] sm:$0xff]  ;;  %v741_v60 = vld [vmem:[#allocation13 + $0x8] sm:$0xff]  ;;  %vm757_vm0 = vcmask 916480  }
 0x169   : > { %1205 = vmatpush3.bf16.msra.mxu1 %v829_v8  ;;  %v649_v40 = vadd.s32 128, %v2463_v35  ;;  %v806_v61 = vld [vmem:[#allocation16] sm:$0xff]  ;;  %v807_v62 = vld [vmem:[#allocation16 + $0x8] sm:$0xff]  ;;  %vm673_vm10 = vcmp.lt.s32.totalorder %v2463_v35, 127  ;;  %vm684_vm11 = vcmp.lt.s32.totalorder %v2463_v35, 126  ;;  %vm695_vm12 = vcmp.lt.s32.totalorder %v2463_v35, 125 }
 0x16a   : > { %v872_v63 = vld [vmem:[%s511_s29] sm:$0xff]  ;;  %v873_v0 = vld [vmem:[%s511_s29 + $0x8] sm:$0xff]  ;;  %vm706_vm13 = vcmp.lt.s32.totalorder %v2463_v35, 124  ;;  %vm717_vm14 = vcmp.lt.s32.totalorder %v2463_v35, 123  ;;  %vm728_vm15 = vcmp.lt.s32.totalorder %v2463_v35, 122  ;;  %s2678_s22 = sld [smem:[#allocation30_spill]] }
 0x16b   : > { %s1159_s15 = sshll.u32 %s2677_s20, 7  ;;  %s1154_s19 = sshll.u32 %s2416_s2, 4 }
 0x16c   : > { %612 = vperm.xlu1 %1392, %v590_v5   ;;  %598 = vperm.xlu0 %1391, %v588_v6   ;;  %s1160_s16 = sadd.s32 4294967293, %s1159_s15  ;;  %s581_s11 = scalar_lea.vmem [#allocation17], %s1154_s19 }
 0x16d   : > { %1207 = vmatmul.mubr.msk.bf16.vlgmr.msra.gmra.mrb[0].mxu1 %vm823_vm2, %v1453_v9  ;;  %v652_v41 = vstv %s1160_s16  ;;  %s905_s12 = sshll.u32 %s581_s11, 4  ;;  %s2679_s24 = sld [smem:[#allocation38_spill]]  ;;  %s2492_s12 = int_to_ptr.vmem [resolvable:$true] %s905_s12 }
 0x16e   : > { %v653_v42 = vadd.s32 %v652_v41, %v2463_v35  ;;  %v654_v43 = vadd.s32 %v652_v41, %v649_v40  ;;  %s2680_s5 = sld [smem:[#allocation48_spill]]  ;;  %s891_s21 = scalar_lea.sflag [#allocation4], %s2416_s2 }
 0x16f   : > { %s1733_s29 = scalar_lea.vmem %s2492_s12, 256 }
 0x170   : > { %vm655_vm3 = vcmp.ge.s32.totalorder %v653_v42, 0  ;;  %vm657_vm4 = vcmp.lt.s32.totalorder %v653_v42, 256  ;;  %vm656_vm5 = vcmp.ge.s32.totalorder %v654_v43, 0  ;;  %vm658_vm6 = vcmp.lt.s32.totalorder %v654_v43, 256  ;;  %s1169_s1 = sshll.u32 %s2678_s22, 2  ;;  %p1734_p0 = scmp.ne.s32.totalorder %s2492_s12, %s1733_s29 }
 0x171   : > { %vm659_vm7 = vmand %vm655_vm3, %vm657_vm4  ;;  %s902_s9 = sadd.s32 %s2677_s20, %s1169_s1  ;;  %s1901_s20 = smov [#allocation17]  }
 0x172   : > { %vm660_vm8 = vmand %vm656_vm5, %vm658_vm6  ;;  %s1170_s26 = sshll.u32 %s902_s9, 7  ;;  %s1737_s15 = sshll.u32 %s1901_s20, 4  ;;  %s1738_s15 = int_to_ptr.vmem [resolvable:$false] %s1737_s15 }
 0x173   : > { %vm1162_vm9 = vmpackc.low %vm659_vm7, %vm659_vm7  ;;  %p2681_p6 = scmp.ne.s32.totalorder %s2679_s24, 0  ;;  %s1739_s16 = scalar_lea.vmem %s1738_s15, 512 }
 0x174   : > { %s2497_s7 = scalar_lea.hbm %s2680_s5, %s1170_s26  ;;  %p1740_p3 = scmp.lt.s32.totalorder %s2492_s12, %s1738_s15 }
 0x175   : > { %p1735_p9 = pnand %p1734_p0, %p2681_p6  ;;  %p1741_p13 = scmp.lt.s32.totalorder %s1739_s16, %s1733_s29 }
 0x177   : > { %p1736_p7 = pneg %p1735_p9  ;;  %p1742_p11 = por %p1741_p13, %p1740_p3 }
 0x179   : > { %p1743_p4 = pnand %p1742_p11, %p1736_p7 }
 0x1e7   : > { %v608_v12 = vpop.permute.xlu1 %607  ;;  %v594_v13 = vpop.permute.xlu0 %593 }
 0x1e8   : > { %v601_v14 = vmul.f32 %v594_v13, %v583_v10  ;;  %v602_v15 = vmul.f32 %v594_v13, %v584_v11 }
 0x1ea   : > { %v615_v18 = vadd.f32 %v608_v12, %v601_v14  ;;  %v616_v19 = vadd.f32 %v608_v12, %v602_v15 }
 0x1eb   : > { %v599_v20 = vpop.permute.xlu0 %598  ;;  %v613_v25 = vpop.permute.xlu1 %612 }
 0x1ec   : > { %v1155_v21 = vmul.f32 -1.442695, %v615_v18  ;;  %v1156_v22 = vmul.f32 -1.442695, %v616_v19  ;;  %v603_v23 = vmul.f32 %v599_v20, %v585_v16  ;;  %v604_v24 = vmul.f32 %v599_v20, %v586_v17 }
 0x1ee   : > { %1455 = vpow2.f32 %v1155_v21  ;;  %v617_v26 = vadd.f32 %v613_v25, %v603_v23  ;;  %v618_v27 = vadd.f32 %v613_v25, %v604_v24 }
 0x1ef   : > { %1457 = vpow2.f32 %v1156_v22 }
 0x1f0   : > { %v1157_v28 = vmul.f32 -1.442695, %v617_v26  ;;  %v1158_v29 = vmul.f32 -1.442695, %v618_v27 }
 0x1f2   : > { %1459 = vpow2.f32 %v1157_v28 }
 0x1f3   : > { %1461 = vpow2.f32 %v1158_v29 }
 0x1f8   : > { %v1456_v31 = vpop.eup %1455 }
 0x1f9   : > { %v1458_v32 = vpop.eup %1457  ;;  %v631_v33 = vadd.f32 1.0, %v1456_v31 }
 0x1fa   : > { %v632_v34 = vadd.f32 1.0, %v1458_v32 }
 0x1fb   : > { %1463 = vrcp.f32 %v631_v33 }
 0x1fc   : > { %v1460_v36 = vpop.eup %1459  ;;  %1465 = vrcp.f32 %v632_v34 }
 0x1fd   : > { %v1462_v37 = vpop.eup %1461  ;;  %v633_v38 = vadd.f32 1.0, %v1460_v36 }
 0x1fe   : > { %v634_v39 = vadd.f32 1.0, %v1462_v37 }
 0x1ff   : > { %1467 = vrcp.f32 %v633_v38 }
 0x200   : > { %1469 = vrcp.f32 %v634_v39 }
 0x205   : > { %v1464_v44 = vpop.eup %1463 }
 0x206   : > { %v1466_v45 = vpop.eup %1465  ;;  %v643_v46 = vmul.f32 %v1464_v44, %v615_v18 }
 0x207   : > { %v644_v48 = vmul.f32 %v1466_v45, %v616_v19 }
 0x208   : > { %v661_v52 = vsel %vm659_vm7, %v643_v46, 0.0 }
 0x209   : > { %v1468_v47 = vpop.eup %1467  ;;  %v662_v55 = vsel %vm660_vm8, %v644_v48, 0.0 }
 0x20a   : > { %v1470_v49 = vpop.eup %1469  ;;  %v645_v50 = vmul.f32 %v1468_v47, %v617_v26 }
 0x20b   : > { %v646_v51 = vmul.f32 %v1470_v49, %v618_v27 }
 0x20c   : > { %v663_v53 = vsel %vm659_vm7, %v645_v50, 0.0  ;;  %v1163_v54 = vpack.c.bf16 %v645_v50, %v643_v46 }
 0x20d   : > { %v664_v56 = vsel %vm660_vm8, %v646_v51, 0.0  ;;  %v1393_v57 = vpack.i.bf16 %v663_v53, %v661_v52 }
 0x20e   : > { %1187 = vmatpush3.bf16.msk.msra.mxu0 %vm1162_vm9, %v1163_v54  ;;  %v1398_v58 = vpack.i.bf16 %v664_v56, %v662_v55 }
 0x20f   : > { %1394 = vrot.lane.b32.xlu0 %v1393_v57, %s1895_s14  ;;  %1188 = vmatprep.subr.bf16.mxu0 %v1893_v1 }
 0x210   : > { %1399 = vrot.lane.b32.xlu1 %v1398_v58, %s1895_s14 }
 0x213   : > { %1404 = vrot.lane.b32.xlu0 %v1393_v57, %s1896_s10 }
 0x214   : > { %1409 = vrot.lane.b32.xlu1 %v1398_v58, %s1896_s10 }
 0x217   : > { %1414 = vrot.lane.b32.xlu0 %v1393_v57, %s1897_s0 }
 0x218   : > { %1419 = vrot.lane.b32.xlu1 %v1398_v58, %s1897_s0 }
 0x21b   : > { %1424 = vrot.lane.b32.xlu0 %v1393_v57, %s1898_s30 }
 0x21c   : > { %1429 = vrot.lane.b32.xlu1 %v1398_v58, %s1898_s30 }
 0x21f   : > { %1434 = vrot.lane.b32.xlu0 %v1393_v57, %s1899_s27 }
 0x220   : > { %1439 = vrot.lane.b32.xlu1 %v1398_v58, %s1899_s27 }
 0x223   : > { %1444 = vrot.lane.b32.xlu0 %v1393_v57, %s1900_s3 }
 0x224   : > { %1449 = vrot.lane.b32.xlu1 %v1398_v58, %s1900_s3 }
 0x227   : > { %744 = vperm.xlu0 %1391, %v740_v59  }
 0x228   : > { %749 = vperm.xlu1 %1392, %v741_v60  }
 0x22b   : > { %810 = vperm.xlu0 %1391, %v806_v61   ;;  %v1454_v61 = vld [vmem:[#allocation11] sm:$0xff]  }
 0x22c   : > { %815 = vperm.xlu1 %1392, %v807_v62  }
 0x22f   : > { %876 = vperm.xlu0 %1391, %v872_v63  }
 0x230   : > { %881 = vperm.xlu1 %1392, %v873_v0  }
 0x240   : > { %v2472_v2 = vpop.f32.mrb[0].mxu1 }
 0x241   : > { %v1208_v3 = vpop.f32.mrb[1].mxu1 }
 0x242   : > { %v2474_v4 = vpop.f32.mrb[2].mxu1 }
 0x243   : > { %v1209_v5 = vpop.f32.mrb[3].mxu1 }
 0x281   : > { %v1395_v6 = vpop.permute.xlu0 %1394 }
 0x282   : > { %v1400_v7 = vpop.permute.xlu1 %1399  ;;  %v1397_v8 = vunpack.i.h.bf16 %v1395_v6  ;;  %v1396_v9 = vunpack.i.l.bf16 %v1395_v6 }
 0x283   : > { %v1402_v10 = vunpack.i.h.bf16 %v1400_v7  ;;  %v1401_v11 = vunpack.i.l.bf16 %v1400_v7 }
 0x285   : > { %v1405_v12 = vpop.permute.xlu0 %1404  ;;  %v674_v13 = vsel %vm673_vm10, %v1396_v9, %v1401_v11  ;;  %v675_v14 = vsel %vm673_vm10, %v1397_v8, %v1402_v10 }
 0x286   : > { %v1410_v15 = vpop.permute.xlu1 %1409  ;;  %v1407_v16 = vunpack.i.h.bf16 %v1405_v12  ;;  %v1406_v17 = vunpack.i.l.bf16 %v1405_v12  ;;  %v732_v18 = vpack.c.bf16 %v675_v14, %v674_v13 }
 0x287   : > { %v1412_v19 = vunpack.i.h.bf16 %v1410_v15  ;;  %v1411_v20 = vunpack.i.l.bf16 %v1410_v15 }
 0x288   : > { %1189 = vmatpush3.bf16.msra.mxu0 %v732_v18 }
 0x289   : > { %v1415_v21 = vpop.permute.xlu0 %1414  ;;  %1190 = vmatprep.subr.bf16.mxu0 %v1893_v1  ;;  %v685_v22 = vsel %vm684_vm11, %v1406_v17, %v1411_v20  ;;  %v686_v23 = vsel %vm684_vm11, %v1407_v16, %v1412_v19 }
 0x28a   : > { %v1420_v24 = vpop.permute.xlu1 %1419  ;;  %v1417_v25 = vunpack.i.h.bf16 %v1415_v21  ;;  %v1416_v26 = vunpack.i.l.bf16 %v1415_v21  ;;  %v733_v27 = vpack.c.bf16 %v686_v23, %v685_v22 }
 0x28b   : > { %v1422_v28 = vunpack.i.h.bf16 %v1420_v24  ;;  %v1421_v29 = vunpack.i.l.bf16 %v1420_v24 }
 0x28c   : > { %1191 = vmatpush3.bf16.msra.mxu0 %v733_v27 }
 0x28d   : > { %v1425_v30 = vpop.permute.xlu0 %1424  ;;  %1192 = vmatprep.subr.bf16.mxu0 %v1893_v1  ;;  %v696_v31 = vsel %vm695_vm12, %v1416_v26, %v1421_v29  ;;  %v697_v32 = vsel %vm695_vm12, %v1417_v25, %v1422_v28 }
 0x28e   : > { %v1430_v33 = vpop.permute.xlu1 %1429  ;;  %v1427_v34 = vunpack.i.h.bf16 %v1425_v30  ;;  %v1426_v36 = vunpack.i.l.bf16 %v1425_v30  ;;  %v734_v37 = vpack.c.bf16 %v697_v32, %v696_v31 }
 0x28f   : > { %v1432_v38 = vunpack.i.h.bf16 %v1430_v33  ;;  %v1431_v39 = vunpack.i.l.bf16 %v1430_v33 }
 0x290   : > { %1193 = vmatpush3.bf16.msra.mxu0 %v734_v37 }
 0x291   : > { %v1435_v40 = vpop.permute.xlu0 %1434  ;;  %1194 = vmatprep.subr.bf16.mxu0 %v1893_v1  ;;  %v707_v41 = vsel %vm706_vm13, %v1426_v36, %v1431_v39  ;;  %v708_v42 = vsel %vm706_vm13, %v1427_v34, %v1432_v38 }
 0x292   : > { %v1440_v43 = vpop.permute.xlu1 %1439  ;;  %v1437_v44 = vunpack.i.h.bf16 %v1435_v40  ;;  %v1436_v45 = vunpack.i.l.bf16 %v1435_v40  ;;  %v735_v46 = vpack.c.bf16 %v708_v42, %v707_v41 }
 0x293   : > { %v1442_v47 = vunpack.i.h.bf16 %v1440_v43  ;;  %v1441_v48 = vunpack.i.l.bf16 %v1440_v43 }
 0x294   : > { %1195 = vmatpush3.bf16.msra.mxu0 %v735_v46 }
 0x295   : > { %v1445_v49 = vpop.permute.xlu0 %1444  ;;  %1196 = vmatprep.subr.bf16.mxu0 %v1893_v1  ;;  %v718_v50 = vsel %vm717_vm14, %v1436_v45, %v1441_v48  ;;  %v719_v51 = vsel %vm717_vm14, %v1437_v44, %v1442_v47 }
 0x296   : > { %v1450_v52 = vpop.permute.xlu1 %1449  ;;  %v1447_v53 = vunpack.i.h.bf16 %v1445_v49  ;;  %v1446_v54 = vunpack.i.l.bf16 %v1445_v49  ;;  %v736_v55 = vpack.c.bf16 %v719_v51, %v718_v50 }
 0x297   : > { %v1452_v56 = vunpack.i.h.bf16 %v1450_v52  ;;  %v1451_v57 = vunpack.i.l.bf16 %v1450_v52 }
 0x298   : > { %1197 = vmatpush3.bf16.msra.mxu0 %v736_v55 }
 0x299   : > { %1198 = vmatprep.subr.bf16.mxu0 %v1893_v1  ;;  %v729_v58 = vsel %vm728_vm15, %v1446_v54, %v1451_v57  ;;  %v730_v59 = vsel %vm728_vm15, %v1447_v53, %v1452_v56 }
 0x29a   : > { %v737_v60 = vpack.c.bf16 %v730_v59, %v729_v58 }
 0x29c   : > { %1199 = vmatpush3.bf16.msra.mxu0 %v737_v60 }
 0x29f   : > { %1201 = vmatmul.mubr.msk.bf16.vlgmr.msra.gmra.mrb[0].mxu0 %vm757_vm0, %v1454_v61 }
 0x2a6   : > { %v745_v62 = vpop.permute.xlu0 %744 }
 0x2a7   : > { %v750_v63 = vpop.permute.xlu1 %749 }
 0x2aa   : > { %v811_v0 = vpop.permute.xlu0 %810 }
 0x2ab   : > { %v816_v35 = vpop.permute.xlu1 %815  ;;  %v866_v8 = vadd.f32 %v2472_v2, %v811_v0 }
 0x2ac   : > { %v869_v13 = vadd.f32 %v2474_v4, %v816_v35 }
 0x2ae   : > { %v877_v7 = vpop.permute.xlu0 %876 }
 0x2af   : > { %v882_v12 = vpop.permute.xlu1 %881 }
 0x372   : > { %v795_v3 = vpop.f32.mrb[0].mxu0 }
 0x373   : > { %v796_v5 = vadd.f32 %v795_v3, %v745_v62  ;;  %v1202_v6 = vpop.f32.mrb[1].mxu0 }
 0x374   : > { %v798_v1 = vpop.f32.mrb[2].mxu0 }
 0x375   : > { %v884_v9 = vmul.f32 %v877_v7, %v796_v5  ;;  %v799_v10 = vadd.f32 %v798_v1, %v750_v63  ;;  %v1203_v11 = vpop.f32.mrb[3].mxu0 }
 0x377   : > { %v886_v14 = vadd.f32 %v884_v9, %v866_v8  ;;  %v885_v15 = vmul.f32 %v882_v12, %v799_v10 }
 0x379   : > { %888 = vst [vmem:[%s581_s11] sm:$0xff] %v886_v14  ;;  %v887_v2 = vadd.f32 %v885_v15, %v869_v13 }
 0x37b   : > { %889 = vst [vmem:[%s581_s11 + $0x8] sm:$0xff] %v887_v2 }
 0x37c   : > { %1746 = shalt.err (!%p1743_p4)
}
 0x37d   : > { %s1747_s14 = scalar_lea.hbm %s2497_s7, 256  ;;  %s1751_s30 = scalar_lea.hbm %s2680_s5, 1024 }
 0x37e   : > { %p1748_p12 = scmp.ne.s32.totalorder %s2497_s7, %s1747_s14  ;;  %p1752_p5 = scmp.lt.u32.totalorder %s2497_s7, %s2680_s5 }
 0x37f   : > { %p1753_p1 = scmp.lt.u32.totalorder %s1751_s30, %s1747_s14  ;;  %p1755_p0 = scmp.lt.u32.totalorder %s1747_s14, %s2497_s7 }
 0x380   : > { %p1749_p8 = pnand %p1748_p12, %p2681_p6 }
 0x381   : > { %p1754_p10 = por %p1753_p1, %p1752_p5 }
 0x382   : > { %p1750_p2 = pneg %p1749_p8 }
 0x383   : > { %p1756_p9 = por %p1755_p0, %p1754_p10 }
 0x385   : > { %p1757_p7 = pnand %p1756_p9, %p1750_p2 }
 0x387   : > { %1760 = shalt.err (!%p1757_p7)
}
 0x388   : > { %s1902_s22 = smov 128   ;;  %s1903_s19 = smov 256  }
 0x389   : > { %s1904_s1 = smov 8  }
 0x38a   : > { %1236 = dma.vmem_to_hbm [thread:$0]  (%p2681_p6), %s2492_s12, 256, %s2497_s7, %s891_s21, %s1902_s22, %s1903_s19, %s1904_s1  }
 0x38b PF: > { %s2682_s9 = sld [smem:[#allocation31_spill]]  ;;  %s2683_s11 = sld [smem:[#allocation27_spill]] }
 0x38c   : > { %s2684_s26 = sld [smem:[#allocation39_spill]] }
 0x391   : > { %p1280_p3 = scmp.ge.s32.totalorder %s2682_s9, 2  ;;  %s920_s6 = sand.u32 1, %s2683_s11  }
 0x392   : > { %p2685_p13 = scmp.ne.s32.totalorder %s2684_s26, 0  ;;  %s921_s4 = scalar_lea.sflag [#allocation4], %s920_s6 }
 0x394   : > { %p1268_p11 = pnand %p1280_p3, %p2685_p13 }
 0x396   : > { %1830 = dma.done.wait (!%p1268_p11), %s921_s4, 256  }
 0x397   : > { %1832 = vsyncadd (!%p1268_p11), %s921_s4, 4294967040  ;;  %s33_s19 = sadd.s32 1, %s2682_s9   ;;  %s2686_s30 = sld [smem:[#allocation25_spill]] }
 0x398   : > { %p30_p4 = scmp.ge.s32.totalorder %s33_s19, 6   ;;  %s2687_s10 = sld [smem:[#allocation26_spill]] }
 0x399   : > { %s2688_s11 = sld [smem:[#allocation35_spill]]  ;;  %s2689_s2 = sld [smem:[#allocation28_spill]] }
 0x39a   : > { %s2690_s14 = sld [smem:[#allocation36_spill]]  ;;  %s2691_s24 = sld [smem:[#allocation33_spill]] }
 0x39b   : > { %s2692_s7 = sld [smem:[#allocation34_spill]]  ;;  %s2693_s12 = smov %s1851_s13 }
 0x39c   : > { %s2695_s15 = smov %s1867_s17  ;;  %s2696_s16 = smov %s1871_s18 }
 0x39d   :  { %32 = sbr.rel (!%p30_p4) target bundleno = 25 (0x19), region = 165 }
 0x39f   : > { %s2694_s13 = smov %s2689_s2 }
 0x3a0   : > { %s2697_s17 = smov %s2691_s24 }
 0x3a1   : > { %s2698_s18 = smov %s2692_s7 }
 0x3a4   :  { %926 = vsyncpa [#allocation3], 1 }
 0x3a5   :  { %928 = vsyncpa [#allocation3 + $0x1], 1 }
 0x3a6   :  { %929 = vsyncpa [#allocation6], 1 }
 0x3a7   :  { %931 = vsyncpa [#allocation6 + $0x1], 1 }
 0x3a8   :  { %932 = vsyncpa [#allocation9], 1 }
 0x3a9   :  { %934 = vsyncpa [#allocation9 + $0x1], 1 }
 0x3aa   :  { %935 = vsyncpa [#allocation12], 1 }
 0x3ab   :  { %936 = vsyncpa [#allocation15], 1 }
 0x3ac   :  { %937 = vsyncpa [#allocation4], 1 }
 0x3ad   :  { %939 = vsyncpa [#allocation4 + $0x1], 1 }

</bundles_post_ra>
